<compile_context>
chip_gen: v7x
topology: tpu7x:2x2x1
jax: 0.10.0
libtpu: 0.0.40
codegen_flags: <defaults>
</compile_context>

<pallas_src>
import functools

import jax
import jax.numpy as jnp
from jax import lax
from jax.experimental import pallas as pl
from jax.experimental.pallas import tpu as pltpu

NEG_SLOPE = 0.01          # nn.LeakyReLU default
TILE_P = 512              # rows per conv tile (review: 512-1024 ~ HBM roofline)
ATTN_TILE = 128           # q / kv tile for flash attention
VMEM_LIMIT = 48 * 1024 * 1024   # headroom below v7x's 64 MiB physical VMEM


def _round_up(x, m):
    return (x + m - 1) // m * m


def _pick_tile(dim, target):
    """Largest divisor of `dim` that is <= target and a multiple of 8."""
    for d in range(min(target, dim), 7, -1):
        if dim % d == 0 and d % 8 == 0:
            return d
    return dim


def _im2col3x3(x_nhwc):
    """(N, H, W, C) -> (N*H*W, 9*C): the 9 taps of a padded 3x3 conv stacked
    along channels so a single deep-K matmul against a (9*C, Cout) weight
    implements the convolution.
    TODO(synk): replace this materialized im2col (9x activation HBM traffic)
    with halo-band tiling + in-kernel tap shifts (manual DMA of H-row bands)."""
    N, H, W, C = x_nhwc.shape
    xp = jnp.pad(x_nhwc, ((0, 0), (1, 1), (1, 1), (0, 0)))
    taps = [xp[:, kh:kh + H, kw:kw + W, :] for kh in range(3) for kw in range(3)]
    return jnp.concatenate(taps, axis=-1).reshape(N * H * W, 9 * C)


# ---------------------------------------------------------------------------
# Conv kernels: one deep-K matmul + folded BN + LeakyReLU (+ residual branch).
# Argument order: row-tiled refs first, then resident (constant-block) refs.
# ---------------------------------------------------------------------------
def _conv_bn_lrelu_kernel(cols_ref, w_ref, scale_ref, shift_ref, o_ref):
    acc = jnp.dot(cols_ref[...], w_ref[...], preferred_element_type=jnp.float32)
    acc = acc * scale_ref[...] + shift_ref[...]          # BN(eval) + folded bias
    o_ref[...] = jnp.where(acc >= 0, acc, NEG_SLOPE * acc).astype(o_ref.dtype)


def _conv_bn_lrelu_resproj_kernel(cols_ref, xres_ref, w_ref, scale_ref,
                                  shift_ref, wr_ref, br_ref, o_ref):
    acc = jnp.dot(cols_ref[...], w_ref[...], preferred_element_type=jnp.float32)
    acc = acc * scale_ref[...] + shift_ref[...]
    acc = jnp.where(acc >= 0, acc, NEG_SLOPE * acc)
    res = jnp.dot(xres_ref[...], wr_ref[...],
                  preferred_element_type=jnp.float32) + br_ref[...]
    o_ref[...] = (acc + res).astype(o_ref.dtype)


def _conv_bn_lrelu_resid_kernel(cols_ref, xres_ref, w_ref, scale_ref,
                                shift_ref, o_ref):
    acc = jnp.dot(cols_ref[...], w_ref[...], preferred_element_type=jnp.float32)
    acc = acc * scale_ref[...] + shift_ref[...]
    acc = jnp.where(acc >= 0, acc, NEG_SLOPE * acc)
    o_ref[...] = (acc + xres_ref[...]).astype(o_ref.dtype)   # identity residual


def _run_conv(kernel, row_args, const_args, cout, out_dtype):
    """Run `kernel` tiled over rows.  row_args: (P, ?) arrays tiled with the
    output; const_args: weights / per-channel vectors kept resident."""
    P = row_args[0].shape[0]
    tile = TILE_P if P >= TILE_P else _round_up(P, 16)
    P_pad = _round_up(P, tile)
    if P_pad != P:
        row_args = [jnp.pad(a, ((0, P_pad - P), (0, 0))) for a in row_args]

    row_specs = [pl.BlockSpec((tile, a.shape[1]), lambda i: (i, 0))
                 for a in row_args]
    const_specs = [pl.BlockSpec(c.shape, lambda i, nd=c.ndim: (0,) * nd)
                   for c in const_args]

    out = pl.pallas_call(
        kernel,
        out_shape=jax.ShapeDtypeStruct((P_pad, cout), out_dtype),
        grid=(P_pad // tile,),
        in_specs=row_specs + const_specs,
        out_specs=pl.BlockSpec((tile, cout), lambda i: (i, 0)),
        compiler_params=pltpu.CompilerParams(
            dimension_semantics=("parallel",),
            vmem_limit_bytes=VMEM_LIMIT),
    )(*row_args, *const_args)
    return out[:P]


# ---------------------------------------------------------------------------
# SelfAttention: flash-style kernel, grid (batch, q-tile, kv-tile), online
# softmax in VMEM scratch.  No (HW, HW) energy matrix is materialized.
# ---------------------------------------------------------------------------
def _flash_attention_kernel(xq_ref, xkv_ref, wq_ref, bq_ref, wk_ref, bk_ref,
                            wv_ref, bv_ref, gamma_ref, o_ref,
                            q_sc, m_sc, l_sc, acc_sc):
    kv = pl.program_id(2)

    @pl.when(kv == 0)
    def _():
        xq = xq_ref[0].astype(jnp.bfloat16)
        q_sc[...] = (jnp.dot(xq, wq_ref[...],
                             preferred_element_type=jnp.float32) + bq_ref[...])
        m_sc[...] = jnp.full(m_sc.shape, -jnp.inf, m_sc.dtype)
        l_sc[...] = jnp.zeros(l_sc.shape, l_sc.dtype)
        acc_sc[...] = jnp.zeros(acc_sc.shape, acc_sc.dtype)

    xkv = xkv_ref[0].astype(jnp.bfloat16)                       # (tk, C)
    k = jnp.dot(xkv, wk_ref[...], preferred_element_type=jnp.float32) + bk_ref[...]
    v = jnp.dot(xkv, wv_ref[...], preferred_element_type=jnp.float32) + bv_ref[...]

    # energy[i, j] = <q_i, k_j>  (no 1/sqrt(d) scaling — matches the module)
    s = lax.dot_general(q_sc[...], k, (((1,), (1,)), ((), ())),
                        preferred_element_type=jnp.float32)     # (tq, tk)

    m_prev = m_sc[...]
    m_new = jnp.maximum(m_prev, jnp.max(s, axis=-1, keepdims=True))
    alpha = jnp.exp(m_prev - m_new)
    p = jnp.exp(s - m_new)
    l_sc[...] = alpha * l_sc[...] + jnp.sum(p, axis=-1, keepdims=True)
    acc_sc[...] = alpha * acc_sc[...] + jnp.dot(
        p.astype(jnp.bfloat16), v.astype(jnp.bfloat16),
        preferred_element_type=jnp.float32)
    m_sc[...] = m_new

    @pl.when(kv == pl.num_programs(2) - 1)
    def _():
        out = acc_sc[...] * pl.reciprocal(l_sc[...], approx=True)
        o_ref[0] = (gamma_ref[...] * out + xq_ref[0]).astype(o_ref.dtype)


def _self_attention(x_flat, wq, bq, wk, bk, wv, bv, gamma_row):
    N, HW, C = x_flat.shape
    C8 = wq.shape[-1]
    tq = _pick_tile(HW, ATTN_TILE)
    tk = _pick_tile(HW, ATTN_TILE)

    qmap = lambda b, qi, ki: (b, qi, 0)
    kmap = lambda b, qi, ki: (b, ki, 0)
    cmap = lambda b, qi, ki: (0, 0)

    return pl.pallas_call(
        _flash_attention_kernel,
        out_shape=jax.ShapeDtypeStruct((N, HW, C), jnp.float32),
        grid=(N, HW // tq, HW // tk),
        in_specs=[
            pl.BlockSpec((1, tq, C), qmap),       # x: query tile / residual
            pl.BlockSpec((1, tk, C), kmap),       # x: key/value tile
            pl.BlockSpec(wq.shape, cmap), pl.BlockSpec(bq.shape, cmap),
            pl.BlockSpec(wk.shape, cmap), pl.BlockSpec(bk.shape, cmap),
            pl.BlockSpec(wv.shape, cmap), pl.BlockSpec(bv.shape, cmap),
            pl.BlockSpec(gamma_row.shape, cmap),
        ],
        out_specs=pl.BlockSpec((1, tq, C), qmap),
        scratch_shapes=[
            pltpu.VMEM((tq, C8), jnp.float32),    # q tile
            pltpu.VMEM((tq, 1), jnp.float32),     # running max
            pltpu.VMEM((tq, 1), jnp.float32),     # running sum
            pltpu.VMEM((tq, C), jnp.float32),     # output accumulator
        ],
        compiler_params=pltpu.CompilerParams(
            dimension_semantics=("parallel", "parallel", "arbitrary"),
            vmem_limit_bytes=VMEM_LIMIT),
    )(x_flat, x_flat, wq, bq, wk, bk, wv, bv, gamma_row)


# ---------------------------------------------------------------------------
# Forward wrapper (NCHW in / NCHW out, like the PyTorch module)
# ---------------------------------------------------------------------------
@functools.partial(jax.jit, static_argnames=("use_attention",))
def _conv_block_impl(x_nchw, p, use_attention):
    x = jnp.transpose(x_nchw, (0, 2, 3, 1)).astype(jnp.float32)     # NHWC
    N, H, W, Cin = x.shape
    w1 = p["w1"]                  # (3,3,Cin,Cout) == torch weight.permute(2,3,1,0)
    Cout = w1.shape[-1]
    P = N * H * W

    # Fold conv bias into the eval-mode BN affine:  y = conv*scale + shift'
    shift1 = p["bn1_shift"] + p["b1"] * p["bn1_scale"]
    shift2 = p["bn2_shift"] + p["b2"] * p["bn2_scale"]

    # bf16 MXU operands; f32 accumulation + f32 element-wise post-ops.
    w1_2d = w1.reshape(9 * Cin, Cout).astype(jnp.bfloat16)
    w2_2d = p["w2"].reshape(9 * Cout, Cout).astype(jnp.bfloat16)
    x_bf = x.astype(jnp.bfloat16)

    # conv1 -> BN -> LeakyReLU   (Dropout2d == identity in eval)
    cols1 = _im2col3x3(x_bf)                                        # (P, 9*Cin)
    h1 = _run_conv(_conv_bn_lrelu_kernel, [cols1],
                   [w1_2d, p["bn1_scale"], shift1], Cout, jnp.bfloat16)
    h1 = h1.reshape(N, H, W, Cout)

    # conv2 -> BN -> LeakyReLU  (+ residual branch on the original input)
    cols2 = _im2col3x3(h1)                                          # (P, 9*Cout)
    if Cin != Cout:
        xres = x_bf.reshape(P, Cin)
        out = _run_conv(_conv_bn_lrelu_resproj_kernel, [cols2, xres],
                        [w2_2d, p["bn2_scale"], shift2,
                         p["wr"].astype(jnp.bfloat16), p["br"]],
                        Cout, jnp.float32)
    else:
        xres = x.reshape(P, Cout)                    # identity residual (exact)
        out = _run_conv(_conv_bn_lrelu_resid_kernel, [cols2, xres],
                        [w2_2d, p["bn2_scale"], shift2], Cout, jnp.float32)

    out = out.reshape(N, H * W, Cout)

    if use_attention:
        gamma_row = jnp.broadcast_to(p["gamma"].reshape(1, 1), (1, Cout))
        out = _self_attention(out,
                              p["wq"].astype(jnp.bfloat16), p["bq"],
                              p["wk"].astype(jnp.bfloat16), p["bk"],
                              p["wv"].astype(jnp.bfloat16), p["bv"],
                              gamma_row)

    out = out.reshape(N, H, W, Cout)
    return jnp.transpose(out, (0, 3, 1, 2))                          # NCHW


def conv_block_forward(x_nchw, params):
    arrays = {k: v for k, v in params.items() if k != "use_attention"}
    return _conv_block_impl(x_nchw, arrays,
                            use_attention=bool(params["use_attention"]))


# ---------------------------------------------------------------------------
# Pure-JAX f32 reference (independent conv via lax.conv_general_dilated)
# ---------------------------------------------------------------------------
def _ref_forward(x_nchw, params):
    x = jnp.transpose(x_nchw, (0, 2, 3, 1)).astype(jnp.float32)
    N, H, W, Cin = x.shape
    Cout = params["w1"].shape[-1]
    lrelu = lambda v: jnp.where(v >= 0, v, NEG_SLOPE * v)

    def conv3(xin, w, b):
        y = lax.conv_general_dilated(
            xin, w, window_strides=(1, 1), padding="SAME",
            dimension_numbers=("NHWC", "HWIO", "NHWC"))
        return y + b

    h = lrelu(conv3(x, params["w1"], params["b1"]) * params["bn1_scale"]
              + params["bn1_shift"])
    h2 = lrelu(conv3(h, params["w2"], params["b2"]) * params["bn2_scale"]
               + params["bn2_shift"])
    res = (jnp.einsum("nhwc,cd->nhwd", x, params["wr"]) + params["br"]
           if Cin != Cout else x)
    out = (h2 + res).reshape(N, H * W, Cout)
    if params["use_attention"]:
        q = out @ params["wq"] + params["bq"]
        k = out @ params["wk"] + params["bk"]
        v = out @ params["wv"] + params["bv"]
        energy = jnp.einsum("bic,bjc->bij", q, k)
        att = jax.nn.softmax(energy, axis=-1)
        out = params["gamma"].reshape(()) * jnp.einsum("bij,bjc->bic", att, v) + out
    return jnp.transpose(out.reshape(N, H, W, Cout), (0, 3, 1, 2))


if __name__ == "__main__":
    bn_eps = 1e-5

    def bn_fold(w, b, mean, var):
        scale = w / jnp.sqrt(var + bn_eps)
        shift = b - mean * scale
        return scale.reshape(1, -1), shift.reshape(1, -1)

    def make_params(key, Cin, Cout, use_attention):
        C8 = max(Cout // 8, 1)
        ks = jax.random.split(key, 24)
        rnd = lambda k, shape, s=0.1: s * jax.random.normal(k, shape, jnp.float32)
        bn1_scale, bn1_shift = bn_fold(1.0 + rnd(ks[2], (Cout,)), rnd(ks[3], (Cout,)),
                                       rnd(ks[4], (Cout,)),
                                       1.0 + jnp.abs(rnd(ks[5], (Cout,))))
        bn2_scale, bn2_shift = bn_fold(1.0 + rnd(ks[8], (Cout,)), rnd(ks[9], (Cout,)),
                                       rnd(ks[10], (Cout,)),
                                       1.0 + jnp.abs(rnd(ks[11], (Cout,))))
        p = dict(
            # torch conv weight (Cout, Cin, 3, 3) -> stored as (3, 3, Cin, Cout)
            w1=rnd(ks[0], (3, 3, Cin, Cout)), b1=rnd(ks[1], (1, Cout)),
            bn1_scale=bn1_scale, bn1_shift=bn1_shift,
            w2=rnd(ks[6], (3, 3, Cout, Cout)), b2=rnd(ks[7], (1, Cout)),
            bn2_scale=bn2_scale, bn2_shift=bn2_shift,
            use_attention=use_attention,
        )
        if Cin != Cout:
            p["wr"] = rnd(ks[12], (Cin, Cout))      # torch 1x1 conv weight^T
            p["br"] = rnd(ks[13], (1, Cout))
        if use_attention:
            p.update(
                wq=rnd(ks[14], (Cout, C8)), bq=rnd(ks[15], (1, C8)),
                wk=rnd(ks[16], (Cout, C8)), bk=rnd(ks[17], (1, C8)),
                wv=rnd(ks[18], (Cout, Cout)), bv=rnd(ks[19], (1, Cout)),
                # torch initializes gamma to 0; nonzero here so the attention
                # branch actually contributes numerically in this test.
                gamma=jnp.full((1, 1), 0.1, jnp.float32),
            )
        return p, ks[20]

    key = jax.random.PRNGKey(0)
    configs = [
        # projection residual + attention (flash kernel runs 2 kv steps)
        dict(N=2, Cin=4, Cout=8, H=16, W=16, use_attention=True),
        # identity residual, no attention, non-divisible P (exercises padding)
        dict(N=2, Cin=8, Cout=8, H=20, W=20, use_attention=False),
    ]
    for cfg in configs:
        key, sub = jax.random.split(key)
        params, xkey = make_params(sub, cfg["Cin"], cfg["Cout"],
                                   cfg["use_attention"])
        x = jax.random.normal(xkey, (cfg["N"], cfg["Cin"], cfg["H"], cfg["W"]),
                              jnp.float32)
        out = jax.block_until_ready(conv_block_forward(x, params))
        ref = jax.block_until_ready(_ref_forward(x, params))
        assert out.shape == (cfg["N"], cfg["Cout"], cfg["H"], cfg["W"]), out.shape
        # bf16 MXU operands (f32 accumulation) vs. pure-f32 reference.
        err = float(jnp.max(jnp.abs(out - ref)))
        assert jnp.allclose(out, ref, atol=3e-2, rtol=3e-2), err
    print("KERNEL_OK")
</pallas_src>

<mosaic_0001>
module attributes {stable_mosaic.version = 11 : i64} {
  func.func @_conv_bn_lrelu_kernel(%arg0: i32, %arg1: memref<512x36xbf16, #tpu.memory_space<vmem>>, %arg2: memref<36x8xbf16, #tpu.memory_space<vmem>>, %arg3: memref<1x8xf32, #tpu.memory_space<vmem>>, %arg4: memref<1x8xf32, #tpu.memory_space<vmem>>, %arg5: memref<512x8xbf16, #tpu.memory_space<vmem>>) attributes {dimension_semantics = [#tpu.dimension_semantics<parallel>], iteration_bounds = array<i64: 1>, scalar_prefetch = 0 : i64, scratch_operands = 0 : i64, tpu.core_type = #tpu.core_type<tc>, window_params = [{transform_indices = @transform_0, window_bounds = array<i64: 512, 36>}, {pipeline_mode = #tpu.pipeline_mode<synchronous>, transform_indices = @transform_1, window_bounds = array<i64: 36, 8>}, {pipeline_mode = #tpu.pipeline_mode<synchronous>, transform_indices = @transform_2, window_bounds = array<i64: 1, 8>}, {pipeline_mode = #tpu.pipeline_mode<synchronous>, transform_indices = @transform_3, window_bounds = array<i64: 1, 8>}, {transform_indices = @transform_4, window_bounds = array<i64: 512, 8>}]} {
    %c0 = arith.constant 0 : index
    %c0_0 = arith.constant 0 : index
    %0 = vector.load %arg1[%c0, %c0_0] : memref<512x36xbf16, #tpu.memory_space<vmem>>, vector<512x36xbf16>
    %c0_1 = arith.constant 0 : index
    %c0_2 = arith.constant 0 : index
    %1 = vector.load %arg2[%c0_1, %c0_2] : memref<36x8xbf16, #tpu.memory_space<vmem>>, vector<36x8xbf16>
    %cst = arith.constant dense<0.000000e+00> : vector<512x8xf32>
    %2 = tpu.matmul %0, %1, %cst {dimension_numbers = #tpu.dot_dimension_numbers<[1], [0], [0], [1], [0, 0, 1, 1], [], []>} : vector<512x36xbf16>, vector<36x8xbf16>, vector<512x8xf32> -> vector<512x8xf32>
    %c0_3 = arith.constant 0 : index
    %c0_4 = arith.constant 0 : index
    %3 = vector.load %arg3[%c0_3, %c0_4] : memref<1x8xf32, #tpu.memory_space<vmem>>, vector<1x8xf32>
    %4 = vector.broadcast %3 : vector<1x8xf32> to vector<512x8xf32>
    %5 = arith.mulf %2, %4 : vector<512x8xf32>
    %c0_5 = arith.constant 0 : index
    %c0_6 = arith.constant 0 : index
    %6 = vector.load %arg4[%c0_5, %c0_6] : memref<1x8xf32, #tpu.memory_space<vmem>>, vector<1x8xf32>
    %7 = vector.broadcast %6 : vector<1x8xf32> to vector<512x8xf32>
    %8 = arith.addf %5, %7 : vector<512x8xf32>
    %cst_7 = arith.constant 0.000000e+00 : f32
    %9 = vector.broadcast %cst_7 : f32 to vector<512x8xf32>
    %10 = arith.cmpf oge, %8, %9 : vector<512x8xf32>
    %cst_8 = arith.constant 0.00999999977 : f32
    %11 = vector.broadcast %cst_8 : f32 to vector<512x8xf32>
    %12 = arith.mulf %11, %8 : vector<512x8xf32>
    %13 = arith.select %10, %8, %12 : vector<512x8xi1>, vector<512x8xf32>
    %14 = arith.truncf %13 : vector<512x8xf32> to vector<512x8xbf16>
    %c0_9 = arith.constant 0 : index
    %c0_10 = arith.constant 0 : index
    %15 = vector.load %arg5[%c0_9, %c0_10] : memref<512x8xbf16, #tpu.memory_space<vmem>>, vector<512x8xbf16>
    tpu.vector_store %arg5[%c0_9, %c0_10], %14 {strides = array<i32>} : memref<512x8xbf16, #tpu.memory_space<vmem>>, vector<512x8xbf16>,
    return
  }
  func.func @transform_0(%arg0: i32) -> (i32, i32) {
    %c0_i32 = arith.constant 0 : i32
    %c0_i32_0 = arith.constant 0 : i32
    return %arg0, %c0_i32 : i32, i32
  }
  func.func @transform_1(%arg0: i32) -> (i32, i32) {
    %c0_i32 = arith.constant 0 : i32
    %c0_i32_0 = arith.constant 0 : i32
    %c0_i32_1 = arith.constant 0 : i32
    return %c0_i32, %c0_i32_0 : i32, i32
  }
  func.func @transform_2(%arg0: i32) -> (i32, i32) {
    %c0_i32 = arith.constant 0 : i32
    %c0_i32_0 = arith.constant 0 : i32
    %c0_i32_1 = arith.constant 0 : i32
    return %c0_i32, %c0_i32_0 : i32, i32
  }
  func.func @transform_3(%arg0: i32) -> (i32, i32) {
    %c0_i32 = arith.constant 0 : i32
    %c0_i32_0 = arith.constant 0 : i32
    %c0_i32_1 = arith.constant 0 : i32
    return %c0_i32, %c0_i32_0 : i32, i32
  }
  func.func @transform_4(%arg0: i32) -> (i32, i32) {
    %c0_i32 = arith.constant 0 : i32
    %c0_i32_0 = arith.constant 0 : i32
    return %arg0, %c0_i32 : i32, i32
  }
}

module attributes {stable_mosaic.version = 11 : i64} {
  func.func @_conv_bn_lrelu_resproj_kernel(%arg0: i32, %arg1: memref<512x72xbf16, #tpu.memory_space<vmem>>, %arg2: memref<512x4xbf16, #tpu.memory_space<vmem>>, %arg3: memref<72x8xbf16, #tpu.memory_space<vmem>>, %arg4: memref<1x8xf32, #tpu.memory_space<vmem>>, %arg5: memref<1x8xf32, #tpu.memory_space<vmem>>, %arg6: memref<4x8xbf16, #tpu.memory_space<vmem>>, %arg7: memref<1x8xf32, #tpu.memory_space<vmem>>, %arg8: memref<512x8xf32, #tpu.memory_space<vmem>>) attributes {dimension_semantics = [#tpu.dimension_semantics<parallel>], iteration_bounds = array<i64: 1>, scalar_prefetch = 0 : i64, scratch_operands = 0 : i64, tpu.core_type = #tpu.core_type<tc>, window_params = [{transform_indices = @transform_0, window_bounds = array<i64: 512, 72>}, {transform_indices = @transform_1, window_bounds = array<i64: 512, 4>}, {pipeline_mode = #tpu.pipeline_mode<synchronous>, transform_indices = @transform_2, window_bounds = array<i64: 72, 8>}, {pipeline_mode = #tpu.pipeline_mode<synchronous>, transform_indices = @transform_3, window_bounds = array<i64: 1, 8>}, {pipeline_mode = #tpu.pipeline_mode<synchronous>, transform_indices = @transform_4, window_bounds = array<i64: 1, 8>}, {pipeline_mode = #tpu.pipeline_mode<synchronous>, transform_indices = @transform_5, window_bounds = array<i64: 4, 8>}, {pipeline_mode = #tpu.pipeline_mode<synchronous>, transform_indices = @transform_6, window_bounds = array<i64: 1, 8>}, {transform_indices = @transform_7, window_bounds = array<i64: 512, 8>}]} {
    %c0 = arith.constant 0 : index
    %c0_0 = arith.constant 0 : index
    %0 = vector.load %arg1[%c0, %c0_0] : memref<512x72xbf16, #tpu.memory_space<vmem>>, vector<512x72xbf16>
    %c0_1 = arith.constant 0 : index
    %c0_2 = arith.constant 0 : index
    %1 = vector.load %arg3[%c0_1, %c0_2] : memref<72x8xbf16, #tpu.memory_space<vmem>>, vector<72x8xbf16>
    %cst = arith.constant dense<0.000000e+00> : vector<512x8xf32>
    %2 = tpu.matmul %0, %1, %cst {dimension_numbers = #tpu.dot_dimension_numbers<[1], [0], [0], [1], [0, 0, 1, 1], [], []>} : vector<512x72xbf16>, vector<72x8xbf16>, vector<512x8xf32> -> vector<512x8xf32>
    %c0_3 = arith.constant 0 : index
    %c0_4 = arith.constant 0 : index
    %3 = vector.load %arg4[%c0_3, %c0_4] : memref<1x8xf32, #tpu.memory_space<vmem>>, vector<1x8xf32>
    %4 = vector.broadcast %3 : vector<1x8xf32> to vector<512x8xf32>
    %5 = arith.mulf %2, %4 : vector<512x8xf32>
    %c0_5 = arith.constant 0 : index
    %c0_6 = arith.constant 0 : index
    %6 = vector.load %arg5[%c0_5, %c0_6] : memref<1x8xf32, #tpu.memory_space<vmem>>, vector<1x8xf32>
    %7 = vector.broadcast %6 : vector<1x8xf32> to vector<512x8xf32>
    %8 = arith.addf %5, %7 : vector<512x8xf32>
    %cst_7 = arith.constant 0.000000e+00 : f32
    %9 = vector.broadcast %cst_7 : f32 to vector<512x8xf32>
    %10 = arith.cmpf oge, %8, %9 : vector<512x8xf32>
    %cst_8 = arith.constant 0.00999999977 : f32
    %11 = vector.broadcast %cst_8 : f32 to vector<512x8xf32>
    %12 = arith.mulf %11, %8 : vector<512x8xf32>
    %13 = arith.select %10, %8, %12 : vector<512x8xi1>, vector<512x8xf32>
    %c0_9 = arith.constant 0 : index
    %c0_10 = arith.constant 0 : index
    %14 = vector.load %arg2[%c0_9, %c0_10] : memref<512x4xbf16, #tpu.memory_space<vmem>>, vector<512x4xbf16>
    %c0_11 = arith.constant 0 : index
    %c0_12 = arith.constant 0 : index
    %15 = vector.load %arg6[%c0_11, %c0_12] : memref<4x8xbf16, #tpu.memory_space<vmem>>, vector<4x8xbf16>
    %cst_13 = arith.constant dense<0.000000e+00> : vector<512x8xf32>
    %16 = tpu.matmul %14, %15, %cst_13 {dimension_numbers = #tpu.dot_dimension_numbers<[1], [0], [0], [1], [0, 0, 1, 1], [], []>} : vector<512x4xbf16>, vector<4x8xbf16>, vector<512x8xf32> -> vector<512x8xf32>
    %c0_14 = arith.constant 0 : index
    %c0_15 = arith.constant 0 : index
    %17 = vector.load %arg7[%c0_14, %c0_15] : memref<1x8xf32, #tpu.memory_space<vmem>>, vector<1x8xf32>
    %18 = vector.broadcast %17 : vector<1x8xf32> to vector<512x8xf32>
    %19 = arith.addf %16, %18 : vector<512x8xf32>
    %20 = arith.addf %13, %19 : vector<512x8xf32>
    %c0_16 = arith.constant 0 : index
    %c0_17 = arith.constant 0 : index
    %21 = vector.load %arg8[%c0_16, %c0_17] : memref<512x8xf32, #tpu.memory_space<vmem>>, vector<512x8xf32>
    tpu.vector_store %arg8[%c0_16, %c0_17], %20 {strides = array<i32>} : memref<512x8xf32, #tpu.memory_space<vmem>>, vector<512x8xf32>,
    return
  }
  func.func @transform_0(%arg0: i32) -> (i32, i32) {
    %c0_i32 = arith.constant 0 : i32
    %c0_i32_0 = arith.constant 0 : i32
    return %arg0, %c0_i32 : i32, i32
  }
  func.func @transform_1(%arg0: i32) -> (i32, i32) {
    %c0_i32 = arith.constant 0 : i32
    %c0_i32_0 = arith.constant 0 : i32
    return %arg0, %c0_i32 : i32, i32
  }
  func.func @transform_2(%arg0: i32) -> (i32, i32) {
    %c0_i32 = arith.constant 0 : i32
    %c0_i32_0 = arith.constant 0 : i32
    %c0_i32_1 = arith.constant 0 : i32
    return %c0_i32, %c0_i32_0 : i32, i32
  }
  func.func @transform_3(%arg0: i32) -> (i32, i32) {
    %c0_i32 = arith.constant 0 : i32
    %c0_i32_0 = arith.constant 0 : i32
    %c0_i32_1 = arith.constant 0 : i32
    return %c0_i32, %c0_i32_0 : i32, i32
  }
  func.func @transform_4(%arg0: i32) -> (i32, i32) {
    %c0_i32 = arith.constant 0 : i32
    %c0_i32_0 = arith.constant 0 : i32
    %c0_i32_1 = arith.constant 0 : i32
    return %c0_i32, %c0_i32_0 : i32, i32
  }
  func.func @transform_5(%arg0: i32) -> (i32, i32) {
    %c0_i32 = arith.constant 0 : i32
    %c0_i32_0 = arith.constant 0 : i32
    %c0_i32_1 = arith.constant 0 : i32
    return %c0_i32, %c0_i32_0 : i32, i32
  }
  func.func @transform_6(%arg0: i32) -> (i32, i32) {
    %c0_i32 = arith.constant 0 : i32
    %c0_i32_0 = arith.constant 0 : i32
    %c0_i32_1 = arith.constant 0 : i32
    return %c0_i32, %c0_i32_0 : i32, i32
  }
  func.func @transform_7(%arg0: i32) -> (i32, i32) {
    %c0_i32 = arith.constant 0 : i32
    %c0_i32_0 = arith.constant 0 : i32
    return %arg0, %c0_i32 : i32, i32
  }
}

module attributes {stable_mosaic.version = 11 : i64} {
  func.func @_flash_attention_kernel(%arg0: i32, %arg1: i32, %arg2: i32, %arg3: memref<1x128x8xf32, #tpu.memory_space<vmem>>, %arg4: memref<1x128x8xf32, #tpu.memory_space<vmem>>, %arg5: memref<8x1xbf16, #tpu.memory_space<vmem>>, %arg6: memref<1x1xf32, #tpu.memory_space<vmem>>, %arg7: memref<8x1xbf16, #tpu.memory_space<vmem>>, %arg8: memref<1x1xf32, #tpu.memory_space<vmem>>, %arg9: memref<8x8xbf16, #tpu.memory_space<vmem>>, %arg10: memref<1x8xf32, #tpu.memory_space<vmem>>, %arg11: memref<1x8xf32, #tpu.memory_space<vmem>>, %arg12: memref<1x128x8xf32, #tpu.memory_space<vmem>>, %arg13: memref<128x1xf32, #tpu.memory_space<vmem>>, %arg14: memref<128x1xf32, #tpu.memory_space<vmem>>, %arg15: memref<128x1xf32, #tpu.memory_space<vmem>>, %arg16: memref<128x8xf32, #tpu.memory_space<vmem>>) attributes {dimension_semantics = [#tpu.dimension_semantics<parallel>, #tpu.dimension_semantics<parallel>, #tpu.dimension_semantics<arbitrary>], iteration_bounds = array<i64: 2, 2, 2>, scalar_prefetch = 0 : i64, scratch_operands = 4 : i64, tpu.core_type = #tpu.core_type<tc>, window_params = [{transform_indices = @transform_0, window_bounds = array<i64: 1, 128, 8>}, {transform_indices = @transform_1, window_bounds = array<i64: 1, 128, 8>}, {pipeline_mode = #tpu.pipeline_mode<synchronous>, transform_indices = @transform_2, window_bounds = array<i64: 8, 1>}, {pipeline_mode = #tpu.pipeline_mode<synchronous>, transform_indices = @transform_3, window_bounds = array<i64: 1, 1>}, {pipeline_mode = #tpu.pipeline_mode<synchronous>, transform_indices = @transform_4, window_bounds = array<i64: 8, 1>}, {pipeline_mode = #tpu.pipeline_mode<synchronous>, transform_indices = @transform_5, window_bounds = array<i64: 1, 1>}, {pipeline_mode = #tpu.pipeline_mode<synchronous>, transform_indices = @transform_6, window_bounds = array<i64: 8, 8>}, {pipeline_mode = #tpu.pipeline_mode<synchronous>, transform_indices = @transform_7, window_bounds = array<i64: 1, 8>}, {pipeline_mode = #tpu.pipeline_mode<synchronous>, transform_indices = @transform_8, window_bounds = array<i64: 1, 8>}, {transform_indices = @transform_9, window_bounds = array<i64: 1, 128, 8>}]} {
    %c0_i32 = arith.constant 0 : i32
    %0 = arith.cmpi eq, %arg2, %c0_i32 : i32
    %1 = arith.extui %0 : i1 to i32
    %c0_i32_0 = arith.constant 0 : i32
    %2 = arith.cmpi ne, %1, %c0_i32_0 : i32
    scf.if %2 {
      %c0_31 = arith.constant 0 : index
      %c0_32 = arith.constant 0 : index
      %c0_33 = arith.constant 0 : index
      %45 = vector.load %arg3[%c0_31, %c0_32, %c0_33] : memref<1x128x8xf32, #tpu.memory_space<vmem>>, vector<1x128x8xf32>
      %46 = vector.shape_cast %45 : vector<1x128x8xf32> to vector<128x8xf32>
      %47 = arith.truncf %46 : vector<128x8xf32> to vector<128x8xbf16>
      %c0_34 = arith.constant 0 : index
      %c0_35 = arith.constant 0 : index
      %48 = vector.load %arg5[%c0_34, %c0_35] : memref<8x1xbf16, #tpu.memory_space<vmem>>, vector<8x1xbf16>
      %cst_36 = arith.constant dense<0.000000e+00> : vector<128x1xf32>
      %49 = tpu.matmul %47, %48, %cst_36 {dimension_numbers = #tpu.dot_dimension_numbers<[1], [0], [0], [1], [0, 0, 1, 1], [], []>} : vector<128x8xbf16>, vector<8x1xbf16>, vector<128x1xf32> -> vector<128x1xf32>
      %c0_37 = arith.constant 0 : index
      %c0_38 = arith.constant 0 : index
      %50 = vector.load %arg6[%c0_37, %c0_38] : memref<1x1xf32, #tpu.memory_space<vmem>>, vector<1x1xf32>
      %51 = vector.broadcast %50 : vector<1x1xf32> to vector<128x1xf32>
      %52 = arith.addf %49, %51 : vector<128x1xf32>
      %c0_39 = arith.constant 0 : index
      %c0_40 = arith.constant 0 : index
      %53 = vector.load %arg13[%c0_39, %c0_40] : memref<128x1xf32, #tpu.memory_space<vmem>>, vector<128x1xf32>
      tpu.vector_store %arg13[%c0_39, %c0_40], %52 {strides = array<i32>} : memref<128x1xf32, #tpu.memory_space<vmem>>, vector<128x1xf32>,
      %cst_41 = arith.constant 0xFF800000 : f32
      %54 = vector.broadcast %cst_41 : f32 to vector<128x1xf32>
      %c0_42 = arith.constant 0 : index
      %c0_43 = arith.constant 0 : index
      %55 = vector.load %arg14[%c0_42, %c0_43] : memref<128x1xf32, #tpu.memory_space<vmem>>, vector<128x1xf32>
      tpu.vector_store %arg14[%c0_42, %c0_43], %54 {strides = array<i32>} : memref<128x1xf32, #tpu.memory_space<vmem>>, vector<128x1xf32>,
      %cst_44 = arith.constant 0.000000e+00 : f32
      %56 = vector.broadcast %cst_44 : f32 to vector<128x1xf32>
      %c0_45 = arith.constant 0 : index
      %c0_46 = arith.constant 0 : index
      %57 = vector.load %arg15[%c0_45, %c0_46] : memref<128x1xf32, #tpu.memory_space<vmem>>, vector<128x1xf32>
      tpu.vector_store %arg15[%c0_45, %c0_46], %56 {strides = array<i32>} : memref<128x1xf32, #tpu.memory_space<vmem>>, vector<128x1xf32>,
      %cst_47 = arith.constant 0.000000e+00 : f32
      %58 = vector.broadcast %cst_47 : f32 to vector<128x8xf32>
      %c0_48 = arith.constant 0 : index
      %c0_49 = arith.constant 0 : index
      %59 = vector.load %arg16[%c0_48, %c0_49] : memref<128x8xf32, #tpu.memory_space<vmem>>, vector<128x8xf32>
      tpu.vector_store %arg16[%c0_48, %c0_49], %58 {strides = array<i32>} : memref<128x8xf32, #tpu.memory_space<vmem>>, vector<128x8xf32>,
    } else {
    }
    %c0 = arith.constant 0 : index
    %c0_1 = arith.constant 0 : index
    %c0_2 = arith.constant 0 : index
    %3 = vector.load %arg4[%c0, %c0_1, %c0_2] : memref<1x128x8xf32, #tpu.memory_space<vmem>>, vector<1x128x8xf32>
    %4 = vector.shape_cast %3 : vector<1x128x8xf32> to vector<128x8xf32>
    %5 = arith.truncf %4 : vector<128x8xf32> to vector<128x8xbf16>
    %c0_3 = arith.constant 0 : index
    %c0_4 = arith.constant 0 : index
    %6 = vector.load %arg7[%c0_3, %c0_4] : memref<8x1xbf16, #tpu.memory_space<vmem>>, vector<8x1xbf16>
    %cst = arith.constant dense<0.000000e+00> : vector<128x1xf32>
    %7 = tpu.matmul %5, %6, %cst {dimension_numbers = #tpu.dot_dimension_numbers<[1], [0], [0], [1], [0, 0, 1, 1], [], []>} : vector<128x8xbf16>, vector<8x1xbf16>, vector<128x1xf32> -> vector<128x1xf32>
    %c0_5 = arith.constant 0 : index
    %c0_6 = arith.constant 0 : index
    %8 = vector.load %arg8[%c0_5, %c0_6] : memref<1x1xf32, #tpu.memory_space<vmem>>, vector<1x1xf32>
    %9 = vector.broadcast %8 : vector<1x1xf32> to vector<128x1xf32>
    %10 = arith.addf %7, %9 : vector<128x1xf32>
    %c0_7 = arith.constant 0 : index
    %c0_8 = arith.constant 0 : index
    %11 = vector.load %arg9[%c0_7, %c0_8] : memref<8x8xbf16, #tpu.memory_space<vmem>>, vector<8x8xbf16>
    %cst_9 = arith.constant dense<0.000000e+00> : vector<128x8xf32>
    %12 = tpu.matmul %5, %11, %cst_9 {dimension_numbers = #tpu.dot_dimension_numbers<[1], [0], [0], [1], [0, 0, 1, 1], [], []>} : vector<128x8xbf16>, vector<8x8xbf16>, vector<128x8xf32> -> vector<128x8xf32>
    %c0_10 = arith.constant 0 : index
    %c0_11 = arith.constant 0 : index
    %13 = vector.load %arg10[%c0_10, %c0_11] : memref<1x8xf32, #tpu.memory_space<vmem>>, vector<1x8xf32>
    %14 = vector.broadcast %13 : vector<1x8xf32> to vector<128x8xf32>
    %15 = arith.addf %12, %14 : vector<128x8xf32>
    %c0_12 = arith.constant 0 : index
    %c0_13 = arith.constant 0 : index
    %16 = vector.load %arg13[%c0_12, %c0_13] : memref<128x1xf32, #tpu.memory_space<vmem>>, vector<128x1xf32>
    %cst_14 = arith.constant dense<0.000000e+00> : vector<128x128xf32>
    %17 = tpu.matmul %16, %10, %cst_14 {dimension_numbers = #tpu.dot_dimension_numbers<[1], [1], [0], [0], [0, 0, 1, 0], [], []>} : vector<128x1xf32>, vector<128x1xf32>, vector<128x128xf32> -> vector<128x128xf32>
    %c0_15 = arith.constant 0 : index
    %c0_16 = arith.constant 0 : index
    %18 = vector.load %arg14[%c0_15, %c0_16] : memref<128x1xf32, #tpu.memory_space<vmem>>, vector<128x1xf32>
    %cst_17 = arith.constant dense<0xFF800000> : vector<128xf32>
    %19 = vector.multi_reduction <maximumf>, %17, %cst_17 [1] : vector<128x128xf32> to vector<128xf32>
    %20 = vector.shape_cast %19 : vector<128xf32> to vector<128x1xf32>
    %21 = arith.maximumf %18, %20 : vector<128x1xf32>
    %22 = arith.subf %18, %21 : vector<128x1xf32>
    %23 = math.exp %22 : vector<128x1xf32>
    %24 = vector.broadcast %21 : vector<128x1xf32> to vector<128x128xf32>
    %25 = arith.subf %17, %24 : vector<128x128xf32>
    %26 = math.exp %25 : vector<128x128xf32>
    %c0_18 = arith.constant 0 : index
    %c0_19 = arith.constant 0 : index
    %27 = vector.load %arg15[%c0_18, %c0_19] : memref<128x1xf32, #tpu.memory_space<vmem>>, vector<128x1xf32>
    %28 = arith.mulf %23, %27 : vector<128x1xf32>
    %cst_20 = arith.constant dense<0.000000e+00> : vector<128xf32>
    %29 = vector.multi_reduction <add>, %26, %cst_20 [1] : vector<128x128xf32> to vector<128xf32>
    %30 = vector.shape_cast %29 : vector<128xf32> to vector<128x1xf32>
    %31 = arith.addf %28, %30 : vector<128x1xf32>
    %c0_21 = arith.constant 0 : index
    %c0_22 = arith.constant 0 : index
    %32 = vector.load %arg15[%c0_21, %c0_22] : memref<128x1xf32, #tpu.memory_space<vmem>>, vector<128x1xf32>
    tpu.vector_store %arg15[%c0_21, %c0_22], %31 {strides = array<i32>} : memref<128x1xf32, #tpu.memory_space<vmem>>, vector<128x1xf32>,
    %c0_23 = arith.constant 0 : index
    %c0_24 = arith.constant 0 : index
    %33 = vector.load %arg16[%c0_23, %c0_24] : memref<128x8xf32, #tpu.memory_space<vmem>>, vector<128x8xf32>
    %34 = vector.broadcast %23 : vector<128x1xf32> to vector<128x8xf32>
    %35 = arith.mulf %34, %33 : vector<128x8xf32>
    %36 = arith.truncf %26 : vector<128x128xf32> to vector<128x128xbf16>
    %37 = arith.truncf %15 : vector<128x8xf32> to vector<128x8xbf16>
    %cst_25 = arith.constant dense<0.000000e+00> : vector<128x8xf32>
    %38 = tpu.matmul %36, %37, %cst_25 {dimension_numbers = #tpu.dot_dimension_numbers<[1], [0], [0], [1], [0, 0, 1, 1], [], []>} : vector<128x128xbf16>, vector<128x8xbf16>, vector<128x8xf32> -> vector<128x8xf32>
    %39 = arith.addf %35, %38 : vector<128x8xf32>
    %c0_26 = arith.constant 0 : index
    %c0_27 = arith.constant 0 : index
    %40 = vector.load %arg16[%c0_26, %c0_27] : memref<128x8xf32, #tpu.memory_space<vmem>>, vector<128x8xf32>
    tpu.vector_store %arg16[%c0_26, %c0_27], %39 {strides = array<i32>} : memref<128x8xf32, #tpu.memory_space<vmem>>, vector<128x8xf32>,
    %c0_28 = arith.constant 0 : index
    %c0_29 = arith.constant 0 : index
    %41 = vector.load %arg14[%c0_28, %c0_29] : memref<128x1xf32, #tpu.memory_space<vmem>>, vector<128x1xf32>
    tpu.vector_store %arg14[%c0_28, %c0_29], %21 {strides = array<i32>} : memref<128x1xf32, #tpu.memory_space<vmem>>, vector<128x1xf32>,
    %c1_i32 = arith.constant 1 : i32
    %42 = arith.cmpi eq, %arg2, %c1_i32 : i32
    %43 = arith.extui %42 : i1 to i32
    %c0_i32_30 = arith.constant 0 : i32
    %44 = arith.cmpi ne, %43, %c0_i32_30 : i32
    scf.if %44 {
      %c0_31 = arith.constant 0 : index
      %c0_32 = arith.constant 0 : index
      %45 = vector.load %arg16[%c0_31, %c0_32] : memref<128x8xf32, #tpu.memory_space<vmem>>, vector<128x8xf32>
      %c0_33 = arith.constant 0 : index
      %c0_34 = arith.constant 0 : index
      %46 = vector.load %arg15[%c0_33, %c0_34] : memref<128x1xf32, #tpu.memory_space<vmem>>, vector<128x1xf32>
      %47 = tpu.reciprocal %46 {approx = true} : vector<128x1xf32> -> vector<128x1xf32>
      %48 = vector.broadcast %47 : vector<128x1xf32> to vector<128x8xf32>
      %49 = arith.mulf %45, %48 : vector<128x8xf32>
      %c0_35 = arith.constant 0 : index
      %c0_36 = arith.constant 0 : index
      %50 = vector.load %arg11[%c0_35, %c0_36] : memref<1x8xf32, #tpu.memory_space<vmem>>, vector<1x8xf32>
      %51 = vector.broadcast %50 : vector<1x8xf32> to vector<128x8xf32>
      %52 = arith.mulf %51, %49 : vector<128x8xf32>
      %c0_37 = arith.constant 0 : index
      %c0_38 = arith.constant 0 : index
      %c0_39 = arith.constant 0 : index
      %53 = vector.load %arg3[%c0_37, %c0_38, %c0_39] : memref<1x128x8xf32, #tpu.memory_space<vmem>>, vector<1x128x8xf32>
      %54 = vector.shape_cast %53 : vector<1x128x8xf32> to vector<128x8xf32>
      %55 = arith.addf %52, %54 : vector<128x8xf32>
      %c0_40 = arith.constant 0 : index
      %c0_41 = arith.constant 0 : index
      %c0_42 = arith.constant 0 : index
      %56 = vector.load %arg12[%c0_40, %c0_41, %c0_42] : memref<1x128x8xf32, #tpu.memory_space<vmem>>, vector<1x128x8xf32>
      %57 = vector.shape_cast %56 : vector<1x128x8xf32> to vector<128x8xf32>
      %58 = vector.shape_cast %55 : vector<128x8xf32> to vector<1x128x8xf32>
      tpu.vector_store %arg12[%c0_40, %c0_41, %c0_42], %58 {strides = array<i32>} : memref<1x128x8xf32, #tpu.memory_space<vmem>>, vector<1x128x8xf32>,
    } else {
    }
    return
  }
  func.func @transform_0(%arg0: i32, %arg1: i32, %arg2: i32) -> (i32, i32, i32) {
    %c0_i32 = arith.constant 0 : i32
    %c0_i32_0 = arith.constant 0 : i32
    return %arg0, %arg1, %c0_i32 : i32, i32, i32
  }
  func.func @transform_1(%arg0: i32, %arg1: i32, %arg2: i32) -> (i32, i32, i32) {
    %c0_i32 = arith.constant 0 : i32
    %c0_i32_0 = arith.constant 0 : i32
    return %arg0, %arg2, %c0_i32 : i32, i32, i32
  }
  func.func @transform_2(%arg0: i32, %arg1: i32, %arg2: i32) -> (i32, i32) {
    %c0_i32 = arith.constant 0 : i32
    %c0_i32_0 = arith.constant 0 : i32
    %c0_i32_1 = arith.constant 0 : i32
    return %c0_i32, %c0_i32_0 : i32, i32
  }
  func.func @transform_3(%arg0: i32, %arg1: i32, %arg2: i32) -> (i32, i32) {
    %c0_i32 = arith.constant 0 : i32
    %c0_i32_0 = arith.constant 0 : i32
    %c0_i32_1 = arith.constant 0 : i32
    return %c0_i32, %c0_i32_0 : i32, i32
  }
  func.func @transform_4(%arg0: i32, %arg1: i32, %arg2: i32) -> (i32, i32) {
    %c0_i32 = arith.constant 0 : i32
    %c0_i32_0 = arith.constant 0 : i32
    %c0_i32_1 = arith.constant 0 : i32
    return %c0_i32, %c0_i32_0 : i32, i32
  }
  func.func @transform_5(%arg0: i32, %arg1: i32, %arg2: i32) -> (i32, i32) {
    %c0_i32 = arith.constant 0 : i32
    %c0_i32_0 = arith.constant 0 : i32
    %c0_i32_1 = arith.constant 0 : i32
    return %c0_i32, %c0_i32_0 : i32, i32
  }
  func.func @transform_6(%arg0: i32, %arg1: i32, %arg2: i32) -> (i32, i32) {
    %c0_i32 = arith.constant 0 : i32
    %c0_i32_0 = arith.constant 0 : i32
    %c0_i32_1 = arith.constant 0 : i32
    return %c0_i32, %c0_i32_0 : i32, i32
  }
  func.func @transform_7(%arg0: i32, %arg1: i32, %arg2: i32) -> (i32, i32) {
    %c0_i32 = arith.constant 0 : i32
    %c0_i32_0 = arith.constant 0 : i32
    %c0_i32_1 = arith.constant 0 : i32
    return %c0_i32, %c0_i32_0 : i32, i32
  }
  func.func @transform_8(%arg0: i32, %arg1: i32, %arg2: i32) -> (i32, i32) {
    %c0_i32 = arith.constant 0 : i32
    %c0_i32_0 = arith.constant 0 : i32
    %c0_i32_1 = arith.constant 0 : i32
    return %c0_i32, %c0_i32_0 : i32, i32
  }
  func.func @transform_9(%arg0: i32, %arg1: i32, %arg2: i32) -> (i32, i32, i32) {
    %c0_i32 = arith.constant 0 : i32
    %c0_i32_0 = arith.constant 0 : i32
    return %arg0, %arg1, %c0_i32 : i32, i32, i32
  }
}

</mosaic_0001>

<bundles_post_ra>
// kernel: _conv_block_impl.3
= control target key start
LH: loop header
LB: loop body
LE: loop exit
PB: predicated region body
PF: predicated region fallthrough
CT: control target
= control target key end

     0   :  { %vm262_vm0 = vcmask 293888   ;;  %vm359_vm1 = vcmask 1041408   ;;  %vm1242_vm2 = vcmask 60416   ;;  %s2342_s1 = inlined_call_operand.vmem [shape: bf16[36,8], index: 1, kind: input, shape index: {}]   ;;  %s2343_s0 = inlined_call_operand.vmem [shape: bf16[512,36], index: 0, kind: input, shape index: {}]   ;;  %s2344_s2 = inlined_call_operand.vmem [shape: f32[1,8], index: 2, kind: input, shape index: {}]   ;;  %s2345_s3 = inlined_call_operand.vmem [shape: f32[1,8], index: 3, kind: input, shape index: {}]   ;;  %s2346_s4 = inlined_call_operand.vmem [shape: bf16[512,8], index: 4, kind: output, shape index: {}]  }
   0x1   :  { %v1621_v0 = vld [vmem:[%s2342_s1] sm:$0xff]   ;;  %v1622_v1 = vld [vmem:[%s2342_s1 + $0x8] sm:$0xff]   ;;  %v1623_v2 = vld [vmem:[%s2342_s1 + $0x10] ss:$0 sps:$4 sm:$0x33]  }
   0x2   :  { %1543 = vmatprep.subr.bf16.mxu0 %v1621_v0  ;;  %1613 = vmatprep.subr.bf16.mxu1 %v1621_v0  ;;  %v1624_v3 = vld [vmem:[%s2343_s0] sm:$0xff]   ;;  %v361_v5 = vsel %vm359_vm1, %v1623_v2, 0  ;;  %v1626_v6 = vld [vmem:[%s2343_s0 + $0x8] sm:$0xff]   ;;  %v1628_v8 = vld [vmem:[%s2343_s0 + $0x10] sm:$0xff]  }
   0x3   :  { %1544 = vmatpush3.bf16.msra.mxu0 %v1621_v0  ;;  %1616 = vmatpush3.bf16.msra.mxu1 %v1621_v0  ;;  %v1625_v4 = vld [vmem:[%s2343_s0 + $0x80] sm:$0xff]   ;;  %v1627_v7 = vld [vmem:[%s2343_s0 + $0x88] sm:$0xff]   ;;  %v1629_v9 = vld [vmem:[%s2343_s0 + $0x90] sm:$0xff]  }
   0x4   :  { %1545 = vmatprep.subr.bf16.mxu0 %v1622_v1  ;;  %1614 = vmatprep.subr.bf16.mxu1 %v1622_v1  ;;  %v1630_v10 = vld [vmem:[%s2343_s0 + $0x18] sm:$0xff]   ;;  %v1632_v12 = vld [vmem:[%s2343_s0 + $0x20] sm:$0xff]   ;;  %v1634_v14 = vld [vmem:[%s2343_s0 + $0x28] sm:$0xff]  }
   0x5   :  { %1549 = vmatprep.mubr.msk.bf16.mxu0 %vm262_vm0, %v1624_v3  ;;  %1581 = vmatprep.mubr.msk.bf16.mxu1 %vm262_vm0, %v1625_v4  ;;  %v1631_v11 = vld [vmem:[%s2343_s0 + $0x98] sm:$0xff]   ;;  %v1633_v13 = vld [vmem:[%s2343_s0 + $0xa0] sm:$0xff]   ;;  %v1635_v15 = vld [vmem:[%s2343_s0 + $0xa8] sm:$0xff]  }
   0x6   :  { %v1636_v16 = vld [vmem:[%s2343_s0 + $0x30] sm:$0xff]   ;;  %v1638_v18 = vld [vmem:[%s2343_s0 + $0x38] sm:$0xff]   ;;  %v1640_v20 = vld [vmem:[%s2343_s0 + $0x40] sm:$0xff]  }
   0x7   :  { %1546 = vmatpush3.bf16.msra.mxu0 %v1622_v1  ;;  %1617 = vmatpush3.bf16.msra.mxu1 %v1622_v1  ;;  %v1637_v17 = vld [vmem:[%s2343_s0 + $0xb0] sm:$0xff]   ;;  %v1639_v19 = vld [vmem:[%s2343_s0 + $0xb8] sm:$0xff]   ;;  %v1641_v21 = vld [vmem:[%s2343_s0 + $0xc0] sm:$0xff]  }
   0x8   :  { %1619 = vmatprep.subr.msk.bf16.mxu0 %vm359_vm1, %v1623_v2  ;;  %1620 = vmatprep.subr.msk.bf16.mxu1 %vm359_vm1, %v1623_v2  ;;  %v1642_v22 = vld [vmem:[%s2343_s0 + $0x48] sm:$0xff]   ;;  %v1644_v24 = vld [vmem:[%s2343_s0 + $0x50] sm:$0xff]   ;;  %v1646_v26 = vld [vmem:[%s2343_s0 + $0x58] sm:$0xff]  }
   0x9   :  { %v1643_v23 = vld [vmem:[%s2343_s0 + $0xc8] sm:$0xff]   ;;  %v1645_v25 = vld [vmem:[%s2343_s0 + $0xd0] sm:$0xff]   ;;  %v1647_v27 = vld [vmem:[%s2343_s0 + $0xd8] sm:$0xff]  }
   0xa   :  { %v1648_v28 = vld [vmem:[%s2343_s0 + $0x60] sm:$0xff]   ;;  %v1650_v30 = vld [vmem:[%s2343_s0 + $0x68] sm:$0xff]   ;;  %v1652_v32 = vld [vmem:[%s2343_s0 + $0x70] sm:$0xff]  }
   0xb   :  { %1548 = vmatpush3.bf16.msra.mxu0 %v361_v5  ;;  %1618 = vmatpush3.bf16.msra.mxu1 %v361_v5  ;;  %v1649_v29 = vld [vmem:[%s2343_s0 + $0xe0] sm:$0xff]   ;;  %v1651_v31 = vld [vmem:[%s2343_s0 + $0xe8] sm:$0xff]   ;;  %v1653_v33 = vld [vmem:[%s2343_s0 + $0xf0] sm:$0xff]  }
   0xc   :  { %v1654_v34 = vld [vmem:[%s2343_s0 + $0x78] sm:$0xff]   ;;  %v1821_v36 = vld [vmem:[%s2344_s2] ss:$0 sm:$0xff] }
   0xd   :  { %v1655_v35 = vld [vmem:[%s2343_s0 + $0xf8] sm:$0xff]   ;;  %v1826_v38 = vld [vmem:[%s2345_s3] ss:$0 sm:$0xff] }
   0xe   :  { %1550 = vmatmul.mubr.msk.bf16.vlgmr.msra.gmra.mrb[0].mxu0 %vm262_vm0, %v1626_v6  ;;  %1582 = vmatmul.mubr.msk.bf16.vlgmr.msra.gmra.mrb[0].mxu1 %vm262_vm0, %v1627_v7 }
   0xf   :  { %1553 = vmatprep.mubr.msk.bf16.mxu0 %vm262_vm0, %v1628_v8  ;;  %1585 = vmatprep.mubr.msk.bf16.mxu1 %vm262_vm0, %v1629_v9 }
  0x16   :  { %1554 = vmatmul.mubr.msk.bf16.gmra.mrb[4].mxu0 %vm262_vm0, %v1630_v10  ;;  %1586 = vmatmul.mubr.msk.bf16.gmra.mrb[4].mxu1 %vm262_vm0, %v1631_v11 }
  0x17   :  { %1557 = vmatprep.mubr.msk.bf16.mxu0 %vm262_vm0, %v1632_v12  ;;  %1589 = vmatprep.mubr.msk.bf16.mxu1 %vm262_vm0, %v1633_v13 }
  0x1e   :  { %1558 = vmatmul.mubr.msk.bf16.gmra.mrb[8].mxu0 %vm262_vm0, %v1634_v14  ;;  %1590 = vmatmul.mubr.msk.bf16.gmra.mrb[8].mxu1 %vm262_vm0, %v1635_v15 }
  0x1f   :  { %1561 = vmatprep.mubr.msk.bf16.mxu0 %vm262_vm0, %v1636_v16  ;;  %1593 = vmatprep.mubr.msk.bf16.mxu1 %vm262_vm0, %v1637_v17 }
  0x26   :  { %1562 = vmatmul.mubr.msk.bf16.gmra.mrb[12].mxu0 %vm262_vm0, %v1638_v18  ;;  %1594 = vmatmul.mubr.msk.bf16.gmra.mrb[12].mxu1 %vm262_vm0, %v1639_v19 }
  0x27   :  { %1565 = vmatprep.mubr.msk.bf16.mxu0 %vm262_vm0, %v1640_v20  ;;  %1597 = vmatprep.mubr.msk.bf16.mxu1 %vm262_vm0, %v1641_v21 }
  0x2e   :  { %1566 = vmatmul.mubr.msk.bf16.gmra.mrb[16].mxu0 %vm262_vm0, %v1642_v22  ;;  %1598 = vmatmul.mubr.msk.bf16.gmra.mrb[16].mxu1 %vm262_vm0, %v1643_v23 }
  0x2f   :  { %1569 = vmatprep.mubr.msk.bf16.mxu0 %vm262_vm0, %v1644_v24  ;;  %1601 = vmatprep.mubr.msk.bf16.mxu1 %vm262_vm0, %v1645_v25 }
  0x36   :  { %1570 = vmatmul.mubr.msk.bf16.gmra.mrb[20].mxu0 %vm262_vm0, %v1646_v26  ;;  %1602 = vmatmul.mubr.msk.bf16.gmra.mrb[20].mxu1 %vm262_vm0, %v1647_v27 }
  0x37   :  { %1573 = vmatprep.mubr.msk.bf16.mxu0 %vm262_vm0, %v1648_v28  ;;  %1605 = vmatprep.mubr.msk.bf16.mxu1 %vm262_vm0, %v1649_v29 }
  0x3e   :  { %1574 = vmatmul.mubr.msk.bf16.gmra.mrb[24].mxu0 %vm262_vm0, %v1650_v30  ;;  %1606 = vmatmul.mubr.msk.bf16.gmra.mrb[24].mxu1 %vm262_vm0, %v1651_v31 }
  0x3f   :  { %1577 = vmatprep.mubr.msk.bf16.mxu0 %vm262_vm0, %v1652_v32  ;;  %1609 = vmatprep.mubr.msk.bf16.mxu1 %vm262_vm0, %v1653_v33 }
  0x46   :  { %1578 = vmatmul.mubr.msk.bf16.gmra.mrb[28].mxu0 %vm262_vm0, %v1654_v34  ;;  %1610 = vmatmul.mubr.msk.bf16.gmra.mrb[28].mxu1 %vm262_vm0, %v1655_v35 }
  0xe1   :  { %v1551_v37 = vpop.f32.mrb[0].mxu0  ;;  %v1583_v39 = vpop.f32.mrb[0].mxu1 }
  0xe2   :  { %v661_v40 = vmul.f32 %v1551_v37, %v1821_v36  ;;  %v693_v41 = vmul.f32 %v1583_v39, %v1821_v36  ;;  %v397_v42 = vpop.f32.mrb[1].mxu0  ;;  %v525_v43 = vpop.f32.mrb[1].mxu1 }
  0xe3   :  { %v659_v44 = vmul.f32 %v1821_v36, %v397_v42  ;;  %v691_v45 = vmul.f32 %v1821_v36, %v525_v43  ;;  %v1552_v46 = vpop.f32.mrb[2].mxu0  ;;  %v1584_v47 = vpop.f32.mrb[2].mxu1 }
  0xe4   :  { %v732_v48 = vadd.f32 %v1826_v38, %v661_v40  ;;  %v764_v49 = vadd.f32 %v1826_v38, %v693_v41  ;;  %v662_v50 = vmul.f32 %v1552_v46, %v1821_v36  ;;  %v694_v51 = vmul.f32 %v1584_v47, %v1821_v36  ;;  %v400_v52 = vpop.f32.mrb[3].mxu0  ;;  %v528_v53 = vpop.f32.mrb[3].mxu1 }
  0xe5   :  { %v730_v54 = vadd.f32 %v1826_v38, %v659_v44  ;;  %v762_v55 = vadd.f32 %v1826_v38, %v691_v45  ;;  %v660_v56 = vmul.f32 %v1821_v36, %v400_v52  ;;  %v692_v57 = vmul.f32 %v1821_v36, %v528_v53 }
  0xe6   :  { %vm796_vm3 = vcmp.ge.f32.partialorder %v732_v48, 0.0  ;;  %v860_v58 = vmul.f32 0.01, %v732_v48  ;;  %vm828_vm4 = vcmp.ge.f32.partialorder %v764_v49, 0.0  ;;  %v892_v59 = vmul.f32 0.01, %v764_v49 }
  0xe7   :  { %vm794_vm5 = vcmp.ge.f32.partialorder %v730_v54, 0.0  ;;  %v858_v60 = vmul.f32 0.01, %v730_v54  ;;  %vm826_vm6 = vcmp.ge.f32.partialorder %v762_v55, 0.0  ;;  %v890_v61 = vmul.f32 0.01, %v762_v55 }
  0xe8   :  { %v924_v62 = vsel %vm796_vm3, %v732_v48, %v860_v58  ;;  %v956_v63 = vsel %vm828_vm4, %v764_v49, %v892_v59  ;;  %v733_v0 = vadd.f32 %v1826_v38, %v662_v50  ;;  %v765_v1 = vadd.f32 %v1826_v38, %v694_v51 }
  0xe9   :  { %v1446_v2 = vpack.c.bf16 %v924_v62, %v924_v62  ;;  %v1478_v3 = vpack.c.bf16 %v956_v63, %v956_v63  ;;  %v922_v4 = vsel %vm794_vm5, %v730_v54, %v858_v60  ;;  %v954_v5 = vsel %vm826_vm6, %v762_v55, %v890_v61  ;;  %v1555_v6 = vpop.f32.mrb[4].mxu0  ;;  %v1587_v7 = vpop.f32.mrb[4].mxu1 }
  0xea   :  { %v1444_v8 = vpack.c.bf16 %v922_v4, %v922_v4  ;;  %v1476_v9 = vpack.c.bf16 %v954_v5, %v954_v5  ;;  %vm797_vm7 = vcmp.ge.f32.partialorder %v733_v0, 0.0  ;;  %v861_v10 = vmul.f32 0.01, %v733_v0  ;;  %v413_v11 = vpop.f32.mrb[5].mxu0  ;;  %v541_v12 = vpop.f32.mrb[5].mxu1 }
  0xeb   :  { %1245 = vst.msk [vmem:[%s2346_s4 + $0x8] sm:$0xf] %vm1242_vm2, %v1446_v2  ;;  %1277 = vst.msk [vmem:[%s2346_s4 + $0x88] sm:$0xf] %vm1242_vm2, %v1478_v3  ;;  %vm829_vm8 = vcmp.ge.f32.partialorder %v765_v1, 0.0  ;;  %v731_v14 = vadd.f32 %v1826_v38, %v660_v56  ;;  %v763_v15 = vadd.f32 %v1826_v38, %v692_v57  ;;  %v1556_v16 = vpop.f32.mrb[6].mxu0  ;;  %v665_v19 = vmul.f32 %v1555_v6, %v1821_v36 }
  0xec   :  { %v893_v13 = vmul.f32 0.01, %v765_v1  ;;  %v1588_v17 = vpop.f32.mrb[6].mxu1  ;;  %1243 = vst.msk [vmem:[%s2346_s4] sm:$0xf] %vm1242_vm2, %v1444_v8  ;;  %v925_v18 = vsel %vm797_vm7, %v733_v0, %v861_v10  ;;  %v697_v20 = vmul.f32 %v1587_v7, %v1821_v36  ;;  %v663_v21 = vmul.f32 %v1821_v36, %v413_v11  ;;  %v416_v22 = vpop.f32.mrb[7].mxu0 }
  0xed   :  { %1275 = vst.msk [vmem:[%s2346_s4 + $0x80] sm:$0xf] %vm1242_vm2, %v1476_v9  ;;  %v544_v23 = vpop.f32.mrb[7].mxu1  ;;  %v1447_v24 = vpack.c.bf16 %v925_v18, %v925_v18  ;;  %vm795_vm9 = vcmp.ge.f32.partialorder %v731_v14, 0.0  ;;  %v859_v26 = vmul.f32 0.01, %v731_v14  ;;  %v736_v29 = vadd.f32 %v1826_v38, %v665_v19 }
  0xee   :  { %v957_v25 = vsel %vm829_vm8, %v765_v1, %v893_v13  ;;  %vm827_vm10 = vcmp.ge.f32.partialorder %v763_v15, 0.0  ;;  %v891_v28 = vmul.f32 0.01, %v763_v15  ;;  %v768_v31 = vadd.f32 %v1826_v38, %v697_v20 }
  0xef   :  { %v1479_v27 = vpack.c.bf16 %v957_v25, %v957_v25  ;;  %1246 = vst.msk [vmem:[%s2346_s4 + $0xc] sm:$0xf] %vm1242_vm2, %v1447_v24  ;;  %v923_v30 = vsel %vm795_vm9, %v731_v14, %v859_v26  ;;  %v734_v32 = vadd.f32 %v1826_v38, %v663_v21  ;;  %v695_v33 = vmul.f32 %v1821_v36, %v541_v12 }
  0xf0   :  { %v1445_v34 = vpack.c.bf16 %v923_v30, %v923_v30  ;;  %v955_v35 = vsel %vm827_vm10, %v763_v15, %v891_v28  ;;  %vm800_vm11 = vcmp.ge.f32.partialorder %v736_v29, 0.0  ;;  %v864_v37 = vmul.f32 0.01, %v736_v29 }
  0xf1   :  { %1278 = vst.msk [vmem:[%s2346_s4 + $0x8c] sm:$0xf] %vm1242_vm2, %v1479_v27  ;;  %v1477_v39 = vpack.c.bf16 %v955_v35, %v955_v35  ;;  %vm832_vm12 = vcmp.ge.f32.partialorder %v768_v31, 0.0  ;;  %v896_v40 = vmul.f32 0.01, %v768_v31  ;;  %vm798_vm13 = vcmp.ge.f32.partialorder %v734_v32, 0.0 }
  0xf2   :  { %v1559_v41 = vpop.f32.mrb[8].mxu0  ;;  %v1591_v42 = vpop.f32.mrb[8].mxu1  ;;  %1244 = vst.msk [vmem:[%s2346_s4 + $0x4] sm:$0xf] %vm1242_vm2, %v1445_v34  ;;  %v928_v43 = vsel %vm800_vm11, %v736_v29, %v864_v37  ;;  %v862_v44 = vmul.f32 0.01, %v734_v32  ;;  %v766_v45 = vadd.f32 %v1826_v38, %v695_v33  ;;  %v666_v46 = vmul.f32 %v1556_v16, %v1821_v36 }
  0xf3   :  { %v429_v47 = vpop.f32.mrb[9].mxu0  ;;  %v557_v48 = vpop.f32.mrb[9].mxu1  ;;  %1276 = vst.msk [vmem:[%s2346_s4 + $0x84] sm:$0xf] %vm1242_vm2, %v1477_v39  ;;  %v1450_v49 = vpack.c.bf16 %v928_v43, %v928_v43  ;;  %v960_v50 = vsel %vm832_vm12, %v768_v31, %v896_v40  ;;  %v698_v51 = vmul.f32 %v1588_v17, %v1821_v36  ;;  %v664_v52 = vmul.f32 %v1821_v36, %v416_v22 }
  0xf4   :  { %v1560_v53 = vpop.f32.mrb[10].mxu0  ;;  %v1592_v54 = vpop.f32.mrb[10].mxu1  ;;  %v1482_v55 = vpack.c.bf16 %v960_v50, %v960_v50  ;;  %v926_v56 = vsel %vm798_vm13, %v734_v32, %v862_v44  ;;  %vm830_vm14 = vcmp.ge.f32.partialorder %v766_v45, 0.0  ;;  %v894_v57 = vmul.f32 0.01, %v766_v45 }
  0xf5   :  { %v1888_v58 = vpop.f32.mrb[11].mxu0  ;;  %v1890_v59 = vpop.f32.mrb[11].mxu1  ;;  %1249 = vst.msk [vmem:[%s2346_s4 + $0x18] sm:$0xf] %vm1242_vm2, %v1450_v49  ;;  %v1448_v60 = vpack.c.bf16 %v926_v56, %v926_v56  ;;  %v737_v61 = vadd.f32 %v1826_v38, %v666_v46  ;;  %v769_v62 = vadd.f32 %v1826_v38, %v698_v51  ;;  %v735_v63 = vadd.f32 %v1826_v38, %v664_v52 }
  0xf6   :  { %1281 = vst.msk [vmem:[%s2346_s4 + $0x98] sm:$0xf] %vm1242_vm2, %v1482_v55  ;;  %v958_v0 = vsel %vm830_vm14, %v766_v45, %v894_v57  ;;  %v696_v1 = vmul.f32 %v1821_v36, %v544_v23  ;;  %v669_v2 = vmul.f32 %v1559_v41, %v1821_v36  ;;  %v701_v3 = vmul.f32 %v1591_v42, %v1821_v36 }
  0xf7   :  { %1247 = vst.msk [vmem:[%s2346_s4 + $0x10] sm:$0xf] %vm1242_vm2, %v1448_v60  ;;  %v1480_v4 = vpack.c.bf16 %v958_v0, %v958_v0  ;;  %vm801_vm15 = vcmp.ge.f32.partialorder %v737_v61, 0.0  ;;  %v865_v5 = vmul.f32 0.01, %v737_v61  ;;  %vm833_vm0 = vcmp.ge.f32.partialorder %v769_v62, 0.0 }
  0xf8   :  { %v897_v6 = vmul.f32 0.01, %v769_v62  ;;  %vm799_vm1 = vcmp.ge.f32.partialorder %v735_v63, 0.0  ;;  %v863_v7 = vmul.f32 0.01, %v735_v63  ;;  %v767_v8 = vadd.f32 %v1826_v38, %v696_v1 }
  0xf9   :  { %1279 = vst.msk [vmem:[%s2346_s4 + $0x90] sm:$0xf] %vm1242_vm2, %v1480_v4  ;;  %v929_v9 = vsel %vm801_vm15, %v737_v61, %v865_v5  ;;  %v740_v10 = vadd.f32 %v1826_v38, %v669_v2  ;;  %v772_v11 = vadd.f32 %v1826_v38, %v701_v3  ;;  %v667_v12 = vmul.f32 %v1821_v36, %v429_v47  ;;  %v1563_v13 = vpop.f32.mrb[12].mxu0  ;;  %v1918_v14 = vpop.f32.mrb[12].mxu1 }
  0xfa   :  { %v1451_v15 = vpack.c.bf16 %v929_v9, %v929_v9  ;;  %v961_v16 = vsel %vm833_vm0, %v769_v62, %v897_v6  ;;  %v927_v17 = vsel %vm799_vm1, %v735_v63, %v863_v7  ;;  %vm831_vm3 = vcmp.ge.f32.partialorder %v767_v8, 0.0  ;;  %v1920_v18 = vpop.f32.mrb[13].mxu0  ;;  %v1922_v19 = vpop.f32.mrb[13].mxu1 }
  0xfb   :  { %v1483_v20 = vpack.c.bf16 %v961_v16, %v961_v16  ;;  %v1449_v21 = vpack.c.bf16 %v927_v17, %v927_v17  ;;  %v895_v22 = vmul.f32 0.01, %v767_v8  ;;  %vm804_vm4 = vcmp.ge.f32.partialorder %v740_v10, 0.0  ;;  %v1924_v23 = vpop.f32.mrb[14].mxu0  ;;  %v1926_v24 = vpop.f32.mrb[14].mxu1 }
  0xfc   :  { %1250 = vst.msk [vmem:[%s2346_s4 + $0x1c] sm:$0xf] %vm1242_vm2, %v1451_v15  ;;  %v868_v25 = vmul.f32 0.01, %v740_v10  ;;  %vm836_vm5 = vcmp.ge.f32.partialorder %v772_v11, 0.0  ;;  %v738_v27 = vadd.f32 %v1826_v38, %v667_v12  ;;  %v1933_v28 = vpop.f32.mrb[15].mxu0  ;;  %v699_v30 = vmul.f32 %v1821_v36, %v557_v48 }
  0xfd   :  { %v900_v26 = vmul.f32 0.01, %v772_v11  ;;  %1282 = vst.msk [vmem:[%s2346_s4 + $0x9c] sm:$0xf] %vm1242_vm2, %v1483_v20  ;;  %1248 = vst.msk [vmem:[%s2346_s4 + $0x14] sm:$0xf] %vm1242_vm2, %v1449_v21  ;;  %v959_v29 = vsel %vm831_vm3, %v767_v8, %v895_v22  ;;  %v670_v31 = vmul.f32 %v1560_v53, %v1821_v36  ;;  %v702_v32 = vmul.f32 %v1592_v54, %v1821_v36 }
  0xfe   :  { %v1947_v33 = vpop.f32.mrb[15].mxu1  ;;  %v1481_v34 = vpack.c.bf16 %v959_v29, %v959_v29  ;;  %v932_v35 = vsel %vm804_vm4, %v740_v10, %v868_v25  ;;  %vm802_vm6 = vcmp.ge.f32.partialorder %v738_v27, 0.0  ;;  %v866_v41 = vmul.f32 0.01, %v738_v27 }
  0xff   :  { %v964_v37 = vsel %vm836_vm5, %v772_v11, %v900_v26  ;;  %v1454_v39 = vpack.c.bf16 %v932_v35, %v932_v35  ;;  %v770_v42 = vadd.f32 %v1826_v38, %v699_v30  ;;  %v741_v43 = vadd.f32 %v1826_v38, %v670_v31 }
 0x100   :  { %v1486_v40 = vpack.c.bf16 %v964_v37, %v964_v37  ;;  %1280 = vst.msk [vmem:[%s2346_s4 + $0x94] sm:$0xf] %vm1242_vm2, %v1481_v34  ;;  %v773_v44 = vadd.f32 %v1826_v38, %v702_v32  ;;  %v668_v45 = vmul.f32 %v1821_v36, %v1888_v58  ;;  %v700_v46 = vmul.f32 %v1821_v36, %v1890_v59 }
 0x101   :  { %1253 = vst.msk [vmem:[%s2346_s4 + $0x28] sm:$0xf] %vm1242_vm2, %v1454_v39  ;;  %v930_v47 = vsel %vm802_vm6, %v738_v27, %v866_v41  ;;  %vm834_vm7 = vcmp.ge.f32.partialorder %v770_v42, 0.0  ;;  %v898_v48 = vmul.f32 0.01, %v770_v42  ;;  %v673_v49 = vmul.f32 %v1563_v13, %v1821_v36  ;;  %v1970_v50 = vpop.f32.mrb[16].mxu0 }
 0x102   :  { %1285 = vst.msk [vmem:[%s2346_s4 + $0xa8] sm:$0xf] %vm1242_vm2, %v1486_v40  ;;  %v1972_v51 = vpop.f32.mrb[16].mxu1  ;;  %v1452_v52 = vpack.c.bf16 %v930_v47, %v930_v47  ;;  %vm805_vm8 = vcmp.ge.f32.partialorder %v741_v43, 0.0  ;;  %v869_v53 = vmul.f32 0.01, %v741_v43  ;;  %v739_v58 = vadd.f32 %v1826_v38, %v668_v45 }
 0x103   :  { %vm837_vm9 = vcmp.ge.f32.partialorder %v773_v44, 0.0  ;;  %v1974_v54 = vpop.f32.mrb[17].mxu0  ;;  %v1976_v55 = vpop.f32.mrb[17].mxu1  ;;  %v962_v56 = vsel %vm834_vm7, %v770_v42, %v898_v48  ;;  %v901_v57 = vmul.f32 0.01, %v773_v44  ;;  %v771_v59 = vadd.f32 %v1826_v38, %v700_v46 }
 0x104   :  { %v1980_v60 = vpop.f32.mrb[18].mxu0  ;;  %v1982_v61 = vpop.f32.mrb[18].mxu1  ;;  %1251 = vst.msk [vmem:[%s2346_s4 + $0x20] sm:$0xf] %vm1242_vm2, %v1452_v52  ;;  %v1484_v62 = vpack.c.bf16 %v962_v56, %v962_v56  ;;  %v933_v63 = vsel %vm805_vm8, %v741_v43, %v869_v53  ;;  %v744_v0 = vadd.f32 %v1826_v38, %v673_v49  ;;  %v705_v1 = vmul.f32 %v1918_v14, %v1821_v36 }
 0x105   :  { %v1991_v2 = vpop.f32.mrb[19].mxu0  ;;  %v1993_v3 = vpop.f32.mrb[19].mxu1  ;;  %v1455_v4 = vpack.c.bf16 %v933_v63, %v933_v63  ;;  %v965_v5 = vsel %vm837_vm9, %v773_v44, %v901_v57  ;;  %vm803_vm10 = vcmp.ge.f32.partialorder %v739_v58, 0.0  ;;  %v867_v6 = vmul.f32 0.01, %v739_v58 }
 0x106   :  { %1283 = vst.msk [vmem:[%s2346_s4 + $0xa0] sm:$0xf] %vm1242_vm2, %v1484_v62  ;;  %v1487_v7 = vpack.c.bf16 %v965_v5, %v965_v5  ;;  %vm835_vm11 = vcmp.ge.f32.partialorder %v771_v59, 0.0  ;;  %v899_v8 = vmul.f32 0.01, %v771_v59  ;;  %vm808_vm12 = vcmp.ge.f32.partialorder %v744_v0, 0.0 }
 0x107   :  { %1254 = vst.msk [vmem:[%s2346_s4 + $0x2c] sm:$0xf] %vm1242_vm2, %v1455_v4  ;;  %v931_v9 = vsel %vm803_vm10, %v739_v58, %v867_v6  ;;  %v872_v10 = vmul.f32 0.01, %v744_v0  ;;  %v776_v11 = vadd.f32 %v1826_v38, %v705_v1  ;;  %v671_v12 = vmul.f32 %v1821_v36, %v1920_v18 }
 0x108   :  { %1286 = vst.msk [vmem:[%s2346_s4 + $0xac] sm:$0xf] %vm1242_vm2, %v1487_v7  ;;  %v1453_v13 = vpack.c.bf16 %v931_v9, %v931_v9  ;;  %v963_v14 = vsel %vm835_vm11, %v771_v59, %v899_v8  ;;  %v703_v15 = vmul.f32 %v1821_v36, %v1922_v19  ;;  %v674_v16 = vmul.f32 %v1924_v23, %v1821_v36 }
 0x109   :  { %v1485_v17 = vpack.c.bf16 %v963_v14, %v963_v14  ;;  %v936_v20 = vsel %vm808_vm12, %v744_v0, %v872_v10  ;;  %vm840_vm13 = vcmp.ge.f32.partialorder %v776_v11, 0.0  ;;  %v904_v21 = vmul.f32 0.01, %v776_v11  ;;  %v2015_v22 = vpop.f32.mrb[20].mxu0  ;;  %v2017_v18 = vpop.f32.mrb[20].mxu1 }
 0x10a   :  { %1252 = vst.msk [vmem:[%s2346_s4 + $0x24] sm:$0xf] %vm1242_vm2, %v1453_v13  ;;  %v1458_v25 = vpack.c.bf16 %v936_v20, %v936_v20  ;;  %v742_v26 = vadd.f32 %v1826_v38, %v671_v12  ;;  %v774_v19 = vadd.f32 %v1826_v38, %v703_v15  ;;  %v745_v23 = vadd.f32 %v1826_v38, %v674_v16  ;;  %v2026_v27 = vpop.f32.mrb[21].mxu0  ;;  %v2028_v29 = vpop.f32.mrb[21].mxu1 }
 0x10b   :  { %1284 = vst.msk [vmem:[%s2346_s4 + $0xa4] sm:$0xf] %vm1242_vm2, %v1485_v17  ;;  %v968_v30 = vsel %vm840_vm13, %v776_v11, %v904_v21  ;;  %v706_v31 = vmul.f32 %v1926_v24, %v1821_v36  ;;  %v672_v32 = vmul.f32 %v1821_v36, %v1933_v28  ;;  %v704_v34 = vmul.f32 %v1821_v36, %v1947_v33  ;;  %v2040_v35 = vpop.f32.mrb[22].mxu0  ;;  %v2042_v37 = vpop.f32.mrb[22].mxu1 }
 0x10c   :  { %1257 = vst.msk [vmem:[%s2346_s4 + $0x38] sm:$0xf] %vm1242_vm2, %v1458_v25  ;;  %v1490_v39 = vpack.c.bf16 %v968_v30, %v968_v30  ;;  %vm806_vm14 = vcmp.ge.f32.partialorder %v742_v26, 0.0  ;;  %v870_v40 = vmul.f32 0.01, %v742_v26  ;;  %vm838_vm15 = vcmp.ge.f32.partialorder %v774_v19, 0.0 }
 0x10d   :  { %v2048_v24 = vpop.f32.mrb[23].mxu0  ;;  %v2050_v41 = vpop.f32.mrb[23].mxu1  ;;  %v902_v28 = vmul.f32 0.01, %v774_v19  ;;  %vm809_vm0 = vcmp.ge.f32.partialorder %v745_v23, 0.0  ;;  %v777_v42 = vadd.f32 %v1826_v38, %v706_v31  ;;  %v743_v44 = vadd.f32 %v1826_v38, %v672_v32 }
 0x10e   :  { %v873_v33 = vmul.f32 0.01, %v745_v23  ;;  %1289 = vst.msk [vmem:[%s2346_s4 + $0xb8] sm:$0xf] %vm1242_vm2, %v1490_v39  ;;  %v934_v43 = vsel %vm806_vm14, %v742_v26, %v870_v40  ;;  %v775_v45 = vadd.f32 %v1826_v38, %v704_v34  ;;  %v677_v46 = vmul.f32 %v1970_v50, %v1821_v36 }
 0x10f   :  { %v1456_v47 = vpack.c.bf16 %v934_v43, %v934_v43  ;;  %v966_v48 = vsel %vm838_vm15, %v774_v19, %v902_v28  ;;  %vm841_vm1 = vcmp.ge.f32.partialorder %v777_v42, 0.0  ;;  %v905_v56 = vmul.f32 0.01, %v777_v42 }
 0x110   :  { %v937_v49 = vsel %vm809_vm0, %v745_v23, %v873_v33  ;;  %v1488_v52 = vpack.c.bf16 %v966_v48, %v966_v48  ;;  %vm807_vm3 = vcmp.ge.f32.partialorder %v743_v44, 0.0  ;;  %v871_v57 = vmul.f32 0.01, %v743_v44 }
 0x111   :  { %v1459_v53 = vpack.c.bf16 %v937_v49, %v937_v49  ;;  %1255 = vst.msk [vmem:[%s2346_s4 + $0x30] sm:$0xf] %vm1242_vm2, %v1456_v47  ;;  %vm839_vm4 = vcmp.ge.f32.partialorder %v775_v45, 0.0  ;;  %v903_v58 = vmul.f32 0.01, %v775_v45  ;;  %v748_v59 = vadd.f32 %v1826_v38, %v677_v46  ;;  %v2066_v62 = vpop.f32.mrb[24].mxu0 }
 0x112   :  { %1287 = vst.msk [vmem:[%s2346_s4 + $0xb0] sm:$0xf] %vm1242_vm2, %v1488_v52  ;;  %v969_v50 = vsel %vm841_vm1, %v777_v42, %v905_v56  ;;  %v709_v63 = vmul.f32 %v1972_v51, %v1821_v36  ;;  %v675_v0 = vmul.f32 %v1821_v36, %v1974_v54  ;;  %v707_v1 = vmul.f32 %v1821_v36, %v1976_v55  ;;  %v2082_v4 = vpop.f32.mrb[24].mxu1  ;;  %v2084_v5 = vpop.f32.mrb[25].mxu0 }
 0x113   :  { %1258 = vst.msk [vmem:[%s2346_s4 + $0x3c] sm:$0xf] %vm1242_vm2, %v1459_v53  ;;  %v1491_v6 = vpack.c.bf16 %v969_v50, %v969_v50  ;;  %v935_v7 = vsel %vm807_vm3, %v743_v44, %v871_v57  ;;  %v967_v8 = vsel %vm839_vm4, %v775_v45, %v903_v58  ;;  %vm812_vm5 = vcmp.ge.f32.partialorder %v748_v59, 0.0  ;;  %v2087_v9 = vpop.f32.mrb[25].mxu1  ;;  %v2089_v10 = vpop.f32.mrb[26].mxu0 }
 0x114   :  { %v1457_v51 = vpack.c.bf16 %v935_v7, %v935_v7  ;;  %v1489_v11 = vpack.c.bf16 %v967_v8, %v967_v8  ;;  %v876_v12 = vmul.f32 0.01, %v748_v59  ;;  %v780_v54 = vadd.f32 %v1826_v38, %v709_v63  ;;  %v2092_v13 = vpop.f32.mrb[26].mxu1  ;;  %v2094_v55 = vpop.f32.mrb[27].mxu0 }
 0x115   :  { %1290 = vst.msk [vmem:[%s2346_s4 + $0xbc] sm:$0xf] %vm1242_vm2, %v1491_v6  ;;  %v746_v14 = vadd.f32 %v1826_v38, %v675_v0  ;;  %v778_v15 = vadd.f32 %v1826_v38, %v707_v1  ;;  %v678_v16 = vmul.f32 %v1980_v60, %v1821_v36  ;;  %v710_v17 = vmul.f32 %v1982_v61, %v1821_v36  ;;  %v2106_v20 = vpop.f32.mrb[27].mxu1 }
 0x116   :  { %1256 = vst.msk [vmem:[%s2346_s4 + $0x34] sm:$0xf] %vm1242_vm2, %v1457_v51  ;;  %1288 = vst.msk [vmem:[%s2346_s4 + $0xb4] sm:$0xf] %vm1242_vm2, %v1489_v11  ;;  %v940_v21 = vsel %vm812_vm5, %v748_v59, %v876_v12  ;;  %vm844_vm6 = vcmp.ge.f32.partialorder %v780_v54, 0.0  ;;  %v676_v60 = vmul.f32 %v1821_v36, %v1991_v2  ;;  %v708_v2 = vmul.f32 %v1821_v36, %v1993_v3 }
 0x117   :  { %v908_v25 = vmul.f32 0.01, %v780_v54  ;;  %v1462_v61 = vpack.c.bf16 %v940_v21, %v940_v21  ;;  %vm810_vm7 = vcmp.ge.f32.partialorder %v746_v14, 0.0  ;;  %v874_v26 = vmul.f32 0.01, %v746_v14 }
 0x118   :  { %vm842_vm8 = vcmp.ge.f32.partialorder %v778_v15, 0.0  ;;  %v906_v23 = vmul.f32 0.01, %v778_v15  ;;  %v749_v30 = vadd.f32 %v1826_v38, %v678_v16  ;;  %v781_v31 = vadd.f32 %v1826_v38, %v710_v17 }
 0x119   :  { %v972_v19 = vsel %vm844_vm6, %v780_v54, %v908_v25  ;;  %1261 = vst.msk [vmem:[%s2346_s4 + $0x48] sm:$0xf] %vm1242_vm2, %v1462_v61  ;;  %v938_v34 = vsel %vm810_vm7, %v746_v14, %v874_v26  ;;  %v747_v39 = vadd.f32 %v1826_v38, %v676_v60  ;;  %v2128_v40 = vpop.f32.mrb[28].mxu0  ;;  %v2130_v28 = vpop.f32.mrb[28].mxu1  ;;  %v779_v53 = vadd.f32 %v1826_v38, %v708_v2 }
 0x11a   :  { %v1494_v32 = vpack.c.bf16 %v972_v19, %v972_v19  ;;  %v1460_v33 = vpack.c.bf16 %v938_v34, %v938_v34  ;;  %v970_v42 = vsel %vm842_vm8, %v778_v15, %v906_v23  ;;  %vm813_vm9 = vcmp.ge.f32.partialorder %v749_v30, 0.0  ;;  %v2132_v44 = vpop.f32.mrb[29].mxu0  ;;  %v2134_v45 = vpop.f32.mrb[29].mxu1 }
 0x11b   :  { %v877_v43 = vmul.f32 0.01, %v749_v30  ;;  %v1492_v46 = vpack.c.bf16 %v970_v42, %v970_v42  ;;  %vm845_vm10 = vcmp.ge.f32.partialorder %v781_v31, 0.0  ;;  %v909_v3 = vmul.f32 0.01, %v781_v31  ;;  %v2140_v47 = vpop.f32.mrb[30].mxu0 }
 0x11c   :  { %1293 = vst.msk [vmem:[%s2346_s4 + $0xc8] sm:$0xf] %vm1242_vm2, %v1494_v32  ;;  %vm811_vm11 = vcmp.ge.f32.partialorder %v747_v39, 0.0  ;;  %v2142_v48 = vpop.f32.mrb[30].mxu1  ;;  %1259 = vst.msk [vmem:[%s2346_s4 + $0x40] sm:$0xf] %vm1242_vm2, %v1460_v33  ;;  %v681_v56 = vmul.f32 %v2015_v22, %v1821_v36  ;;  %v713_v63 = vmul.f32 %v2017_v18, %v1821_v36  ;;  %v679_v0 = vmul.f32 %v1821_v36, %v2026_v27 }
 0x11d   :  { %v941_v49 = vsel %vm813_vm9, %v749_v30, %v877_v43  ;;  %v875_v52 = vmul.f32 0.01, %v747_v39  ;;  %v2151_v57 = vpop.f32.mrb[31].mxu0  ;;  %v2153_v58 = vpop.f32.mrb[31].mxu1  ;;  %1291 = vst.msk [vmem:[%s2346_s4 + $0xc0] sm:$0xf] %vm1242_vm2, %v1492_v46  ;;  %v973_v50 = vsel %vm845_vm10, %v781_v31, %v909_v3  ;;  %v711_v11 = vmul.f32 %v1821_v36, %v2028_v29 }
 0x11e   :  { %v1463_v59 = vpack.c.bf16 %v941_v49, %v941_v49  ;;  %v1495_v1 = vpack.c.bf16 %v973_v50, %v973_v50  ;;  %vm843_vm12 = vcmp.ge.f32.partialorder %v779_v53, 0.0  ;;  %v907_v6 = vmul.f32 0.01, %v779_v53 }
 0x11f   :  { %v939_v22 = vsel %vm811_vm11, %v747_v39, %v875_v52  ;;  %v752_v8 = vadd.f32 %v1826_v38, %v681_v56  ;;  %v784_v51 = vadd.f32 %v1826_v38, %v713_v63  ;;  %v750_v18 = vadd.f32 %v1826_v38, %v679_v0 }
 0x120   :  { %1262 = vst.msk [vmem:[%s2346_s4 + $0x4c] sm:$0xf] %vm1242_vm2, %v1463_v59  ;;  %v1461_v7 = vpack.c.bf16 %v939_v22, %v939_v22  ;;  %1294 = vst.msk [vmem:[%s2346_s4 + $0xcc] sm:$0xf] %vm1242_vm2, %v1495_v1  ;;  %v971_v27 = vsel %vm843_vm12, %v779_v53, %v907_v6  ;;  %v682_v12 = vmul.f32 %v2040_v35, %v1821_v36 }
 0x121   :  { %v714_v54 = vmul.f32 %v2042_v37, %v1821_v36  ;;  %v1493_v14 = vpack.c.bf16 %v971_v27, %v971_v27  ;;  %vm816_vm13 = vcmp.ge.f32.partialorder %v752_v8, 0.0  ;;  %v880_v15 = vmul.f32 0.01, %v752_v8 }
 0x122   :  { %1260 = vst.msk [vmem:[%s2346_s4 + $0x44] sm:$0xf] %vm1242_vm2, %v1461_v7  ;;  %vm848_vm14 = vcmp.ge.f32.partialorder %v784_v51, 0.0  ;;  %v912_v16 = vmul.f32 0.01, %v784_v51  ;;  %vm814_vm15 = vcmp.ge.f32.partialorder %v750_v18, 0.0  ;;  %v782_v29 = vadd.f32 %v1826_v38, %v711_v11 }
 0x123   :  { %v878_v17 = vmul.f32 0.01, %v750_v18  ;;  %1292 = vst.msk [vmem:[%s2346_s4 + $0xc4] sm:$0xf] %vm1242_vm2, %v1493_v14  ;;  %v944_v35 = vsel %vm816_vm13, %v752_v8, %v880_v15  ;;  %v753_v37 = vadd.f32 %v1826_v38, %v682_v12  ;;  %v785_v21 = vadd.f32 %v1826_v38, %v714_v54 }
 0x124   :  { %v680_v25 = vmul.f32 %v1821_v36, %v2048_v24  ;;  %v1466_v60 = vpack.c.bf16 %v944_v35, %v944_v35  ;;  %v976_v61 = vsel %vm848_vm14, %v784_v51, %v912_v16  ;;  %vm846_vm0 = vcmp.ge.f32.partialorder %v782_v29, 0.0 }
 0x125   :  { %v942_v26 = vsel %vm814_vm15, %v750_v18, %v878_v17  ;;  %v1498_v19 = vpack.c.bf16 %v976_v61, %v976_v61  ;;  %v910_v30 = vmul.f32 0.01, %v782_v29  ;;  %vm817_vm1 = vcmp.ge.f32.partialorder %v753_v37, 0.0 }
 0x126   :  { %v1464_v23 = vpack.c.bf16 %v942_v26, %v942_v26  ;;  %1265 = vst.msk [vmem:[%s2346_s4 + $0x58] sm:$0xf] %vm1242_vm2, %v1466_v60  ;;  %v881_v31 = vmul.f32 0.01, %v753_v37  ;;  %vm849_vm3 = vcmp.ge.f32.partialorder %v785_v21, 0.0  ;;  %v751_v34 = vadd.f32 %v1826_v38, %v680_v25 }
 0x127   :  { %v913_v32 = vmul.f32 0.01, %v785_v21  ;;  %1297 = vst.msk [vmem:[%s2346_s4 + $0xd8] sm:$0xf] %vm1242_vm2, %v1498_v19  ;;  %v974_v24 = vsel %vm846_vm0, %v782_v29, %v910_v30  ;;  %v712_v39 = vmul.f32 %v1821_v36, %v2050_v41  ;;  %v685_v2 = vmul.f32 %v2066_v62, %v1821_v36 }
 0x128   :  { %1263 = vst.msk [vmem:[%s2346_s4 + $0x50] sm:$0xf] %vm1242_vm2, %v1464_v23  ;;  %v717_v33 = vmul.f32 %v2082_v4, %v1821_v36  ;;  %v1496_v42 = vpack.c.bf16 %v974_v24, %v974_v24  ;;  %v945_v43 = vsel %vm817_vm1, %v753_v37, %v881_v31  ;;  %vm815_vm4 = vcmp.ge.f32.partialorder %v751_v34, 0.0 }
 0x129   :  { %v977_v46 = vsel %vm849_vm3, %v785_v21, %v913_v32  ;;  %v1467_v3 = vpack.c.bf16 %v945_v43, %v945_v43  ;;  %v879_v52 = vmul.f32 0.01, %v751_v34  ;;  %v783_v53 = vadd.f32 %v1826_v38, %v712_v39 }
 0x12a   :  { %v1499_v49 = vpack.c.bf16 %v977_v46, %v977_v46  ;;  %1295 = vst.msk [vmem:[%s2346_s4 + $0xd0] sm:$0xf] %vm1242_vm2, %v1496_v42  ;;  %v756_v41 = vadd.f32 %v1826_v38, %v685_v2  ;;  %v788_v62 = vadd.f32 %v1826_v38, %v717_v33  ;;  %v683_v4 = vmul.f32 %v1821_v36, %v2084_v5 }
 0x12b   :  { %v715_v56 = vmul.f32 %v1821_v36, %v2087_v9  ;;  %1266 = vst.msk [vmem:[%s2346_s4 + $0x5c] sm:$0xf] %vm1242_vm2, %v1467_v3  ;;  %v943_v59 = vsel %vm815_vm4, %v751_v34, %v879_v52  ;;  %vm847_vm5 = vcmp.ge.f32.partialorder %v783_v53, 0.0  ;;  %v911_v50 = vmul.f32 0.01, %v783_v53 }
 0x12c   :  { %1298 = vst.msk [vmem:[%s2346_s4 + $0xdc] sm:$0xf] %vm1242_vm2, %v1499_v49  ;;  %v686_v63 = vmul.f32 %v2089_v10, %v1821_v36  ;;  %v1465_v5 = vpack.c.bf16 %v943_v59, %v943_v59  ;;  %vm820_vm6 = vcmp.ge.f32.partialorder %v756_v41, 0.0  ;;  %v884_v0 = vmul.f32 0.01, %v756_v41 }
 0x12d   :  { %vm852_vm7 = vcmp.ge.f32.partialorder %v788_v62, 0.0  ;;  %v975_v9 = vsel %vm847_vm5, %v783_v53, %v911_v50  ;;  %v916_v1 = vmul.f32 0.01, %v788_v62  ;;  %v754_v22 = vadd.f32 %v1826_v38, %v683_v4 }
 0x12e   :  { %v786_v6 = vadd.f32 %v1826_v38, %v715_v56  ;;  %1264 = vst.msk [vmem:[%s2346_s4 + $0x54] sm:$0xf] %vm1242_vm2, %v1465_v5  ;;  %v1497_v7 = vpack.c.bf16 %v975_v9, %v975_v9  ;;  %v948_v8 = vsel %vm820_vm6, %v756_v41, %v884_v0  ;;  %v757_v51 = vadd.f32 %v1826_v38, %v686_v63 }
 0x12f   :  { %v718_v10 = vmul.f32 %v2092_v13, %v1821_v36  ;;  %v1470_v18 = vpack.c.bf16 %v948_v8, %v948_v8  ;;  %v980_v27 = vsel %vm852_vm7, %v788_v62, %v916_v1  ;;  %vm818_vm8 = vcmp.ge.f32.partialorder %v754_v22, 0.0 }
 0x130   :  { %v882_v11 = vmul.f32 0.01, %v754_v22  ;;  %1296 = vst.msk [vmem:[%s2346_s4 + $0xd4] sm:$0xf] %vm1242_vm2, %v1497_v7  ;;  %v1502_v12 = vpack.c.bf16 %v980_v27, %v980_v27  ;;  %vm850_vm9 = vcmp.ge.f32.partialorder %v786_v6, 0.0  ;;  %vm821_vm10 = vcmp.ge.f32.partialorder %v757_v51, 0.0 }
 0x131   :  { %v914_v54 = vmul.f32 0.01, %v786_v6  ;;  %1269 = vst.msk [vmem:[%s2346_s4 + $0x68] sm:$0xf] %vm1242_vm2, %v1470_v18  ;;  %v885_v13 = vmul.f32 0.01, %v757_v51  ;;  %v789_v15 = vadd.f32 %v1826_v38, %v718_v10  ;;  %v684_v16 = vmul.f32 %v1821_v36, %v2094_v55 }
 0x132   :  { %v946_v14 = vsel %vm818_vm8, %v754_v22, %v882_v11  ;;  %1301 = vst.msk [vmem:[%s2346_s4 + $0xe8] sm:$0xf] %vm1242_vm2, %v1502_v12  ;;  %v716_v35 = vmul.f32 %v1821_v36, %v2106_v20  ;;  %v689_v37 = vmul.f32 %v2128_v40, %v1821_v36  ;;  %v721_v40 = vmul.f32 %v2130_v28, %v1821_v36 }
 0x133   :  { %v1468_v17 = vpack.c.bf16 %v946_v14, %v946_v14  ;;  %v978_v29 = vsel %vm850_vm9, %v786_v6, %v914_v54  ;;  %v949_v25 = vsel %vm821_vm10, %v757_v51, %v885_v13  ;;  %vm853_vm11 = vcmp.ge.f32.partialorder %v789_v15, 0.0 }
 0x134   :  { %v1500_v21 = vpack.c.bf16 %v978_v29, %v978_v29  ;;  %v917_v60 = vmul.f32 0.01, %v789_v15  ;;  %v1471_v55 = vpack.c.bf16 %v949_v25, %v949_v25  ;;  %v755_v61 = vadd.f32 %v1826_v38, %v684_v16 }
 0x135   :  { %1267 = vst.msk [vmem:[%s2346_s4 + $0x60] sm:$0xf] %vm1242_vm2, %v1468_v17  ;;  %v787_v26 = vadd.f32 %v1826_v38, %v716_v35  ;;  %v760_v19 = vadd.f32 %v1826_v38, %v689_v37  ;;  %v687_v23 = vmul.f32 %v1821_v36, %v2132_v44  ;;  %v719_v30 = vmul.f32 %v1821_v36, %v2134_v45 }
 0x136   :  { %1299 = vst.msk [vmem:[%s2346_s4 + $0xe0] sm:$0xf] %vm1242_vm2, %v1500_v21  ;;  %v981_v20 = vsel %vm853_vm11, %v789_v15, %v917_v60  ;;  %1270 = vst.msk [vmem:[%s2346_s4 + $0x6c] sm:$0xf] %vm1242_vm2, %v1471_v55  ;;  %vm819_vm12 = vcmp.ge.f32.partialorder %v755_v61, 0.0  ;;  %v792_v28 = vadd.f32 %v1826_v38, %v721_v40  ;;  %v690_v2 = vmul.f32 %v2140_v47, %v1821_v36 }
 0x137   :  { %v1503_v31 = vpack.c.bf16 %v981_v20, %v981_v20  ;;  %v883_v32 = vmul.f32 0.01, %v755_v61  ;;  %vm851_vm13 = vcmp.ge.f32.partialorder %v787_v26, 0.0  ;;  %v915_v34 = vmul.f32 0.01, %v787_v26 }
 0x138   :  { %vm824_vm14 = vcmp.ge.f32.partialorder %v760_v19, 0.0  ;;  %v888_v24 = vmul.f32 0.01, %v760_v19  ;;  %v758_v45 = vadd.f32 %v1826_v38, %v687_v23  ;;  %v790_v39 = vadd.f32 %v1826_v38, %v719_v30 }
 0x139   :  { %1302 = vst.msk [vmem:[%s2346_s4 + $0xec] sm:$0xf] %vm1242_vm2, %v1503_v31  ;;  %v947_v44 = vsel %vm819_vm12, %v755_v61, %v883_v32  ;;  %v979_v42 = vsel %vm851_vm13, %v787_v26, %v915_v34  ;;  %vm856_vm15 = vcmp.ge.f32.partialorder %v792_v28, 0.0  ;;  %v920_v49 = vmul.f32 0.01, %v792_v28 }
 0x13a   :  { %v1469_v33 = vpack.c.bf16 %v947_v44, %v947_v44  ;;  %v952_v43 = vsel %vm824_vm14, %v760_v19, %v888_v24  ;;  %v1501_v46 = vpack.c.bf16 %v979_v42, %v979_v42  ;;  %vm822_vm0 = vcmp.ge.f32.partialorder %v758_v45, 0.0 }
 0x13b   :  { %v1474_v3 = vpack.c.bf16 %v952_v43, %v952_v43  ;;  %v886_v52 = vmul.f32 0.01, %v758_v45  ;;  %vm854_vm1 = vcmp.ge.f32.partialorder %v790_v39, 0.0  ;;  %v918_v53 = vmul.f32 0.01, %v790_v39 }
 0x13c   :  { %1268 = vst.msk [vmem:[%s2346_s4 + $0x64] sm:$0xf] %vm1242_vm2, %v1469_v33  ;;  %v761_v41 = vadd.f32 %v1826_v38, %v690_v2  ;;  %1300 = vst.msk [vmem:[%s2346_s4 + $0xe4] sm:$0xf] %vm1242_vm2, %v1501_v46  ;;  %v984_v47 = vsel %vm856_vm15, %v792_v28, %v920_v49  ;;  %v722_v62 = vmul.f32 %v2142_v48, %v1821_v36 }
 0x13d   :  { %1273 = vst.msk [vmem:[%s2346_s4 + $0x78] sm:$0xf] %vm1242_vm2, %v1474_v3  ;;  %v688_v4 = vmul.f32 %v1821_v36, %v2151_v57  ;;  %v720_v56 = vmul.f32 %v1821_v36, %v2153_v58  ;;  %v1506_v59 = vpack.c.bf16 %v984_v47, %v984_v47  ;;  %v950_v50 = vsel %vm822_vm0, %v758_v45, %v886_v52 }
 0x13e   :  { %v982_v63 = vsel %vm854_vm1, %v790_v39, %v918_v53  ;;  %vm825_vm3 = vcmp.ge.f32.partialorder %v761_v41, 0.0  ;;  %v1472_v5 = vpack.c.bf16 %v950_v50, %v950_v50  ;;  %v889_v9 = vmul.f32 0.01, %v761_v41 }
 0x13f   :  { %v1504_v0 = vpack.c.bf16 %v982_v63, %v982_v63  ;;  %v793_v1 = vadd.f32 %v1826_v38, %v722_v62  ;;  %1305 = vst.msk [vmem:[%s2346_s4 + $0xf8] sm:$0xf] %vm1242_vm2, %v1506_v59  ;;  %v759_v48 = vadd.f32 %v1826_v38, %v688_v4  ;;  %v791_v57 = vadd.f32 %v1826_v38, %v720_v56 }
 0x140   :  { %1271 = vst.msk [vmem:[%s2346_s4 + $0x70] sm:$0xf] %vm1242_vm2, %v1472_v5  ;;  %v953_v36 = vsel %vm825_vm3, %v761_v41, %v889_v9 }
 0x141   :  { %1303 = vst.msk [vmem:[%s2346_s4 + $0xf0] sm:$0xf] %vm1242_vm2, %v1504_v0  ;;  %vm857_vm4 = vcmp.ge.f32.partialorder %v793_v1, 0.0  ;;  %v921_v58 = vmul.f32 0.01, %v793_v1  ;;  %v1475_v22 = vpack.c.bf16 %v953_v36, %v953_v36  ;;  %vm823_vm5 = vcmp.ge.f32.partialorder %v759_v48, 0.0 }
 0x142   :  { %v887_v6 = vmul.f32 0.01, %v759_v48  ;;  %vm855_vm6 = vcmp.ge.f32.partialorder %v791_v57, 0.0  ;;  %v919_v8 = vmul.f32 0.01, %v791_v57 }
 0x143   :  { %v985_v7 = vsel %vm857_vm4, %v793_v1, %v921_v58  ;;  %1274 = vst.msk [vmem:[%s2346_s4 + $0x7c] sm:$0xf] %vm1242_vm2, %v1475_v22 }
 0x144   :  { %v1507_v38 = vpack.c.bf16 %v985_v7, %v985_v7  ;;  %v951_v51 = vsel %vm823_vm5, %v759_v48, %v887_v6  ;;  %v983_v18 = vsel %vm855_vm6, %v791_v57, %v919_v8 }
 0x145   :  { %v1473_v10 = vpack.c.bf16 %v951_v51, %v951_v51  ;;  %v1505_v27 = vpack.c.bf16 %v983_v18, %v983_v18 }
 0x146   :  { %1306 = vst.msk [vmem:[%s2346_s4 + $0xfc] sm:$0xf] %vm1242_vm2, %v1507_v38 }
 0x147   :  { %1272 = vst.msk [vmem:[%s2346_s4 + $0x74] sm:$0xf] %vm1242_vm2, %v1473_v10  ;;  %1304 = vst.msk [vmem:[%s2346_s4 + $0xf4] sm:$0xf] %vm1242_vm2, %v1505_v27 }

// kernel: _conv_block_impl.4
= control target key start
LH: loop header
LB: loop body
LE: loop exit
PB: predicated region body
PF: predicated region fallthrough
CT: control target
= control target key end

     0   :  { %vm1340_vm0 = vcmask 1041408   ;;  %vm287_vm1 = vcmask 588800   ;;  %vm1243_vm2 = vcmask 31744   ;;  %vm384_vm3 = vcmask 1043456   ;;  %s3155_s2 = inlined_call_operand.vmem [shape: bf16[72,8], index: 2, kind: input, shape index: {}]   ;;  %s3156_s5 = inlined_call_operand.vmem [shape: bf16[4,8], index: 5, kind: input, shape index: {}]   ;;  %s3157_s0 = inlined_call_operand.vmem [shape: bf16[512,72], index: 0, kind: input, shape index: {}]   ;;  %s3158_s1 = inlined_call_operand.vmem [shape: bf16[512,4], index: 1, kind: input, shape index: {}]   ;;  %s3159_s3 = inlined_call_operand.vmem [shape: f32[1,8], index: 3, kind: input, shape index: {}]   ;;  %s3160_s4 = inlined_call_operand.vmem [shape: f32[1,8], index: 4, kind: input, shape index: {}]   ;;  %s3161_s6 = inlined_call_operand.vmem [shape: f32[1,8], index: 6, kind: input, shape index: {}]   ;;  %s3162_s7 = inlined_call_operand.vmem [shape: f32[512,8], index: 7, kind: output, shape index: {}]  }
   0x1   :  { %v2114_v0 = vld [vmem:[%s3155_s2] sm:$0xff]   ;;  %v2115_v1 = vld [vmem:[%s3155_s2 + $0x8] sm:$0xff]   ;;  %v2116_v2 = vld [vmem:[%s3155_s2 + $0x10] sm:$0xff]   ;;  %vm1697_vm5 = vcmask 64512  }
   0x2   :  { %1972 = vmatprep.subr.bf16.mxu0 %v2114_v0  ;;  %v1075_v3 = vld [vmem:[%s3156_s5] sm:$0x3]  ;;  %v2117_v6 = vld [vmem:[%s3155_s2 + $0x18] sm:$0xff]   ;;  %v2122_v8 = vld [vmem:[%s3158_s1 + $0x8] sm:$0xff]  }
   0x3   :  { %1973 = vmatpush3.bf16.msra.mxu0 %v2114_v0  ;;  %2113 = vmatprep.subr.msk.bf16.mxu1 %vm1340_vm0, %v1075_v3  ;;  %v2119_v4 = vld [vmem:[%s3157_s0] sm:$0xff]   ;;  %v1342_v5 = vsel %vm1340_vm0, %v1075_v3, 0  ;;  %v2125_v9 = vld [vmem:[%s3158_s1 + $0x10] sm:$0xff]   ;;  %v2126_v11 = vld [vmem:[%s3158_s1 + $0x18] sm:$0xff]  }
   0x4   :  { %1974 = vmatprep.subr.bf16.mxu0 %v2115_v1  ;;  %2047 = vmatpush3.bf16.msra.mxu1 %v1342_v5  ;;  %v2121_v7 = vld [vmem:[%s3158_s1] sm:$0xff]   ;;  %v2120_v14 = vld [vmem:[%s3157_s0 + $0x8] sm:$0xff]   ;;  %v2123_v15 = vld [vmem:[%s3157_s0 + $0x10] sm:$0xff]  }
   0x5   :  { %1982 = vmatprep.mubr.msk.bf16.mxu0 %vm287_vm1, %v2119_v4  ;;  %2048 = vmatprep.mubr.msk.bf16.mxu1 %vm1243_vm2, %v2121_v7  ;;  %v2118_v10 = vld [vmem:[%s3155_s2 + $0x20] ss:$0 sps:$4 sm:$0xff]   ;;  %v2130_v16 = vld [vmem:[%s3158_s1 + $0x28] sm:$0xff]   ;;  %v2133_v17 = vld [vmem:[%s3158_s1 + $0x30] sm:$0xff]  }
   0x6   :  { %v2129_v12 = vld [vmem:[%s3158_s1 + $0x20] sm:$0xff]   ;;  %v386_v13 = vsel %vm384_vm3, %v2118_v10, 0  ;;  %v2124_v18 = vld [vmem:[%s3157_s0 + $0x18] sm:$0xff]   ;;  %v2128_v22 = vld [vmem:[%s3157_s0 + $0x28] sm:$0xff]  }
   0x7   :  { %1975 = vmatpush3.bf16.msra.mxu0 %v2115_v1  ;;  %2049 = vmatmul.mubr.msk.bf16.vlgmr.msra.gmra.mrb[0].mxu1 %vm1243_vm2, %v2122_v8  ;;  %v2127_v19 = vld [vmem:[%s3157_s0 + $0x20] sm:$0xff]   ;;  %v2134_v20 = vld [vmem:[%s3158_s1 + $0x38] sm:$0xff]   ;;  %v2131_v23 = vld [vmem:[%s3157_s0 + $0x30] sm:$0xff]  }
   0x8   :  { %1976 = vmatprep.subr.bf16.mxu0 %v2116_v2  ;;  %2052 = vmatprep.mubr.msk.bf16.mxu1 %vm1243_vm2, %v2125_v9  ;;  %v2137_v21 = vld [vmem:[%s3158_s1 + $0x40] sm:$0xff]   ;;  %v2138_v24 = vld [vmem:[%s3158_s1 + $0x48] sm:$0xff]   ;;  %v2141_v25 = vld [vmem:[%s3158_s1 + $0x50] sm:$0xff]  }
   0x9   :  { %v2132_v26 = vld [vmem:[%s3157_s0 + $0x38] sm:$0xff]   ;;  %v2135_v27 = vld [vmem:[%s3157_s0 + $0x40] sm:$0xff]   ;;  %v2136_v30 = vld [vmem:[%s3157_s0 + $0x48] sm:$0xff]  }
   0xa   :  { %v2142_v28 = vld [vmem:[%s3158_s1 + $0x58] sm:$0xff]   ;;  %v2145_v29 = vld [vmem:[%s3158_s1 + $0x60] sm:$0xff]   ;;  %v2139_v31 = vld [vmem:[%s3157_s0 + $0x50] sm:$0xff]  }
   0xb   :  { %1977 = vmatpush3.bf16.msra.mxu0 %v2116_v2  ;;  %v2146_v32 = vld [vmem:[%s3158_s1 + $0x68] sm:$0xff]   ;;  %v2149_v33 = vld [vmem:[%s3158_s1 + $0x70] sm:$0xff]   ;;  %v2140_v34 = vld [vmem:[%s3157_s0 + $0x58] sm:$0xff]  }
   0xc   :  { %1978 = vmatprep.subr.bf16.mxu0 %v2117_v6  ;;  %v2143_v35 = vld [vmem:[%s3157_s0 + $0x60] sm:$0xff]   ;;  %v2150_v36 = vld [vmem:[%s3158_s1 + $0x78] sm:$0xff]   ;;  %v2144_v38 = vld [vmem:[%s3157_s0 + $0x68] sm:$0xff]  }
   0xd   :  { %v2153_v37 = vld [vmem:[%s3158_s1 + $0x80] sm:$0xff]   ;;  %v2147_v39 = vld [vmem:[%s3157_s0 + $0x70] sm:$0xff]   ;;  %v2154_v40 = vld [vmem:[%s3158_s1 + $0x88] sm:$0xff]  }
   0xe   :  { %v2157_v41 = vld [vmem:[%s3158_s1 + $0x90] sm:$0xff]   ;;  %v2148_v42 = vld [vmem:[%s3157_s0 + $0x78] sm:$0xff]   ;;  %v2151_v43 = vld [vmem:[%s3157_s0 + $0x80] sm:$0xff]  }
   0xf   :  { %1979 = vmatpush3.bf16.msra.mxu0 %v2117_v6  ;;  %2053 = vmatmul.mubr.msk.bf16.gmra.mrb[4].mxu1 %vm1243_vm2, %v2126_v11  ;;  %v2158_v44 = vld [vmem:[%s3158_s1 + $0x98] sm:$0xff]   ;;  %v2161_v45 = vld [vmem:[%s3158_s1 + $0xa0] sm:$0xff]   ;;  %v2152_v46 = vld [vmem:[%s3157_s0 + $0x88] sm:$0xff]  }
  0x10   :  { %2112 = vmatprep.subr.msk.bf16.mxu0 %vm384_vm3, %v2118_v10  ;;  %2056 = vmatprep.mubr.msk.bf16.mxu1 %vm1243_vm2, %v2129_v12  ;;  %v2155_v47 = vld [vmem:[%s3157_s0 + $0x90] sm:$0xff]   ;;  %v2162_v48 = vld [vmem:[%s3158_s1 + $0xa8] sm:$0xff]   ;;  %v2156_v50 = vld [vmem:[%s3157_s0 + $0x98] sm:$0xff]  }
  0x11   :  { %v2165_v49 = vld [vmem:[%s3158_s1 + $0xb0] sm:$0xff]   ;;  %v2159_v51 = vld [vmem:[%s3157_s0 + $0xa0] sm:$0xff]   ;;  %v2166_v52 = vld [vmem:[%s3158_s1 + $0xb8] sm:$0xff]  }
  0x12   :  { %v2169_v53 = vld [vmem:[%s3158_s1 + $0xc0] sm:$0xff]   ;;  %v2160_v54 = vld [vmem:[%s3157_s0 + $0xa8] sm:$0xff]   ;;  %v2163_v55 = vld [vmem:[%s3157_s0 + $0xb0] sm:$0xff]  }
  0x13   :  { %1981 = vmatpush3.bf16.msra.mxu0 %v386_v13  ;;  %v2170_v56 = vld [vmem:[%s3158_s1 + $0xc8] sm:$0xff]   ;;  %v2173_v57 = vld [vmem:[%s3158_s1 + $0xd0] sm:$0xff]   ;;  %v2164_v58 = vld [vmem:[%s3157_s0 + $0xb8] sm:$0xff]  }
  0x14   :  { %v2167_v59 = vld [vmem:[%s3157_s0 + $0xc0] sm:$0xff]   ;;  %v2174_v60 = vld [vmem:[%s3158_s1 + $0xd8] sm:$0xff]   ;;  %v2168_v62 = vld [vmem:[%s3157_s0 + $0xc8] sm:$0xff]  }
  0x15   :  { %v2177_v61 = vld [vmem:[%s3158_s1 + $0xe0] sm:$0xff]   ;;  %v2171_v63 = vld [vmem:[%s3157_s0 + $0xd0] sm:$0xff]   ;;  %v2178_v0 = vld [vmem:[%s3158_s1 + $0xe8] sm:$0xff]  }
  0x16   :  { %1983 = vmatmul.mubr.msk.bf16.vlgmr.msra.gmra.mrb[0].mxu0 %vm287_vm1, %v2120_v14  ;;  %v2181_v1 = vld [vmem:[%s3158_s1 + $0xf0] sm:$0xff]   ;;  %v2172_v2 = vld [vmem:[%s3157_s0 + $0xd8] sm:$0xff]   ;;  %v2175_v3 = vld [vmem:[%s3157_s0 + $0xe0] sm:$0xff]  }
  0x17   :  { %1986 = vmatprep.mubr.msk.bf16.mxu0 %vm287_vm1, %v2123_v15  ;;  %2057 = vmatmul.mubr.msk.bf16.gmra.mrb[8].mxu1 %vm1243_vm2, %v2130_v16  ;;  %v2182_v4 = vld [vmem:[%s3158_s1 + $0xf8] sm:$0xff]   ;;  %v2176_v5 = vld [vmem:[%s3157_s0 + $0xe8] sm:$0xff]   ;;  %v2179_v6 = vld [vmem:[%s3157_s0 + $0xf0] sm:$0xff]  }
  0x18   :  { %2060 = vmatprep.mubr.msk.bf16.mxu1 %vm1243_vm2, %v2133_v17  ;;  %v2180_v7 = vld [vmem:[%s3157_s0 + $0xf8] sm:$0xff]   ;;  %v2505_v14 = vld [vmem:[%s3159_s3] ss:$0 sm:$0xff] }
  0x1e   :  { %1987 = vmatmul.mubr.msk.bf16.gmra.mrb[4].mxu0 %vm287_vm1, %v2124_v18  ;;  %v2514_v18 = vld [vmem:[%s3160_s4] ss:$0 sm:$0xff] }
  0x1f   :  { %1990 = vmatprep.mubr.msk.bf16.mxu0 %vm287_vm1, %v2127_v19  ;;  %2061 = vmatmul.mubr.msk.bf16.gmra.mrb[12].mxu1 %vm1243_vm2, %v2134_v20 }
  0x20   :  { %2064 = vmatprep.mubr.msk.bf16.mxu1 %vm1243_vm2, %v2137_v21  ;;  %v2520_v21 = vld [vmem:[%s3161_s6] ss:$0 sm:$0xff] }
  0x26   :  { %1991 = vmatmul.mubr.msk.bf16.gmra.mrb[8].mxu0 %vm287_vm1, %v2128_v22 }
  0x27   :  { %1994 = vmatprep.mubr.msk.bf16.mxu0 %vm287_vm1, %v2131_v23  ;;  %2065 = vmatmul.mubr.msk.bf16.gmra.mrb[16].mxu1 %vm1243_vm2, %v2138_v24 }
  0x28   :  { %2068 = vmatprep.mubr.msk.bf16.mxu1 %vm1243_vm2, %v2141_v25 }
  0x2e   :  { %1995 = vmatmul.mubr.msk.bf16.gmra.mrb[12].mxu0 %vm287_vm1, %v2132_v26 }
  0x2f   :  { %1998 = vmatprep.mubr.msk.bf16.mxu0 %vm287_vm1, %v2135_v27  ;;  %2069 = vmatmul.mubr.msk.bf16.gmra.mrb[20].mxu1 %vm1243_vm2, %v2142_v28 }
  0x30   :  { %2072 = vmatprep.mubr.msk.bf16.mxu1 %vm1243_vm2, %v2145_v29 }
  0x36   :  { %1999 = vmatmul.mubr.msk.bf16.gmra.mrb[16].mxu0 %vm287_vm1, %v2136_v30 }
  0x37   :  { %2002 = vmatprep.mubr.msk.bf16.mxu0 %vm287_vm1, %v2139_v31  ;;  %2073 = vmatmul.mubr.msk.bf16.gmra.mrb[24].mxu1 %vm1243_vm2, %v2146_v32 }
  0x38   :  { %2076 = vmatprep.mubr.msk.bf16.mxu1 %vm1243_vm2, %v2149_v33 }
  0x3e   :  { %2003 = vmatmul.mubr.msk.bf16.gmra.mrb[20].mxu0 %vm287_vm1, %v2140_v34 }
  0x3f   :  { %2006 = vmatprep.mubr.msk.bf16.mxu0 %vm287_vm1, %v2143_v35  ;;  %2077 = vmatmul.mubr.msk.bf16.gmra.mrb[28].mxu1 %vm1243_vm2, %v2150_v36 }
  0x40   :  { %2080 = vmatprep.mubr.msk.bf16.mxu1 %vm1243_vm2, %v2153_v37 }
  0x46   :  { %2007 = vmatmul.mubr.msk.bf16.gmra.mrb[24].mxu0 %vm287_vm1, %v2144_v38 }
  0x47   :  { %2010 = vmatprep.mubr.msk.bf16.mxu0 %vm287_vm1, %v2147_v39  ;;  %2081 = vmatmul.mubr.msk.bf16.gmra.mrb[32].mxu1 %vm1243_vm2, %v2154_v40 }
  0x48   :  { %2084 = vmatprep.mubr.msk.bf16.mxu1 %vm1243_vm2, %v2157_v41 }
  0x4e   :  { %2011 = vmatmul.mubr.msk.bf16.gmra.mrb[28].mxu0 %vm287_vm1, %v2148_v42 }
  0x4f   :  { %2014 = vmatprep.mubr.msk.bf16.mxu0 %vm287_vm1, %v2151_v43  ;;  %2085 = vmatmul.mubr.msk.bf16.gmra.mrb[36].mxu1 %vm1243_vm2, %v2158_v44 }
  0x50   :  { %2088 = vmatprep.mubr.msk.bf16.mxu1 %vm1243_vm2, %v2161_v45 }
  0x56   :  { %2015 = vmatmul.mubr.msk.bf16.gmra.mrb[32].mxu0 %vm287_vm1, %v2152_v46 }
  0x57   :  { %2018 = vmatprep.mubr.msk.bf16.mxu0 %vm287_vm1, %v2155_v47  ;;  %2089 = vmatmul.mubr.msk.bf16.gmra.mrb[40].mxu1 %vm1243_vm2, %v2162_v48 }
  0x58   :  { %2092 = vmatprep.mubr.msk.bf16.mxu1 %vm1243_vm2, %v2165_v49 }
  0x5e   :  { %2019 = vmatmul.mubr.msk.bf16.gmra.mrb[36].mxu0 %vm287_vm1, %v2156_v50 }
  0x5f   :  { %2022 = vmatprep.mubr.msk.bf16.mxu0 %vm287_vm1, %v2159_v51  ;;  %2093 = vmatmul.mubr.msk.bf16.gmra.mrb[44].mxu1 %vm1243_vm2, %v2166_v52 }
  0x60   :  { %2096 = vmatprep.mubr.msk.bf16.mxu1 %vm1243_vm2, %v2169_v53 }
  0x66   :  { %2023 = vmatmul.mubr.msk.bf16.gmra.mrb[40].mxu0 %vm287_vm1, %v2160_v54 }
  0x67   :  { %2026 = vmatprep.mubr.msk.bf16.mxu0 %vm287_vm1, %v2163_v55  ;;  %2097 = vmatmul.mubr.msk.bf16.gmra.mrb[48].mxu1 %vm1243_vm2, %v2170_v56 }
  0x68   :  { %2100 = vmatprep.mubr.msk.bf16.mxu1 %vm1243_vm2, %v2173_v57 }
  0x6e   :  { %2027 = vmatmul.mubr.msk.bf16.gmra.mrb[44].mxu0 %vm287_vm1, %v2164_v58 }
  0x6f   :  { %2030 = vmatprep.mubr.msk.bf16.mxu0 %vm287_vm1, %v2167_v59  ;;  %2101 = vmatmul.mubr.msk.bf16.gmra.mrb[52].mxu1 %vm1243_vm2, %v2174_v60 }
  0x70   :  { %2104 = vmatprep.mubr.msk.bf16.mxu1 %vm1243_vm2, %v2177_v61 }
  0x76   :  { %2031 = vmatmul.mubr.msk.bf16.gmra.mrb[48].mxu0 %vm287_vm1, %v2168_v62 }
  0x77   :  { %2034 = vmatprep.mubr.msk.bf16.mxu0 %vm287_vm1, %v2171_v63  ;;  %2105 = vmatmul.mubr.msk.bf16.gmra.mrb[56].mxu1 %vm1243_vm2, %v2178_v0 }
  0x78   :  { %2108 = vmatprep.mubr.msk.bf16.mxu1 %vm1243_vm2, %v2181_v1 }
  0x7e   :  { %2035 = vmatmul.mubr.msk.bf16.gmra.mrb[52].mxu0 %vm287_vm1, %v2172_v2 }
  0x7f   :  { %2038 = vmatprep.mubr.msk.bf16.mxu0 %vm287_vm1, %v2175_v3  ;;  %2109 = vmatmul.mubr.msk.bf16.gmra.mrb[60].mxu1 %vm1243_vm2, %v2182_v4 }
  0x86   :  { %2039 = vmatmul.mubr.msk.bf16.gmra.mrb[56].mxu0 %vm287_vm1, %v2176_v5 }
  0x87   :  { %2042 = vmatprep.mubr.msk.bf16.mxu0 %vm287_vm1, %v2179_v6 }
  0x8e   :  { %2043 = vmatmul.mubr.msk.bf16.gmra.mrb[60].mxu0 %vm287_vm1, %v2180_v7 }
  0xda   :  { %v2050_v8 = vpop.f32.mrb[0].mxu1 }
  0xdb   :  { %v1378_v9 = vpop.f32.mrb[1].mxu1  ;;  %v1387_v28 = vadd.f32 %v2050_v8, %v2520_v21 }
  0xdc   :  { %v2051_v10 = vpop.f32.mrb[2].mxu1  ;;  %v1379_v33 = vadd.f32 %v2520_v21, %v1378_v9 }
  0xdd   :  { %v1381_v11 = vpop.f32.mrb[3].mxu1  ;;  %v1390_v40 = vadd.f32 %v2051_v10, %v2520_v21 }
  0xde   :  { %v1382_v48 = vadd.f32 %v2520_v21, %v1381_v11 }
  0xe2   :  { %v2054_v12 = vpop.f32.mrb[4].mxu1 }
  0xe3   :  { %v2500_v13 = vpop.f32.mrb[5].mxu1  ;;  %v1403_v60 = vadd.f32 %v2054_v12, %v2520_v21 }
  0xe4   :  { %v2507_v15 = vpop.f32.mrb[6].mxu1  ;;  %v1395_v1 = vadd.f32 %v2520_v21, %v2500_v13 }
  0xe5   :  { %v2509_v16 = vpop.f32.mrb[7].mxu1  ;;  %v1406_v8 = vadd.f32 %v2507_v15, %v2520_v21 }
  0xe9   :  { %v1984_v17 = vpop.f32.mrb[0].mxu0 }
  0xea   :  { %v686_v19 = vmul.f32 %v1984_v17, %v2505_v14  ;;  %v422_v20 = vpop.f32.mrb[1].mxu0  ;;  %v2528_v30 = vpop.f32.mrb[8].mxu1 }
  0xeb   :  { %v684_v22 = vmul.f32 %v2505_v14, %v422_v20  ;;  %v1985_v23 = vpop.f32.mrb[2].mxu0  ;;  %v2532_v34 = vpop.f32.mrb[9].mxu1  ;;  %v1398_v20 = vadd.f32 %v2520_v21, %v2509_v16 }
  0xec   :  { %v757_v24 = vadd.f32 %v2514_v18, %v686_v19  ;;  %v687_v25 = vmul.f32 %v1985_v23, %v2505_v14  ;;  %v425_v26 = vpop.f32.mrb[3].mxu0  ;;  %v2535_v37 = vpop.f32.mrb[10].mxu1 }
  0xed   :  { %v755_v27 = vadd.f32 %v2514_v18, %v684_v22  ;;  %v685_v29 = vmul.f32 %v2505_v14, %v425_v26  ;;  %v2538_v41 = vpop.f32.mrb[11].mxu1 }
  0xee   :  { %v885_v31 = vmul.f32 0.01, %v757_v24  ;;  %v758_v32 = vadd.f32 %v2514_v18, %v687_v25  ;;  %vm821_vm4 = vcmp.ge.f32.partialorder %v757_v24, 0.0 }
  0xef   :  { %v883_v35 = vmul.f32 0.01, %v755_v27  ;;  %v756_v36 = vadd.f32 %v2514_v18, %v685_v29  ;;  %vm819_vm6 = vcmp.ge.f32.partialorder %v755_v27, 0.0 }
  0xf0   :  { %v886_v38 = vmul.f32 0.01, %v758_v32  ;;  %v949_v39 = vsel %vm821_vm4, %v757_v24, %v885_v31  ;;  %vm822_vm7 = vcmp.ge.f32.partialorder %v758_v32, 0.0 }
  0xf1   :  { %v1635_v42 = vadd.f32 %v1387_v28, %v949_v39  ;;  %v884_v43 = vmul.f32 0.01, %v756_v36  ;;  %v947_v44 = vsel %vm819_vm6, %v755_v27, %v883_v35  ;;  %vm820_vm8 = vcmp.ge.f32.partialorder %v756_v36, 0.0  ;;  %v1988_v45 = vpop.f32.mrb[4].mxu0 }
  0xf2   :  { %v1633_v46 = vadd.f32 %v1379_v33, %v947_v44  ;;  %v950_v47 = vsel %vm822_vm7, %v758_v32, %v886_v38  ;;  %v690_v49 = vmul.f32 %v1988_v45, %v2505_v14  ;;  %v438_v50 = vpop.f32.mrb[5].mxu0  ;;  %v2560_v62 = vpop.f32.mrb[12].mxu1  ;;  %v1419_v32 = vadd.f32 %v2528_v30, %v2520_v21 }
  0xf3   :  { %1700 = vst.msk [vmem:[%s3162_s7 + $0x10] sm:$0xff] %vm1697_vm5, %v1635_v42  ;;  %v1636_v51 = vadd.f32 %v1390_v40, %v950_v47  ;;  %v948_v52 = vsel %vm820_vm8, %v756_v36, %v884_v43  ;;  %v688_v53 = vmul.f32 %v2505_v14, %v438_v50  ;;  %v1989_v54 = vpop.f32.mrb[6].mxu0  ;;  %v2569_v2 = vpop.f32.mrb[13].mxu1  ;;  %v1411_v39 = vadd.f32 %v2520_v21, %v2532_v34 }
  0xf4   :  { %1698 = vst.msk [vmem:[%s3162_s7] sm:$0xff] %vm1697_vm5, %v1633_v46  ;;  %v1634_v55 = vadd.f32 %v1382_v48, %v948_v52  ;;  %v761_v56 = vadd.f32 %v2514_v18, %v690_v49  ;;  %v691_v57 = vmul.f32 %v1989_v54, %v2505_v14  ;;  %v441_v58 = vpop.f32.mrb[7].mxu0  ;;  %v2572_v5 = vpop.f32.mrb[14].mxu1  ;;  %v1422_v46 = vadd.f32 %v2535_v37, %v2520_v21 }
  0xf5   :  { %1701 = vst.msk [vmem:[%s3162_s7 + $0x18] sm:$0xff] %vm1697_vm5, %v1636_v51  ;;  %v759_v59 = vadd.f32 %v2514_v18, %v688_v53  ;;  %v689_v61 = vmul.f32 %v2505_v14, %v441_v58  ;;  %v2576_v9 = vpop.f32.mrb[15].mxu1  ;;  %v1414_v53 = vadd.f32 %v2520_v21, %v2538_v41 }
  0xf6   :  { %1699 = vst.msk [vmem:[%s3162_s7 + $0x8] sm:$0xff] %vm1697_vm5, %v1634_v55  ;;  %v889_v63 = vmul.f32 0.01, %v761_v56  ;;  %v762_v0 = vadd.f32 %v2514_v18, %v691_v57  ;;  %vm825_vm9 = vcmp.ge.f32.partialorder %v761_v56, 0.0 }
  0xf7   :  { %v887_v3 = vmul.f32 0.01, %v759_v59  ;;  %v760_v4 = vadd.f32 %v2514_v18, %v689_v61  ;;  %vm823_vm10 = vcmp.ge.f32.partialorder %v759_v59, 0.0 }
  0xf8   :  { %v890_v6 = vmul.f32 0.01, %v762_v0  ;;  %v953_v7 = vsel %vm825_vm9, %v761_v56, %v889_v63  ;;  %vm826_vm11 = vcmp.ge.f32.partialorder %v762_v0, 0.0 }
  0xf9   :  { %v1639_v10 = vadd.f32 %v1403_v60, %v953_v7  ;;  %v888_v11 = vmul.f32 0.01, %v760_v4  ;;  %v951_v12 = vsel %vm823_vm10, %v759_v59, %v887_v3  ;;  %vm824_vm12 = vcmp.ge.f32.partialorder %v760_v4, 0.0  ;;  %v1992_v13 = vpop.f32.mrb[8].mxu0 }
  0xfa   :  { %v1637_v17 = vadd.f32 %v1395_v1, %v951_v12  ;;  %v954_v19 = vsel %vm826_vm11, %v762_v0, %v890_v6  ;;  %v694_v22 = vmul.f32 %v1992_v13, %v2505_v14  ;;  %v454_v23 = vpop.f32.mrb[9].mxu0  ;;  %v2600_v35 = vpop.f32.mrb[16].mxu1  ;;  %v1435_v0 = vadd.f32 %v2560_v62, %v2520_v21 }
  0xfb   :  { %1704 = vst.msk [vmem:[%s3162_s7 + $0x30] sm:$0xff] %vm1697_vm5, %v1639_v10  ;;  %v1640_v15 = vadd.f32 %v1406_v8, %v954_v19  ;;  %v952_v24 = vsel %vm824_vm12, %v760_v4, %v888_v11  ;;  %v692_v25 = vmul.f32 %v2505_v14, %v454_v23  ;;  %v1993_v26 = vpop.f32.mrb[10].mxu0  ;;  %v2609_v40 = vpop.f32.mrb[17].mxu1  ;;  %v1427_v7 = vadd.f32 %v2520_v21, %v2569_v2 }
  0xfc   :  { %1702 = vst.msk [vmem:[%s3162_s7 + $0x20] sm:$0xff] %vm1697_vm5, %v1637_v17  ;;  %v1638_v27 = vadd.f32 %v1398_v20, %v952_v24  ;;  %v765_v16 = vadd.f32 %v2514_v18, %v694_v22  ;;  %v695_v28 = vmul.f32 %v1993_v26, %v2505_v14  ;;  %v457_v29 = vpop.f32.mrb[11].mxu0  ;;  %v2612_v43 = vpop.f32.mrb[18].mxu1  ;;  %v1438_v17 = vadd.f32 %v2572_v5, %v2520_v21 }
  0xfd   :  { %1705 = vst.msk [vmem:[%s3162_s7 + $0x38] sm:$0xff] %vm1697_vm5, %v1640_v15  ;;  %v763_v31 = vadd.f32 %v2514_v18, %v692_v25  ;;  %v693_v33 = vmul.f32 %v2505_v14, %v457_v29  ;;  %v2616_v47 = vpop.f32.mrb[19].mxu1  ;;  %v1430_v25 = vadd.f32 %v2520_v21, %v2576_v9 }
  0xfe   :  { %1703 = vst.msk [vmem:[%s3162_s7 + $0x28] sm:$0xff] %vm1697_vm5, %v1638_v27  ;;  %v893_v36 = vmul.f32 0.01, %v765_v16  ;;  %v766_v38 = vadd.f32 %v2514_v18, %v695_v28  ;;  %vm829_vm13 = vcmp.ge.f32.partialorder %v765_v16, 0.0 }
  0xff   :  { %v891_v42 = vmul.f32 0.01, %v763_v31  ;;  %v764_v30 = vadd.f32 %v2514_v18, %v693_v33  ;;  %vm827_vm14 = vcmp.ge.f32.partialorder %v763_v31, 0.0 }
 0x100   :  { %v894_v44 = vmul.f32 0.01, %v766_v38  ;;  %v957_v45 = vsel %vm829_vm13, %v765_v16, %v893_v36  ;;  %vm830_vm15 = vcmp.ge.f32.partialorder %v766_v38, 0.0 }
 0x101   :  { %v1643_v48 = vadd.f32 %v1419_v32, %v957_v45  ;;  %v892_v49 = vmul.f32 0.01, %v764_v30  ;;  %v955_v50 = vsel %vm827_vm14, %v763_v31, %v891_v42  ;;  %vm828_vm0 = vcmp.ge.f32.partialorder %v764_v30, 0.0  ;;  %v1996_v34 = vpop.f32.mrb[12].mxu0 }
 0x102   :  { %v1641_v51 = vadd.f32 %v1411_v39, %v955_v50  ;;  %v958_v52 = vsel %vm830_vm15, %v766_v38, %v894_v44  ;;  %v698_v54 = vmul.f32 %v1996_v34, %v2505_v14  ;;  %v470_v55 = vpop.f32.mrb[13].mxu0  ;;  %v2640_v3 = vpop.f32.mrb[20].mxu1  ;;  %v1451_v38 = vadd.f32 %v2600_v35, %v2520_v21 }
 0x103   :  { %1708 = vst.msk [vmem:[%s3162_s7 + $0x50] sm:$0xff] %vm1697_vm5, %v1643_v48  ;;  %v1644_v37 = vadd.f32 %v1422_v46, %v958_v52  ;;  %v956_v56 = vsel %vm828_vm0, %v764_v30, %v892_v49  ;;  %v696_v57 = vmul.f32 %v2505_v14, %v470_v55  ;;  %v1997_v58 = vpop.f32.mrb[14].mxu0  ;;  %v2649_v8 = vpop.f32.mrb[21].mxu1  ;;  %v1443_v45 = vadd.f32 %v2520_v21, %v2609_v40 }
 0x104   :  { %1706 = vst.msk [vmem:[%s3162_s7 + $0x40] sm:$0xff] %vm1697_vm5, %v1641_v51  ;;  %v1642_v59 = vadd.f32 %v1414_v53, %v956_v56  ;;  %v769_v41 = vadd.f32 %v2514_v18, %v698_v54  ;;  %v699_v60 = vmul.f32 %v1997_v58, %v2505_v14  ;;  %v473_v61 = vpop.f32.mrb[15].mxu0  ;;  %v2652_v11 = vpop.f32.mrb[22].mxu1  ;;  %v1454_v51 = vadd.f32 %v2612_v43, %v2520_v21 }
 0x105   :  { %1709 = vst.msk [vmem:[%s3162_s7 + $0x58] sm:$0xff] %vm1697_vm5, %v1644_v37  ;;  %v767_v63 = vadd.f32 %v2514_v18, %v696_v57  ;;  %v697_v1 = vmul.f32 %v2505_v14, %v473_v61  ;;  %v2656_v19 = vpop.f32.mrb[23].mxu1  ;;  %v1446_v57 = vadd.f32 %v2520_v21, %v2616_v47 }
 0x106   :  { %1707 = vst.msk [vmem:[%s3162_s7 + $0x48] sm:$0xff] %vm1697_vm5, %v1642_v59  ;;  %v897_v4 = vmul.f32 0.01, %v769_v41  ;;  %v770_v6 = vadd.f32 %v2514_v18, %v699_v60  ;;  %vm833_vm1 = vcmp.ge.f32.partialorder %v769_v41, 0.0 }
 0x107   :  { %v895_v10 = vmul.f32 0.01, %v767_v63  ;;  %v768_v62 = vadd.f32 %v2514_v18, %v697_v1  ;;  %vm831_vm2 = vcmp.ge.f32.partialorder %v767_v63, 0.0 }
 0x108   :  { %v898_v12 = vmul.f32 0.01, %v770_v6  ;;  %v961_v13 = vsel %vm833_vm1, %v769_v41, %v897_v4  ;;  %vm834_vm3 = vcmp.ge.f32.partialorder %v770_v6, 0.0 }
 0x109   :  { %v1647_v20 = vadd.f32 %v1435_v0, %v961_v13  ;;  %v896_v22 = vmul.f32 0.01, %v768_v62  ;;  %v959_v23 = vsel %vm831_vm2, %v767_v63, %v895_v10  ;;  %vm832_vm4 = vcmp.ge.f32.partialorder %v768_v62, 0.0  ;;  %v2000_v2 = vpop.f32.mrb[16].mxu0 }
 0x10a   :  { %v1645_v15 = vadd.f32 %v1427_v7, %v959_v23  ;;  %v962_v24 = vsel %vm834_vm3, %v770_v6, %v898_v12  ;;  %v702_v26 = vmul.f32 %v2000_v2, %v2505_v14  ;;  %v486_v27 = vpop.f32.mrb[17].mxu0  ;;  %v2680_v42 = vpop.f32.mrb[24].mxu1  ;;  %v1467_v6 = vadd.f32 %v2640_v3, %v2520_v21 }
 0x10b   :  { %1712 = vst.msk [vmem:[%s3162_s7 + $0x70] sm:$0xff] %vm1697_vm5, %v1647_v20  ;;  %v1648_v5 = vadd.f32 %v1438_v17, %v962_v24  ;;  %v960_v16 = vsel %vm832_vm4, %v768_v62, %v896_v22  ;;  %v700_v28 = vmul.f32 %v2505_v14, %v486_v27  ;;  %v2001_v29 = vpop.f32.mrb[18].mxu0  ;;  %v2689_v46 = vpop.f32.mrb[25].mxu1  ;;  %v1459_v13 = vadd.f32 %v2520_v21, %v2649_v8 }
 0x10c   :  { %1710 = vst.msk [vmem:[%s3162_s7 + $0x60] sm:$0xff] %vm1697_vm5, %v1645_v15  ;;  %v1646_v31 = vadd.f32 %v1430_v25, %v960_v16  ;;  %v773_v9 = vadd.f32 %v2514_v18, %v702_v26  ;;  %v703_v32 = vmul.f32 %v2001_v29, %v2505_v14  ;;  %v489_v33 = vpop.f32.mrb[19].mxu0  ;;  %v2692_v49 = vpop.f32.mrb[26].mxu1  ;;  %v1470_v15 = vadd.f32 %v2652_v11, %v2520_v21 }
 0x10d   :  { %1713 = vst.msk [vmem:[%s3162_s7 + $0x78] sm:$0xff] %vm1697_vm5, %v1648_v5  ;;  %v771_v36 = vadd.f32 %v2514_v18, %v700_v28  ;;  %v701_v39 = vmul.f32 %v2505_v14, %v489_v33  ;;  %v2696_v52 = vpop.f32.mrb[27].mxu1  ;;  %v1462_v28 = vadd.f32 %v2520_v21, %v2656_v19 }
 0x10e   :  { %1711 = vst.msk [vmem:[%s3162_s7 + $0x68] sm:$0xff] %vm1697_vm5, %v1646_v31  ;;  %v901_v30 = vmul.f32 0.01, %v773_v9  ;;  %v774_v44 = vadd.f32 %v2514_v18, %v703_v32  ;;  %vm837_vm6 = vcmp.ge.f32.partialorder %v773_v9, 0.0 }
 0x10f   :  { %v899_v48 = vmul.f32 0.01, %v771_v36  ;;  %v772_v35 = vadd.f32 %v2514_v18, %v701_v39  ;;  %vm835_vm7 = vcmp.ge.f32.partialorder %v771_v36, 0.0 }
 0x110   :  { %v902_v50 = vmul.f32 0.01, %v774_v44  ;;  %v965_v34 = vsel %vm837_vm6, %v773_v9, %v901_v30  ;;  %vm838_vm8 = vcmp.ge.f32.partialorder %v774_v44, 0.0 }
 0x111   :  { %v1651_v53 = vadd.f32 %v1451_v38, %v965_v34  ;;  %v900_v54 = vmul.f32 0.01, %v772_v35  ;;  %v963_v55 = vsel %vm835_vm7, %v771_v36, %v899_v48  ;;  %vm836_vm9 = vcmp.ge.f32.partialorder %v772_v35, 0.0  ;;  %v2004_v40 = vpop.f32.mrb[20].mxu0 }
 0x112   :  { %v1649_v37 = vadd.f32 %v1443_v45, %v963_v55  ;;  %v966_v56 = vsel %vm838_vm8, %v774_v44, %v902_v50  ;;  %v706_v58 = vmul.f32 %v2004_v40, %v2505_v14  ;;  %v502_v59 = vpop.f32.mrb[21].mxu0  ;;  %v2720_v10 = vpop.f32.mrb[28].mxu1  ;;  %v1483_v44 = vadd.f32 %v2680_v42, %v2520_v21 }
 0x113   :  { %1716 = vst.msk [vmem:[%s3162_s7 + $0x90] sm:$0xff] %vm1697_vm5, %v1651_v53  ;;  %v1652_v43 = vadd.f32 %v1454_v51, %v966_v56  ;;  %v964_v41 = vsel %vm836_vm9, %v772_v35, %v900_v54  ;;  %v704_v60 = vmul.f32 %v2505_v14, %v502_v59  ;;  %v2005_v61 = vpop.f32.mrb[22].mxu0  ;;  %v2729_v17 = vpop.f32.mrb[29].mxu1  ;;  %v1475_v34 = vadd.f32 %v2520_v21, %v2689_v46 }
 0x114   :  { %1714 = vst.msk [vmem:[%s3162_s7 + $0x80] sm:$0xff] %vm1697_vm5, %v1649_v37  ;;  %v1650_v63 = vadd.f32 %v1446_v57, %v964_v41  ;;  %v777_v47 = vadd.f32 %v2514_v18, %v706_v58  ;;  %v707_v0 = vmul.f32 %v2005_v61, %v2505_v14  ;;  %v505_v1 = vpop.f32.mrb[23].mxu0  ;;  %v2732_v22 = vpop.f32.mrb[30].mxu1  ;;  %v1486_v37 = vadd.f32 %v2692_v49, %v2520_v21 }
 0x115   :  { %1717 = vst.msk [vmem:[%s3162_s7 + $0x98] sm:$0xff] %vm1697_vm5, %v1652_v43  ;;  %v775_v4 = vadd.f32 %v2514_v18, %v704_v60  ;;  %v705_v7 = vmul.f32 %v2505_v14, %v505_v1  ;;  %v2736_v24 = vpop.f32.mrb[31].mxu1  ;;  %v1478_v60 = vadd.f32 %v2520_v21, %v2696_v52 }
 0x116   :  { %1715 = vst.msk [vmem:[%s3162_s7 + $0x88] sm:$0xff] %vm1697_vm5, %v1650_v63  ;;  %v905_v62 = vmul.f32 0.01, %v777_v47  ;;  %v778_v12 = vadd.f32 %v2514_v18, %v707_v0  ;;  %vm841_vm10 = vcmp.ge.f32.partialorder %v777_v47, 0.0 }
 0x117   :  { %v903_v20 = vmul.f32 0.01, %v775_v4  ;;  %v776_v3 = vadd.f32 %v2514_v18, %v705_v7  ;;  %vm839_vm11 = vcmp.ge.f32.partialorder %v775_v4, 0.0 }
 0x118   :  { %v906_v23 = vmul.f32 0.01, %v778_v12  ;;  %v969_v2 = vsel %vm841_vm10, %v777_v47, %v905_v62  ;;  %vm842_vm12 = vcmp.ge.f32.partialorder %v778_v12, 0.0 }
 0x119   :  { %v1655_v25 = vadd.f32 %v1467_v6, %v969_v2  ;;  %v904_v26 = vmul.f32 0.01, %v776_v3  ;;  %v967_v27 = vsel %vm839_vm11, %v775_v4, %v903_v20  ;;  %vm840_vm13 = vcmp.ge.f32.partialorder %v776_v3, 0.0  ;;  %v2008_v8 = vpop.f32.mrb[24].mxu0 }
 0x11a   :  { %v1653_v5 = vadd.f32 %v1459_v13, %v967_v27  ;;  %v970_v16 = vsel %vm842_vm12, %v778_v12, %v906_v23  ;;  %v710_v29 = vmul.f32 %v2008_v8, %v2505_v14  ;;  %v518_v31 = vpop.f32.mrb[25].mxu0  ;;  %v2760_v48 = vpop.f32.mrb[32].mxu1  ;;  %v1499_v12 = vadd.f32 %v2720_v10, %v2520_v21 }
 0x11b   :  { %1720 = vst.msk [vmem:[%s3162_s7 + $0xb0] sm:$0xff] %vm1697_vm5, %v1655_v25  ;;  %v1656_v11 = vadd.f32 %v1470_v15, %v970_v16  ;;  %v968_v9 = vsel %vm840_vm13, %v776_v3, %v904_v26  ;;  %v708_v32 = vmul.f32 %v2505_v14, %v518_v31  ;;  %v2009_v33 = vpop.f32.mrb[26].mxu0  ;;  %v2769_v51 = vpop.f32.mrb[33].mxu1  ;;  %v1491_v2 = vadd.f32 %v2520_v21, %v2729_v17 }
 0x11c   :  { %1718 = vst.msk [vmem:[%s3162_s7 + $0xa0] sm:$0xff] %vm1697_vm5, %v1653_v5  ;;  %v1654_v36 = vadd.f32 %v1462_v28, %v968_v9  ;;  %v781_v19 = vadd.f32 %v2514_v18, %v710_v29  ;;  %v711_v38 = vmul.f32 %v2009_v33, %v2505_v14  ;;  %v521_v39 = vpop.f32.mrb[27].mxu0  ;;  %v2772_v54 = vpop.f32.mrb[34].mxu1  ;;  %v1502_v5 = vadd.f32 %v2732_v22, %v2520_v21 }
 0x11d   :  { %1721 = vst.msk [vmem:[%s3162_s7 + $0xb8] sm:$0xff] %vm1697_vm5, %v1656_v11  ;;  %v779_v30 = vadd.f32 %v2514_v18, %v708_v32  ;;  %v709_v45 = vmul.f32 %v2505_v14, %v521_v39  ;;  %v2776_v56 = vpop.f32.mrb[35].mxu1  ;;  %v1494_v32 = vadd.f32 %v2520_v21, %v2736_v24 }
 0x11e   :  { %1719 = vst.msk [vmem:[%s3162_s7 + $0xa8] sm:$0xff] %vm1697_vm5, %v1654_v36  ;;  %v909_v35 = vmul.f32 0.01, %v781_v19  ;;  %v782_v50 = vadd.f32 %v2514_v18, %v711_v38  ;;  %vm845_vm14 = vcmp.ge.f32.partialorder %v781_v19, 0.0 }
 0x11f   :  { %v907_v53 = vmul.f32 0.01, %v779_v30  ;;  %v780_v42 = vadd.f32 %v2514_v18, %v709_v45  ;;  %vm843_vm15 = vcmp.ge.f32.partialorder %v779_v30, 0.0 }
 0x120   :  { %v910_v55 = vmul.f32 0.01, %v782_v50  ;;  %v973_v40 = vsel %vm845_vm14, %v781_v19, %v909_v35  ;;  %vm846_vm0 = vcmp.ge.f32.partialorder %v782_v50, 0.0 }
 0x121   :  { %v1659_v57 = vadd.f32 %v1483_v44, %v973_v40  ;;  %v908_v58 = vmul.f32 0.01, %v780_v42  ;;  %v971_v59 = vsel %vm843_vm15, %v779_v30, %v907_v53  ;;  %vm844_vm1 = vcmp.ge.f32.partialorder %v780_v42, 0.0  ;;  %v2012_v46 = vpop.f32.mrb[28].mxu0 }
 0x122   :  { %v1657_v43 = vadd.f32 %v1475_v34, %v971_v59  ;;  %v974_v41 = vsel %vm846_vm0, %v782_v50, %v910_v55  ;;  %v714_v61 = vmul.f32 %v2012_v46, %v2505_v14  ;;  %v534_v63 = vpop.f32.mrb[29].mxu0  ;;  %v2800_v20 = vpop.f32.mrb[36].mxu1  ;;  %v1515_v50 = vadd.f32 %v2760_v48, %v2520_v21 }
 0x123   :  { %1724 = vst.msk [vmem:[%s3162_s7 + $0xd0] sm:$0xff] %vm1697_vm5, %v1659_v57  ;;  %v1660_v49 = vadd.f32 %v1486_v37, %v974_v41  ;;  %v972_v47 = vsel %vm844_vm1, %v780_v42, %v908_v58  ;;  %v712_v0 = vmul.f32 %v2505_v14, %v534_v63  ;;  %v2013_v1 = vpop.f32.mrb[30].mxu0  ;;  %v2809_v15 = vpop.f32.mrb[37].mxu1  ;;  %v1507_v40 = vadd.f32 %v2520_v21, %v2769_v51 }
 0x124   :  { %1722 = vst.msk [vmem:[%s3162_s7 + $0xc0] sm:$0xff] %vm1697_vm5, %v1657_v43  ;;  %v1658_v4 = vadd.f32 %v1478_v60, %v972_v47  ;;  %v785_v52 = vadd.f32 %v2514_v18, %v714_v61  ;;  %v715_v6 = vmul.f32 %v2013_v1, %v2505_v14  ;;  %v537_v7 = vpop.f32.mrb[31].mxu0  ;;  %v2812_v26 = vpop.f32.mrb[38].mxu1  ;;  %v1518_v43 = vadd.f32 %v2772_v54, %v2520_v21 }
 0x125   :  { %1725 = vst.msk [vmem:[%s3162_s7 + $0xd8] sm:$0xff] %vm1697_vm5, %v1660_v49  ;;  %v783_v62 = vadd.f32 %v2514_v18, %v712_v0  ;;  %v713_v13 = vmul.f32 %v2505_v14, %v537_v7  ;;  %v2816_v16 = vpop.f32.mrb[39].mxu1  ;;  %v1510_v0 = vadd.f32 %v2520_v21, %v2776_v56 }
 0x126   :  { %1723 = vst.msk [vmem:[%s3162_s7 + $0xc8] sm:$0xff] %vm1697_vm5, %v1658_v4  ;;  %v913_v3 = vmul.f32 0.01, %v785_v52  ;;  %v786_v23 = vadd.f32 %v2514_v18, %v715_v6  ;;  %vm849_vm2 = vcmp.ge.f32.partialorder %v785_v52, 0.0 }
 0x127   :  { %v911_v25 = vmul.f32 0.01, %v783_v62  ;;  %v784_v10 = vadd.f32 %v2514_v18, %v713_v13  ;;  %vm847_vm3 = vcmp.ge.f32.partialorder %v783_v62, 0.0 }
 0x128   :  { %v914_v27 = vmul.f32 0.01, %v786_v23  ;;  %v977_v8 = vsel %vm849_vm2, %v785_v52, %v913_v3  ;;  %vm850_vm4 = vcmp.ge.f32.partialorder %v786_v23, 0.0 }
 0x129   :  { %v1663_v28 = vadd.f32 %v1499_v12, %v977_v8  ;;  %v912_v29 = vmul.f32 0.01, %v784_v10  ;;  %v975_v31 = vsel %vm847_vm3, %v783_v62, %v911_v25  ;;  %vm848_vm6 = vcmp.ge.f32.partialorder %v784_v10, 0.0  ;;  %v2016_v17 = vpop.f32.mrb[32].mxu0 }
 0x12a   :  { %v1661_v11 = vadd.f32 %v1491_v2, %v975_v31  ;;  %v978_v9 = vsel %vm850_vm4, %v786_v23, %v914_v27  ;;  %v718_v33 = vmul.f32 %v2016_v17, %v2505_v14  ;;  %v550_v36 = vpop.f32.mrb[33].mxu0  ;;  %v2840_v53 = vpop.f32.mrb[40].mxu1  ;;  %v1531_v23 = vadd.f32 %v2800_v20, %v2520_v21 }
 0x12b   :  { %1728 = vst.msk [vmem:[%s3162_s7 + $0xf0] sm:$0xff] %vm1697_vm5, %v1663_v28  ;;  %v1664_v22 = vadd.f32 %v1502_v5, %v978_v9  ;;  %v976_v19 = vsel %vm848_vm6, %v784_v10, %v912_v29  ;;  %v716_v38 = vmul.f32 %v2505_v14, %v550_v36  ;;  %v2017_v39 = vpop.f32.mrb[34].mxu0  ;;  %v2849_v37 = vpop.f32.mrb[41].mxu1  ;;  %v1523_v8 = vadd.f32 %v2520_v21, %v2809_v15 }
 0x12c   :  { %1726 = vst.msk [vmem:[%s3162_s7 + $0xe0] sm:$0xff] %vm1697_vm5, %v1661_v11  ;;  %v1662_v30 = vadd.f32 %v1494_v32, %v976_v19  ;;  %v789_v24 = vadd.f32 %v2514_v18, %v718_v33  ;;  %v719_v44 = vmul.f32 %v2017_v39, %v2505_v14  ;;  %v553_v45 = vpop.f32.mrb[35].mxu0  ;;  %v2852_v58 = vpop.f32.mrb[42].mxu1  ;;  %v1534_v11 = vadd.f32 %v2812_v26, %v2520_v21 }
 0x12d   :  { %1729 = vst.msk [vmem:[%s3162_s7 + $0xf8] sm:$0xff] %vm1697_vm5, %v1664_v22  ;;  %v787_v35 = vadd.f32 %v2514_v18, %v716_v38  ;;  %v717_v34 = vmul.f32 %v2505_v14, %v553_v45  ;;  %v2856_v41 = vpop.f32.mrb[43].mxu1  ;;  %v1526_v38 = vadd.f32 %v2520_v21, %v2816_v16 }
 0x12e   :  { %1727 = vst.msk [vmem:[%s3162_s7 + $0xe8] sm:$0xff] %vm1697_vm5, %v1662_v30  ;;  %v917_v42 = vmul.f32 0.01, %v789_v24  ;;  %v790_v55 = vadd.f32 %v2514_v18, %v719_v44  ;;  %vm853_vm7 = vcmp.ge.f32.partialorder %v789_v24, 0.0 }
 0x12f   :  { %v915_v57 = vmul.f32 0.01, %v787_v35  ;;  %v788_v48 = vadd.f32 %v2514_v18, %v717_v34  ;;  %vm851_vm8 = vcmp.ge.f32.partialorder %v787_v35, 0.0 }
 0x130   :  { %v918_v59 = vmul.f32 0.01, %v790_v55  ;;  %v981_v46 = vsel %vm853_vm7, %v789_v24, %v917_v42  ;;  %vm854_vm9 = vcmp.ge.f32.partialorder %v790_v55, 0.0 }
 0x131   :  { %v1667_v60 = vadd.f32 %v1515_v50, %v981_v46  ;;  %v916_v61 = vmul.f32 0.01, %v788_v48  ;;  %v979_v63 = vsel %vm851_vm8, %v787_v35, %v915_v57  ;;  %vm852_vm10 = vcmp.ge.f32.partialorder %v788_v48, 0.0  ;;  %v2020_v51 = vpop.f32.mrb[36].mxu0 }
 0x132   :  { %v1665_v49 = vadd.f32 %v1507_v40, %v979_v63  ;;  %v982_v47 = vsel %vm854_vm9, %v790_v55, %v918_v59  ;;  %v722_v1 = vmul.f32 %v2020_v51, %v2505_v14  ;;  %v566_v4 = vpop.f32.mrb[37].mxu0  ;;  %v2880_v25 = vpop.f32.mrb[44].mxu1  ;;  %v1547_v55 = vadd.f32 %v2840_v53, %v2520_v21 }
 0x133   :  { %1732 = vst.msk [vmem:[%s3162_s7 + $0x110] sm:$0xff] %vm1697_vm5, %v1667_v60  ;;  %v1668_v54 = vadd.f32 %v1518_v43, %v982_v47  ;;  %v980_v52 = vsel %vm852_vm10, %v788_v48, %v916_v61  ;;  %v720_v6 = vmul.f32 %v2505_v14, %v566_v4  ;;  %v2021_v7 = vpop.f32.mrb[38].mxu0  ;;  %v2889_v5 = vpop.f32.mrb[45].mxu1  ;;  %v1539_v46 = vadd.f32 %v2520_v21, %v2849_v37 }
 0x134   :  { %1730 = vst.msk [vmem:[%s3162_s7 + $0x100] sm:$0xff] %vm1697_vm5, %v1665_v49  ;;  %v1666_v62 = vadd.f32 %v1510_v0, %v980_v52  ;;  %v793_v56 = vadd.f32 %v2514_v18, %v722_v1  ;;  %v723_v12 = vmul.f32 %v2021_v7, %v2505_v14  ;;  %v569_v13 = vpop.f32.mrb[39].mxu0  ;;  %v2892_v29 = vpop.f32.mrb[46].mxu1  ;;  %v1550_v49 = vadd.f32 %v2852_v58, %v2520_v21 }
 0x135   :  { %1733 = vst.msk [vmem:[%s3162_s7 + $0x118] sm:$0xff] %vm1697_vm5, %v1668_v54  ;;  %v791_v3 = vadd.f32 %v2514_v18, %v720_v6  ;;  %v721_v2 = vmul.f32 %v2505_v14, %v569_v13  ;;  %v2896_v9 = vpop.f32.mrb[47].mxu1  ;;  %v1542_v6 = vadd.f32 %v2520_v21, %v2856_v41 }
 0x136   :  { %1731 = vst.msk [vmem:[%s3162_s7 + $0x108] sm:$0xff] %vm1697_vm5, %v1666_v62  ;;  %v921_v10 = vmul.f32 0.01, %v793_v56  ;;  %v794_v27 = vadd.f32 %v2514_v18, %v723_v12  ;;  %vm857_vm11 = vcmp.ge.f32.partialorder %v793_v56, 0.0 }
 0x137   :  { %v919_v28 = vmul.f32 0.01, %v791_v3  ;;  %v792_v20 = vadd.f32 %v2514_v18, %v721_v2  ;;  %vm855_vm12 = vcmp.ge.f32.partialorder %v791_v3, 0.0 }
 0x138   :  { %v922_v31 = vmul.f32 0.01, %v794_v27  ;;  %v985_v17 = vsel %vm857_vm11, %v793_v56, %v921_v10  ;;  %vm858_vm13 = vcmp.ge.f32.partialorder %v794_v27, 0.0 }
 0x139   :  { %v1671_v32 = vadd.f32 %v1531_v23, %v985_v17  ;;  %v920_v33 = vmul.f32 0.01, %v792_v20  ;;  %v983_v36 = vsel %vm855_vm12, %v791_v3, %v919_v28  ;;  %vm856_vm14 = vcmp.ge.f32.partialorder %v792_v20, 0.0  ;;  %v2024_v15 = vpop.f32.mrb[40].mxu0 }
 0x13a   :  { %v1669_v22 = vadd.f32 %v1523_v8, %v983_v36  ;;  %v986_v19 = vsel %vm858_vm13, %v794_v27, %v922_v31  ;;  %v726_v39 = vmul.f32 %v2024_v15, %v2505_v14  ;;  %v582_v30 = vpop.f32.mrb[41].mxu0  ;;  %v2920_v57 = vpop.f32.mrb[48].mxu1  ;;  %v1563_v27 = vadd.f32 %v2880_v25, %v2520_v21 }
 0x13b   :  { %1736 = vst.msk [vmem:[%s3162_s7 + $0x130] sm:$0xff] %vm1697_vm5, %v1671_v32  ;;  %v1672_v26 = vadd.f32 %v1534_v11, %v986_v19  ;;  %v984_v24 = vsel %vm856_vm14, %v792_v20, %v920_v33  ;;  %v724_v44 = vmul.f32 %v2505_v14, %v582_v30  ;;  %v2025_v45 = vpop.f32.mrb[42].mxu0  ;;  %v2929_v43 = vpop.f32.mrb[49].mxu1  ;;  %v1555_v17 = vadd.f32 %v2520_v21, %v2889_v5 }
 0x13c   :  { %1734 = vst.msk [vmem:[%s3162_s7 + $0x120] sm:$0xff] %vm1697_vm5, %v1669_v22  ;;  %v1670_v35 = vadd.f32 %v1526_v38, %v984_v24  ;;  %v797_v16 = vadd.f32 %v2514_v18, %v726_v39  ;;  %v727_v50 = vmul.f32 %v2025_v45, %v2505_v14  ;;  %v585_v34 = vpop.f32.mrb[43].mxu0  ;;  %v2932_v61 = vpop.f32.mrb[50].mxu1  ;;  %v1566_v22 = vadd.f32 %v2892_v29, %v2520_v21 }
 0x13d   :  { %1737 = vst.msk [vmem:[%s3162_s7 + $0x138] sm:$0xff] %vm1697_vm5, %v1672_v26  ;;  %v795_v42 = vadd.f32 %v2514_v18, %v724_v44  ;;  %v725_v40 = vmul.f32 %v2505_v14, %v585_v34  ;;  %v2936_v47 = vpop.f32.mrb[51].mxu1  ;;  %v1558_v44 = vadd.f32 %v2520_v21, %v2896_v9 }
 0x13e   :  { %1735 = vst.msk [vmem:[%s3162_s7 + $0x128] sm:$0xff] %vm1697_vm5, %v1670_v35  ;;  %v925_v48 = vmul.f32 0.01, %v797_v16  ;;  %v798_v59 = vadd.f32 %v2514_v18, %v727_v50  ;;  %vm861_vm15 = vcmp.ge.f32.partialorder %v797_v16, 0.0 }
 0x13f   :  { %v923_v60 = vmul.f32 0.01, %v795_v42  ;;  %v796_v53 = vadd.f32 %v2514_v18, %v725_v40  ;;  %vm859_vm0 = vcmp.ge.f32.partialorder %v795_v42, 0.0 }
 0x140   :  { %v926_v63 = vmul.f32 0.01, %v798_v59  ;;  %v989_v51 = vsel %vm861_vm15, %v797_v16, %v925_v48  ;;  %vm862_vm1 = vcmp.ge.f32.partialorder %v798_v59, 0.0 }
 0x141   :  { %v1675_v0 = vadd.f32 %v1547_v55, %v989_v51  ;;  %v924_v1 = vmul.f32 0.01, %v796_v53  ;;  %v987_v4 = vsel %vm859_vm0, %v795_v42, %v923_v60  ;;  %vm860_vm2 = vcmp.ge.f32.partialorder %v796_v53, 0.0  ;;  %v2028_v37 = vpop.f32.mrb[44].mxu0 }
 0x142   :  { %v1673_v54 = vadd.f32 %v1539_v46, %v987_v4  ;;  %v990_v52 = vsel %vm862_vm1, %v798_v59, %v926_v63  ;;  %v730_v7 = vmul.f32 %v2028_v37, %v2505_v14  ;;  %v598_v62 = vpop.f32.mrb[45].mxu0  ;;  %v2960_v28 = vpop.f32.mrb[52].mxu1  ;;  %v1579_v59 = vadd.f32 %v2920_v57, %v2520_v21 }
 0x143   :  { %1740 = vst.msk [vmem:[%s3162_s7 + $0x150] sm:$0xff] %vm1697_vm5, %v1675_v0  ;;  %v1676_v58 = vadd.f32 %v1550_v49, %v990_v52  ;;  %v988_v56 = vsel %vm860_vm2, %v796_v53, %v924_v1  ;;  %v728_v12 = vmul.f32 %v2505_v14, %v598_v62  ;;  %v2029_v13 = vpop.f32.mrb[46].mxu0  ;;  %v2969_v11 = vpop.f32.mrb[53].mxu1  ;;  %v1571_v51 = vadd.f32 %v2520_v21, %v2929_v43 }
 0x144   :  { %1738 = vst.msk [vmem:[%s3162_s7 + $0x140] sm:$0xff] %vm1697_vm5, %v1673_v54  ;;  %v1674_v3 = vadd.f32 %v1542_v6, %v988_v56  ;;  %v801_v41 = vadd.f32 %v2514_v18, %v730_v7  ;;  %v731_v23 = vmul.f32 %v2029_v13, %v2505_v14  ;;  %v601_v2 = vpop.f32.mrb[47].mxu0  ;;  %v2972_v33 = vpop.f32.mrb[54].mxu1  ;;  %v1582_v37 = vadd.f32 %v2932_v61, %v2520_v21  ;;  %v3028_v21 = vld [vmem:[%s3159_s3] ss:$0 sm:$0xff] }
 0x145   :  { %1741 = vst.msk [vmem:[%s3162_s7 + $0x158] sm:$0xff] %vm1697_vm5, %v1676_v58  ;;  %v799_v10 = vadd.f32 %v2514_v18, %v728_v12  ;;  %v729_v8 = vmul.f32 %v2505_v14, %v601_v2  ;;  %v2976_v19 = vpop.f32.mrb[55].mxu1  ;;  %v3043_v2 = vld [vmem:[%s3160_s4] ss:$0 sm:$0xff] }
 0x146   :  { %1739 = vst.msk [vmem:[%s3162_s7 + $0x148] sm:$0xff] %vm1697_vm5, %v1674_v3  ;;  %v929_v20 = vmul.f32 0.01, %v801_v41  ;;  %v802_v31 = vadd.f32 %v2514_v18, %v731_v23  ;;  %vm865_vm3 = vcmp.ge.f32.partialorder %v801_v41, 0.0 }
 0x147   :  { %v927_v32 = vmul.f32 0.01, %v799_v10  ;;  %v800_v25 = vadd.f32 %v2514_v18, %v729_v8  ;;  %vm863_vm4 = vcmp.ge.f32.partialorder %v799_v10, 0.0 }
 0x148   :  { %v930_v36 = vmul.f32 0.01, %v802_v31  ;;  %v993_v15 = vsel %vm865_vm3, %v801_v41, %v929_v20  ;;  %vm866_vm6 = vcmp.ge.f32.partialorder %v802_v31, 0.0 }
 0x149   :  { %v1679_v38 = vadd.f32 %v1563_v27, %v993_v15  ;;  %v928_v39 = vmul.f32 0.01, %v800_v25  ;;  %v991_v30 = vsel %vm863_vm4, %v799_v10, %v927_v32  ;;  %vm864_vm7 = vcmp.ge.f32.partialorder %v800_v25, 0.0  ;;  %v2032_v5 = vpop.f32.mrb[48].mxu0 }
 0x14a   :  { %v1677_v26 = vadd.f32 %v1555_v17, %v991_v30  ;;  %v994_v24 = vsel %vm866_vm6, %v802_v31, %v930_v36  ;;  %v734_v45 = vmul.f32 %v2032_v5, %v2505_v14  ;;  %v614_v35 = vpop.f32.mrb[49].mxu0  ;;  %v3000_v60 = vpop.f32.mrb[56].mxu1 }
 0x14b   :  { %1744 = vst.msk [vmem:[%s3162_s7 + $0x170] sm:$0xff] %vm1697_vm5, %v1679_v38  ;;  %v1680_v29 = vadd.f32 %v1566_v22, %v994_v24  ;;  %v992_v16 = vsel %vm864_vm7, %v800_v25, %v928_v39  ;;  %v732_v50 = vmul.f32 %v2505_v14, %v614_v35  ;;  %v2033_v34 = vpop.f32.mrb[50].mxu0  ;;  %v3009_v49 = vpop.f32.mrb[57].mxu1 }
 0x14c   :  { %1742 = vst.msk [vmem:[%s3162_s7 + $0x160] sm:$0xff] %vm1697_vm5, %v1677_v26  ;;  %v1678_v42 = vadd.f32 %v1558_v44, %v992_v16  ;;  %v805_v9 = vadd.f32 %v2514_v18, %v734_v45  ;;  %v735_v55 = vmul.f32 %v2033_v34, %v2505_v14  ;;  %v617_v40 = vpop.f32.mrb[51].mxu0 }
 0x14d   :  { %1745 = vst.msk [vmem:[%s3162_s7 + $0x178] sm:$0xff] %vm1697_vm5, %v1680_v29  ;;  %v803_v48 = vadd.f32 %v2514_v18, %v732_v50  ;;  %v733_v46 = vmul.f32 %v2505_v14, %v617_v40  ;;  %v3012_v14 = vpop.f32.mrb[58].mxu1 }
 0x14e   :  { %1743 = vst.msk [vmem:[%s3162_s7 + $0x168] sm:$0xff] %vm1697_vm5, %v1678_v42  ;;  %v933_v53 = vmul.f32 0.01, %v805_v9  ;;  %v806_v63 = vadd.f32 %v2514_v18, %v735_v55  ;;  %vm869_vm8 = vcmp.ge.f32.partialorder %v805_v9, 0.0  ;;  %v3016_v54 = vpop.f32.mrb[59].mxu1 }
 0x14f   :  { %v931_v0 = vmul.f32 0.01, %v803_v48  ;;  %v804_v57 = vadd.f32 %v2514_v18, %v733_v46  ;;  %vm867_vm9 = vcmp.ge.f32.partialorder %v803_v48, 0.0  ;;  %v3021_v18 = vld [vmem:[%s3161_s6] ss:$0 sm:$0xff] }
 0x150   :  { %v934_v1 = vmul.f32 0.01, %v806_v63  ;;  %v997_v4 = vsel %vm869_vm8, %v805_v9, %v933_v53  ;;  %vm870_vm10 = vcmp.ge.f32.partialorder %v806_v63, 0.0  ;;  %v1574_v56 = vadd.f32 %v3021_v18, %v2936_v47 }
 0x151   :  { %v1683_v52 = vadd.f32 %v1579_v59, %v997_v4  ;;  %v932_v6 = vmul.f32 0.01, %v804_v57  ;;  %v995_v7 = vsel %vm867_vm9, %v803_v48, %v931_v0  ;;  %vm868_vm11 = vcmp.ge.f32.partialorder %v804_v57, 0.0  ;;  %v2036_v43 = vpop.f32.mrb[52].mxu0 }
 0x152   :  { %v1681_v62 = vadd.f32 %v1571_v51, %v995_v7  ;;  %v998_v58 = vsel %vm870_vm10, %v806_v63, %v934_v1  ;;  %v738_v61 = vmul.f32 %v3028_v21, %v2036_v43  ;;  %v630_v12 = vpop.f32.mrb[53].mxu0  ;;  %v1595_v31 = vadd.f32 %v3021_v18, %v2960_v28  ;;  %v3055_v32 = vpop.f32.mrb[60].mxu1 }
 0x153   :  { %1748 = vst.msk [vmem:[%s3162_s7 + $0x190] sm:$0xff] %vm1697_vm5, %v1683_v52  ;;  %v1684_v13 = vadd.f32 %v1582_v37, %v998_v58  ;;  %v996_v3 = vsel %vm868_vm11, %v804_v57, %v932_v6  ;;  %v736_v41 = vmul.f32 %v3028_v21, %v630_v12  ;;  %v2037_v23 = vpop.f32.mrb[54].mxu0  ;;  %v1587_v15 = vadd.f32 %v3021_v18, %v2969_v11  ;;  %v3064_v22 = vpop.f32.mrb[61].mxu1 }
 0x154   :  { %1746 = vst.msk [vmem:[%s3162_s7 + $0x180] sm:$0xff] %vm1697_vm5, %v1681_v62  ;;  %v1682_v47 = vadd.f32 %v1574_v56, %v996_v3  ;;  %v809_v10 = vadd.f32 %v3043_v2, %v738_v61  ;;  %v739_v27 = vmul.f32 %v3028_v21, %v2037_v23  ;;  %v633_v8 = vpop.f32.mrb[55].mxu0  ;;  %v3067_v39 = vpop.f32.mrb[62].mxu1  ;;  %v1598_v26 = vadd.f32 %v3021_v18, %v2972_v33 }
 0x155   :  { %1749 = vst.msk [vmem:[%s3162_s7 + $0x198] sm:$0xff] %vm1697_vm5, %v1684_v13  ;;  %v807_v20 = vadd.f32 %v3043_v2, %v736_v41  ;;  %v737_v17 = vmul.f32 %v3028_v21, %v633_v8  ;;  %v3071_v24 = vpop.f32.mrb[63].mxu1  ;;  %v1590_v50 = vadd.f32 %v3021_v18, %v2976_v19  ;;  %v1611_v63 = vadd.f32 %v3021_v18, %v3000_v60 }
 0x156   :  { %1747 = vst.msk [vmem:[%s3162_s7 + $0x188] sm:$0xff] %vm1697_vm5, %v1682_v47  ;;  %v937_v25 = vmul.f32 0.01, %v809_v10  ;;  %v810_v36 = vadd.f32 %v3043_v2, %v739_v27  ;;  %vm873_vm12 = vcmp.ge.f32.partialorder %v809_v10, 0.0  ;;  %v1603_v1 = vadd.f32 %v3021_v18, %v3009_v49 }
 0x157   :  { %v935_v38 = vmul.f32 0.01, %v807_v20  ;;  %v808_v28 = vadd.f32 %v3043_v2, %v737_v17  ;;  %vm871_vm13 = vcmp.ge.f32.partialorder %v807_v20, 0.0  ;;  %v1614_v6 = vadd.f32 %v3021_v18, %v3012_v14 }
 0x158   :  { %v938_v30 = vmul.f32 0.01, %v810_v36  ;;  %v1001_v5 = vsel %vm873_vm12, %v809_v10, %v937_v25  ;;  %vm874_vm14 = vcmp.ge.f32.partialorder %v810_v36, 0.0  ;;  %v1606_v49 = vadd.f32 %v3021_v18, %v3016_v54 }
 0x159   :  { %v1687_v44 = vadd.f32 %v1595_v31, %v1001_v5  ;;  %v936_v45 = vmul.f32 0.01, %v808_v28  ;;  %v999_v35 = vsel %vm871_vm13, %v807_v20, %v935_v38  ;;  %vm872_vm15 = vcmp.ge.f32.partialorder %v808_v28, 0.0  ;;  %v2040_v11 = vpop.f32.mrb[56].mxu0 }
 0x15a   :  { %v1685_v29 = vadd.f32 %v1587_v15, %v999_v35  ;;  %v1002_v16 = vsel %vm874_vm14, %v810_v36, %v938_v30  ;;  %v742_v34 = vmul.f32 %v3028_v21, %v2040_v11  ;;  %v646_v42 = vpop.f32.mrb[57].mxu0  ;;  %v1627_v20 = vadd.f32 %v3021_v18, %v3055_v32 }
 0x15b   :  { %1752 = vst.msk [vmem:[%s3162_s7 + $0x1b0] sm:$0xff] %vm1697_vm5, %v1687_v44  ;;  %v1688_v33 = vadd.f32 %v1598_v26, %v1002_v16  ;;  %v1000_v9 = vsel %vm872_vm15, %v808_v28, %v936_v45  ;;  %v740_v55 = vmul.f32 %v3028_v21, %v646_v42  ;;  %v2041_v40 = vpop.f32.mrb[58].mxu0  ;;  %v1619_v36 = vadd.f32 %v3021_v18, %v3064_v22 }
 0x15c   :  { %1750 = vst.msk [vmem:[%s3162_s7 + $0x1a0] sm:$0xff] %vm1697_vm5, %v1685_v29  ;;  %v1686_v48 = vadd.f32 %v1590_v50, %v1000_v9  ;;  %v813_v19 = vadd.f32 %v3043_v2, %v742_v34  ;;  %v743_v59 = vmul.f32 %v3028_v21, %v2041_v40  ;;  %v649_v46 = vpop.f32.mrb[59].mxu0  ;;  %v1622_v35 = vadd.f32 %v3021_v18, %v3071_v24 }
 0x15d   :  { %1753 = vst.msk [vmem:[%s3162_s7 + $0x1b8] sm:$0xff] %vm1697_vm5, %v1688_v33  ;;  %v811_v53 = vadd.f32 %v3043_v2, %v740_v55  ;;  %v741_v51 = vmul.f32 %v3028_v21, %v649_v46 }
 0x15e   :  { %1751 = vst.msk [vmem:[%s3162_s7 + $0x1a8] sm:$0xff] %vm1697_vm5, %v1686_v48  ;;  %v941_v0 = vmul.f32 0.01, %v813_v19  ;;  %v814_v57 = vadd.f32 %v3043_v2, %v743_v59  ;;  %vm877_vm0 = vcmp.ge.f32.partialorder %v813_v19, 0.0 }
 0x15f   :  { %v939_v4 = vmul.f32 0.01, %v811_v53  ;;  %v812_v37 = vadd.f32 %v3043_v2, %v741_v51  ;;  %vm875_vm1 = vcmp.ge.f32.partialorder %v811_v53, 0.0 }
 0x160   :  { %v942_v52 = vmul.f32 0.01, %v814_v57  ;;  %v1005_v60 = vsel %vm877_vm0, %v813_v19, %v941_v0  ;;  %vm878_vm2 = vcmp.ge.f32.partialorder %v814_v57, 0.0 }
 0x161   :  { %v1691_v7 = vadd.f32 %v1611_v63, %v1005_v60  ;;  %v940_v43 = vmul.f32 0.01, %v812_v37  ;;  %v1003_v62 = vsel %vm875_vm1, %v811_v53, %v939_v4  ;;  %vm876_vm3 = vcmp.ge.f32.partialorder %v812_v37, 0.0  ;;  %v2044_v58 = vpop.f32.mrb[60].mxu0 }
 0x162   :  { %v1689_v56 = vadd.f32 %v1603_v1, %v1003_v62  ;;  %v1006_v61 = vsel %vm878_vm2, %v814_v57, %v942_v52  ;;  %v746_v12 = vmul.f32 %v3028_v21, %v2044_v58  ;;  %v662_v13 = vpop.f32.mrb[61].mxu0 }
 0x163   :  { %1756 = vst.msk [vmem:[%s3162_s7 + $0x1d0] sm:$0xff] %vm1697_vm5, %v1691_v7  ;;  %v1692_v3 = vadd.f32 %v1614_v6, %v1006_v61  ;;  %v1004_v14 = vsel %vm876_vm3, %v812_v37, %v940_v43  ;;  %v744_v41 = vmul.f32 %v3028_v21, %v662_v13  ;;  %v2045_v23 = vpop.f32.mrb[62].mxu0 }
 0x164   :  { %1754 = vst.msk [vmem:[%s3162_s7 + $0x1c0] sm:$0xff] %vm1697_vm5, %v1689_v56  ;;  %v1690_v47 = vadd.f32 %v1606_v49, %v1004_v14  ;;  %v817_v54 = vadd.f32 %v3043_v2, %v746_v12  ;;  %v747_v10 = vmul.f32 %v3028_v21, %v2045_v23  ;;  %v665_v27 = vpop.f32.mrb[63].mxu0 }
 0x165   :  { %1757 = vst.msk [vmem:[%s3162_s7 + $0x1d8] sm:$0xff] %vm1697_vm5, %v1692_v3  ;;  %v815_v8 = vadd.f32 %v3043_v2, %v744_v41  ;;  %v745_v31 = vmul.f32 %v3028_v21, %v665_v27  ;;  %v1630_v21 = vadd.f32 %v3021_v18, %v3067_v39 }
 0x166   :  { %1755 = vst.msk [vmem:[%s3162_s7 + $0x1c8] sm:$0xff] %vm1697_vm5, %v1690_v47  ;;  %v945_v17 = vmul.f32 0.01, %v817_v54  ;;  %v818_v25 = vadd.f32 %v3043_v2, %v747_v10  ;;  %vm881_vm4 = vcmp.ge.f32.partialorder %v817_v54, 0.0 }
 0x167   :  { %v943_v15 = vmul.f32 0.01, %v815_v8  ;;  %v816_v38 = vadd.f32 %v3043_v2, %v745_v31  ;;  %vm879_vm6 = vcmp.ge.f32.partialorder %v815_v8, 0.0 }
 0x168   :  { %v946_v28 = vmul.f32 0.01, %v818_v25  ;;  %v1009_v32 = vsel %vm881_vm4, %v817_v54, %v945_v17  ;;  %vm882_vm7 = vcmp.ge.f32.partialorder %v818_v25, 0.0 }
 0x169   :  { %v1695_v30 = vadd.f32 %v1627_v20, %v1009_v32  ;;  %v944_v5 = vmul.f32 0.01, %v816_v38  ;;  %v1007_v26 = vsel %vm879_vm6, %v815_v8, %v943_v15  ;;  %vm880_vm8 = vcmp.ge.f32.partialorder %v816_v38, 0.0 }
 0x16a   :  { %v1693_v44 = vadd.f32 %v1619_v36, %v1007_v26  ;;  %v1010_v45 = vsel %vm882_vm7, %v818_v25, %v946_v28 }
 0x16b   :  { %1760 = vst.msk [vmem:[%s3162_s7 + $0x1f0] sm:$0xff] %vm1697_vm5, %v1695_v30  ;;  %v1696_v2 = vadd.f32 %v1630_v21, %v1010_v45  ;;  %v1008_v22 = vsel %vm880_vm8, %v816_v38, %v944_v5 }
 0x16c   :  { %1758 = vst.msk [vmem:[%s3162_s7 + $0x1e0] sm:$0xff] %vm1697_vm5, %v1693_v44  ;;  %v1694_v39 = vadd.f32 %v1622_v35, %v1008_v22 }
 0x16d   :  { %1761 = vst.msk [vmem:[%s3162_s7 + $0x1f8] sm:$0xff] %vm1697_vm5, %v1696_v2 }
 0x16e   :  { %1759 = vst.msk [vmem:[%s3162_s7 + $0x1e8] sm:$0xff] %vm1697_vm5, %v1694_v39 }

// kernel: _conv_block_impl.5
= control target key start
LH: loop header
LB: loop body
LE: loop exit
PB: predicated region body
PF: predicated region fallthrough
CT: control target
= control target key end

     0   :  { %s2738_s13 = smov 0   ;;  %s2740_s14 = smov 0   ;;  %s3475_s0 = inlined_call_operand.vmem [shape: f32[2,256,8], index: 0, kind: input, shape index: {}, may-alias: {0,1}]   ;;  %s3476_s1 = inlined_call_operand.vmem [shape: f32[2,256,8], index: 1, kind: input, shape index: {}, may-alias: {0,1}]   ;;  %s3477_s2 = inlined_call_operand.vmem [shape: bf16[8,1], index: 2, kind: input, shape index: {}]   ;;  %s3478_s3 = inlined_call_operand.<no memory space> [shape: f32[1,1], index: 3, kind: input, shape index: {}]   ;;  %s3479_s4 = inlined_call_operand.vmem [shape: bf16[8,1], index: 4, kind: input, shape index: {}]   ;;  %s3480_s6 = inlined_call_operand.vmem [shape: bf16[8,8], index: 6, kind: input, shape index: {}]   ;;  %s3481_s7 = inlined_call_operand.vmem [shape: f32[1,8], index: 7, kind: input, shape index: {}]   ;;  %s3482_s8 = inlined_call_operand.vmem [shape: f32[1,8], index: 8, kind: input, shape index: {}]   ;;  %s3483_s9 = inlined_call_operand.vmem [shape: f32[2,256,8], index: 9, kind: output, shape index: {}]   ;;  %s3484_s5 = inlined_call_operand.<no memory space> [shape: f32[1,1], index: 5, kind: input, shape index: {}]  }
   0x1   :  { %v14_v0 = vstv %s3478_s3  ;;  %v16_v1 = vstv %s3484_s5  ;;  %s2742_s15 = smov 0   ;;  %s2744_s16 = smov 0  }
   0x2   :  { %15 = vst [vmem:[#allocation6] sm:$0x1] %v14_v0  ;;  %17 = vst [vmem:[#allocation7] sm:$0x1] %v16_v1  ;;  %s2746_s17 = smov 0   ;;  %s2748_s18 = smov 0  }
   0x3   :  { %s2750_s19 = smov 0  }
   0x4 LB: > { %s35_s3 = sadd.s32 1, %s2664_s16  ;;  %s38_s5 = sadd.s32 1, %s2668_s17  ;;  %s2676_s19 = sphi %s2750_s19, %s23_s19   ;;  %s2672_s18 = sphi %s2748_s18, %s3494_s18   ;;  %s2668_s17 = sphi %s2746_s17, %s3493_s17   ;;  %s2664_s16 = sphi %s2744_s16, %s3492_s16   ;;  %s2660_s15 = sphi %s2742_s15, %s3491_s15   ;;  %s2656_s14 = sphi %s2740_s14, %s3490_s14   ;;  %s2652_s13 = sphi %s2738_s13, %s3489_s13  }
   0x5   : > { %p36_p0 = scmp.ge.s32.totalorder %s35_s3, 2  ;;  %p2117_p1 = scmp.ge.s32.totalorder %s2676_s19, 1 }
   0x6   : > { %p336_p2 = scmp.lt.s32.totalorder %s2676_s19, 9  ;;  %s42_s20 = sadd.s32 1, %s2672_s18 }
   0x7   : > { %s3496_s3 = smov (%p36_p0, %s35_s3), 0  ;;  %s3498_s5 = smov (!%p36_p0, %s38_s5), %s2668_s17 }
   0x8   : > { %p337_p3 = pnand %p2117_p1, %p336_p2  ;;  %p40_p4 = scmp.ge.s32.totalorder %s3498_s5, 2 }
   0x9   : > { %s2118_s21 = sshll.u32 (!%p337_p3), %s2656_s14, 4  ;;  %p390_p6 = scmp.lt.s32.totalorder (!%p337_p3), %s2660_s15, 1 }
   0xa   : > { %s3500_s5 = smov (%p40_p4, %s3498_s5), 0  ;;  %s3502_s20 = smov (!%p40_p4, %s42_s20), %s2672_s18 }
   0xb   : > { %p44_p5 = scmp.ge.s32.totalorder %s3502_s20, 2  ;;  %340 = sbr.rel (%p337_p3) target bundleno = 1444 (0x5a4), region = 56 }
   0xc   : > { %p392_p7 = scmp.lt.s32.totalorder (!%p337_p3), %s2118_s21, 31  ;;  %s2121_s22 = sshll.u32 (!%p337_p3), %s2652_s13, 4 }
   0xd   : > { %s3504_s20 = smov (%p44_p5, %s3502_s20), 0  ;;  %p402_p8 = scmp.lt.s32.totalorder (!%p337_p3), %s2121_s22, 31 }
   0xe   : > { %3485 = sst [smem:[#allocation8_spill]] %s3504_s20  ;;  %p2127_p9 = scmp.ne.s32.totalorder (!%p337_p3), %s2652_s13, 0 }
  0x12   : > { %s3506_s15 = smov (!%p390_p6, %s2660_s15), 1  ;;  %s3508_s21 = smov (!%p392_p7, %s2118_s21), 31 }
  0x13   : > { %s2119_s23 = sshll.u32 %s3506_s15, 5  ;;  %s3510_s22 = smov (!%p402_p8, %s2121_s22), 31  ;;  %v448_v2 = vld [vmem:[%s3477_s2] sm:$0xf] (!%p2127_p9)  ;;  %vm481_vm0 = vcmask (!%p2127_p9), 1043456   ;;  %vm456_vm1 = vcmask (!%p2127_p9), 64512  }
  0x14   : > { %s395_s24 = sadd.s32 %s2119_s23, %s3508_s21  ;;  %s405_s11 = sadd.s32 %s2119_s23, %s3510_s22  ;;  %2458 = vmatprep.subr.msk.bf16.mxu0 (!%p2127_p9), %vm481_vm0, %v448_v2  ;;  %2459 = vmatprep.subr.msk.bf16.mxu1 (!%p2127_p9), %vm481_vm0, %v448_v2  ;;  %v483_v5 = vsel (!%p2127_p9), %vm481_vm0, %v448_v2, 0  ;;  %v2678_v10 = vmov (!%p2127_p9), 0.0   ;;  %vm582_vm2 = vcmask (!%p2127_p9), 7168   ;;  %v2679_v29 = vmov (!%p2127_p9), -inf   ;;  %v2128_v30 = vld [vmem:[#allocation6] ss:$0 sm:$0xff] (!%p2127_p9) }
  0x15   : > { %s2120_s25 = sshll.u32 %s395_s24, 3  ;;  %s2123_s12 = sshll.u32 %s405_s11, 3  ;;  %2267 = vmatpush3.bf16.msra.mxu0 (!%p2127_p9), %v483_v5  ;;  %2457 = vmatpush3.bf16.msra.mxu1 (!%p2127_p9), %v483_v5  ;;  %631 = vst.msk [vmem:[#allocation5] sm:$0xff] (!%p2127_p9), %vm456_vm1, %v2678_v10  ;;  %632 = vst.msk [vmem:[#allocation5 + $0x8] sm:$0xff] (!%p2127_p9), %vm456_vm1, %v2678_v10 }
  0x16   : > { %s2786_s28 = scalar_lea.vmem %s3475_s0, %s2120_s25  ;;  %s2791_s10 = scalar_lea.vmem %s3483_s9, %s2120_s25  ;;  %633 = vst.msk [vmem:[#allocation5 + $0x10] sm:$0xff] (!%p2127_p9), %vm456_vm1, %v2678_v10  ;;  %634 = vst.msk [vmem:[#allocation5 + $0x18] sm:$0xff] (!%p2127_p9), %vm456_vm1, %v2678_v10 }
  0x17   : > { %s2796_s15 = scalar_lea.vmem %s3476_s1, %s2123_s12  ;;  %423 = sbr.rel (%p2127_p9) target bundleno = 255 (0xff), region = 60  ;;  %v424_v3 = vld [vmem:[%s2786_s28] sm:$0xff] (!%p2127_p9)  ;;  %v425_v4 = vld [vmem:[%s2786_s28 + $0x8] sm:$0xff] (!%p2127_p9)  ;;  %v426_v9 = vld [vmem:[%s2786_s28 + $0x10] sm:$0xff] (!%p2127_p9)  ;;  %635 = vst.msk [vmem:[#allocation5 + $0x20] sm:$0xff] (!%p2127_p9), %vm456_vm1, %v2678_v10 }
  0x18   : > { %v440_v6 = vpack.c.bf16 (!%p2127_p9), %v425_v4, %v424_v3  ;;  %v432_v7 = vld [vmem:[%s2786_s28 + $0x40] sm:$0xff] (!%p2127_p9)  ;;  %v433_v8 = vld [vmem:[%s2786_s28 + $0x48] sm:$0xff] (!%p2127_p9)  ;;  %636 = vst.msk [vmem:[#allocation5 + $0x28] sm:$0xff] (!%p2127_p9), %vm456_vm1, %v2678_v10  ;;  %637 = vst.msk [vmem:[#allocation5 + $0x30] sm:$0xff] (!%p2127_p9), %vm456_vm1, %v2678_v10 }
  0x19   : > { %638 = vst.msk [vmem:[#allocation5 + $0x38] sm:$0xff] (!%p2127_p9), %vm456_vm1, %v2678_v10  ;;  %639 = vst.msk [vmem:[#allocation5 + $0x40] sm:$0xff] (!%p2127_p9), %vm456_vm1, %v2678_v10  ;;  %v444_v11 = vpack.c.bf16 (!%p2127_p9), %v433_v8, %v432_v7  ;;  %v427_v12 = vld [vmem:[%s2786_s28 + $0x18] sm:$0xff] (!%p2127_p9)  ;;  %v434_v13 = vld [vmem:[%s2786_s28 + $0x50] sm:$0xff] (!%p2127_p9) }
  0x1a   : > { %640 = vst.msk [vmem:[#allocation5 + $0x48] sm:$0xff] (!%p2127_p9), %vm456_vm1, %v2678_v10  ;;  %641 = vst.msk [vmem:[#allocation5 + $0x50] sm:$0xff] (!%p2127_p9), %vm456_vm1, %v2678_v10  ;;  %v435_v14 = vld [vmem:[%s2786_s28 + $0x58] sm:$0xff] (!%p2127_p9)  ;;  %2268 = vmatprep.mubr.msk.bf16.mxu0 (!%p2127_p9), %vm456_vm1, %v440_v6  ;;  %v441_v15 = vpack.c.bf16 (!%p2127_p9), %v427_v12, %v426_v9  ;;  %v428_v17 = vld [vmem:[%s2786_s28 + $0x20] sm:$0xff] (!%p2127_p9) }
  0x1b   : > { %642 = vst.msk [vmem:[#allocation5 + $0x58] sm:$0xff] (!%p2127_p9), %vm456_vm1, %v2678_v10  ;;  %643 = vst.msk [vmem:[#allocation5 + $0x60] sm:$0xff] (!%p2127_p9), %vm456_vm1, %v2678_v10  ;;  %v445_v16 = vpack.c.bf16 (!%p2127_p9), %v435_v14, %v434_v13  ;;  %v429_v18 = vld [vmem:[%s2786_s28 + $0x28] sm:$0xff] (!%p2127_p9)  ;;  %v436_v19 = vld [vmem:[%s2786_s28 + $0x60] sm:$0xff] (!%p2127_p9)  ;;  %2276 = vmatprep.mubr.msk.bf16.mxu1 (!%p2127_p9), %vm456_vm1, %v444_v11 }
  0x1c   : > { %644 = vst.msk [vmem:[#allocation5 + $0x68] sm:$0xff] (!%p2127_p9), %vm456_vm1, %v2678_v10  ;;  %645 = vst.msk [vmem:[#allocation5 + $0x70] sm:$0xff] (!%p2127_p9), %vm456_vm1, %v2678_v10  ;;  %v442_v20 = vpack.c.bf16 (!%p2127_p9), %v429_v18, %v428_v17  ;;  %v437_v21 = vld [vmem:[%s2786_s28 + $0x68] sm:$0xff] (!%p2127_p9)  ;;  %2269 = vmatmul.mubr.msk.bf16.vlgmr.msra.gmra.mrb[0].mxu0 (!%p2127_p9), %vm456_vm1, %v441_v15  ;;  %v430_v23 = vld [vmem:[%s2786_s28 + $0x30] sm:$0xff] (!%p2127_p9) }
  0x1d   : > { %646 = vst.msk [vmem:[#allocation5 + $0x78] sm:$0xff] (!%p2127_p9), %vm456_vm1, %v2678_v10  ;;  %2277 = vmatmul.mubr.msk.bf16.vlgmr.msra.gmra.mrb[0].mxu1 (!%p2127_p9), %vm456_vm1, %v445_v16  ;;  %v446_v22 = vpack.c.bf16 (!%p2127_p9), %v437_v21, %v436_v19  ;;  %v431_v24 = vld [vmem:[%s2786_s28 + $0x38] sm:$0xff] (!%p2127_p9)  ;;  %v438_v25 = vld [vmem:[%s2786_s28 + $0x70] sm:$0xff] (!%p2127_p9) }
  0x1e   : > { %2272 = vmatprep.mubr.msk.bf16.mxu0 %vm456_vm1, %v442_v20  ;;  %v439_v26 = vld [vmem:[%s2786_s28 + $0x78] sm:$0xff]  ;;  %v443_v27 = vpack.c.bf16 %v431_v24, %v430_v23  ;;  %615 = vst.msk [vmem:[#allocation4] sm:$0xff] %vm582_vm2, %v2678_v10  ;;  %616 = vst.msk [vmem:[#allocation4 + $0x8] sm:$0xff] %vm582_vm2, %v2678_v10 }
  0x1f   : > { %2280 = vmatprep.mubr.msk.bf16.mxu1 %vm456_vm1, %v446_v22  ;;  %v447_v28 = vpack.c.bf16 %v439_v26, %v438_v25  ;;  %617 = vst.msk [vmem:[#allocation4 + $0x10] sm:$0xff] %vm582_vm2, %v2678_v10  ;;  %618 = vst.msk [vmem:[#allocation4 + $0x18] sm:$0xff] %vm582_vm2, %v2678_v10 }
  0x20   : > { %619 = vst.msk [vmem:[#allocation4 + $0x20] sm:$0xff] %vm582_vm2, %v2678_v10  ;;  %620 = vst.msk [vmem:[#allocation4 + $0x28] sm:$0xff] %vm582_vm2, %v2678_v10 }
  0x21   : > { %621 = vst.msk [vmem:[#allocation4 + $0x30] sm:$0xff] %vm582_vm2, %v2678_v10  ;;  %622 = vst.msk [vmem:[#allocation4 + $0x38] sm:$0xff] %vm582_vm2, %v2678_v10 }
  0x22   : > { %623 = vst.msk [vmem:[#allocation4 + $0x40] sm:$0xff] %vm582_vm2, %v2678_v10  ;;  %624 = vst.msk [vmem:[#allocation4 + $0x48] sm:$0xff] %vm582_vm2, %v2678_v10 }
  0x23   : > { %625 = vst.msk [vmem:[#allocation4 + $0x50] sm:$0xff] %vm582_vm2, %v2678_v10  ;;  %626 = vst.msk [vmem:[#allocation4 + $0x58] sm:$0xff] %vm582_vm2, %v2678_v10 }
  0x24   : > { %2273 = vmatmul.mubr.msk.bf16.gmra.mrb[4].mxu0 %vm456_vm1, %v443_v27  ;;  %627 = vst.msk [vmem:[#allocation4 + $0x60] sm:$0xff] %vm582_vm2, %v2678_v10  ;;  %628 = vst.msk [vmem:[#allocation4 + $0x68] sm:$0xff] %vm582_vm2, %v2678_v10 }
  0x25   : > { %2281 = vmatmul.mubr.msk.bf16.gmra.mrb[4].mxu1 %vm456_vm1, %v447_v28  ;;  %629 = vst.msk [vmem:[#allocation4 + $0x70] sm:$0xff] %vm582_vm2, %v2678_v10  ;;  %630 = vst.msk [vmem:[#allocation4 + $0x78] sm:$0xff] %vm582_vm2, %v2678_v10 }
  0x26   : > { %599 = vst.msk [vmem:[#allocation3] sm:$0xff] %vm582_vm2, %v2679_v29  ;;  %600 = vst.msk [vmem:[#allocation3 + $0x8] sm:$0xff] %vm582_vm2, %v2679_v29 }
  0x27   : > { %601 = vst.msk [vmem:[#allocation3 + $0x10] sm:$0xff] %vm582_vm2, %v2679_v29  ;;  %602 = vst.msk [vmem:[#allocation3 + $0x18] sm:$0xff] %vm582_vm2, %v2679_v29 }
  0x28   : > { %603 = vst.msk [vmem:[#allocation3 + $0x20] sm:$0xff] %vm582_vm2, %v2679_v29  ;;  %604 = vst.msk [vmem:[#allocation3 + $0x28] sm:$0xff] %vm582_vm2, %v2679_v29 }
  0x29   : > { %605 = vst.msk [vmem:[#allocation3 + $0x30] sm:$0xff] %vm582_vm2, %v2679_v29  ;;  %606 = vst.msk [vmem:[#allocation3 + $0x38] sm:$0xff] %vm582_vm2, %v2679_v29 }
  0x2a   : > { %607 = vst.msk [vmem:[#allocation3 + $0x40] sm:$0xff] %vm582_vm2, %v2679_v29  ;;  %608 = vst.msk [vmem:[#allocation3 + $0x48] sm:$0xff] %vm582_vm2, %v2679_v29 }
  0x2b   : > { %609 = vst.msk [vmem:[#allocation3 + $0x50] sm:$0xff] %vm582_vm2, %v2679_v29  ;;  %610 = vst.msk [vmem:[#allocation3 + $0x58] sm:$0xff] %vm582_vm2, %v2679_v29 }
  0x2c   : > { %611 = vst.msk [vmem:[#allocation3 + $0x60] sm:$0xff] %vm582_vm2, %v2679_v29  ;;  %612 = vst.msk [vmem:[#allocation3 + $0x68] sm:$0xff] %vm582_vm2, %v2679_v29 }
  0x2d   : > { %613 = vst.msk [vmem:[#allocation3 + $0x70] sm:$0xff] %vm582_vm2, %v2679_v29  ;;  %614 = vst.msk [vmem:[#allocation3 + $0x78] sm:$0xff] %vm582_vm2, %v2679_v29 }
  0xef   : > { %v2270_v31 = vpop.f32.mrb[0].mxu0 }
  0xf0   : > { %v2278_v32 = vpop.f32.mrb[0].mxu1  ;;  %v528_v33 = vadd.f32 %v2270_v31, %v2128_v30  ;;  %v519_v35 = vpop.f32.mrb[1].mxu0 }
  0xf1   : > { %v560_v34 = vadd.f32 %v2278_v32, %v2128_v30  ;;  %v551_v36 = vpop.f32.mrb[1].mxu1  ;;  %v520_v37 = vadd.f32 %v2128_v30, %v519_v35  ;;  %v2271_v39 = vpop.f32.mrb[2].mxu0 }
  0xf2   : > { %v552_v38 = vadd.f32 %v2128_v30, %v551_v36  ;;  %v2279_v40 = vpop.f32.mrb[2].mxu1  ;;  %585 = vst.msk [vmem:[#allocation2 + $0x10] sm:$0xff] %vm582_vm2, %v528_v33  ;;  %v531_v41 = vadd.f32 %v2271_v39, %v2128_v30  ;;  %v522_v43 = vpop.f32.mrb[3].mxu0 }
  0xf3   : > { %593 = vst.msk [vmem:[#allocation2 + $0x50] sm:$0xff] %vm582_vm2, %v560_v34  ;;  %v563_v42 = vadd.f32 %v2279_v40, %v2128_v30  ;;  %v554_v44 = vpop.f32.mrb[3].mxu1  ;;  %583 = vst.msk [vmem:[#allocation2] sm:$0xff] %vm582_vm2, %v520_v37  ;;  %v523_v45 = vadd.f32 %v2128_v30, %v522_v43 }
  0xf4   : > { %591 = vst.msk [vmem:[#allocation2 + $0x40] sm:$0xff] %vm582_vm2, %v552_v38  ;;  %v555_v46 = vadd.f32 %v2128_v30, %v554_v44  ;;  %586 = vst.msk [vmem:[#allocation2 + $0x18] sm:$0xff] %vm582_vm2, %v531_v41 }
  0xf5   : > { %594 = vst.msk [vmem:[#allocation2 + $0x58] sm:$0xff] %vm582_vm2, %v563_v42  ;;  %584 = vst.msk [vmem:[#allocation2 + $0x8] sm:$0xff] %vm582_vm2, %v523_v45 }
  0xf6   : > { %592 = vst.msk [vmem:[#allocation2 + $0x48] sm:$0xff] %vm582_vm2, %v555_v46 }
  0xf7   : > { %v2274_v47 = vpop.f32.mrb[4].mxu0 }
  0xf8   : > { %v2282_v48 = vpop.f32.mrb[4].mxu1  ;;  %v544_v49 = vadd.f32 %v2274_v47, %v2128_v30  ;;  %v535_v51 = vpop.f32.mrb[5].mxu0 }
  0xf9   : > { %v576_v50 = vadd.f32 %v2282_v48, %v2128_v30  ;;  %v567_v52 = vpop.f32.mrb[5].mxu1  ;;  %v536_v53 = vadd.f32 %v2128_v30, %v535_v51  ;;  %v2275_v55 = vpop.f32.mrb[6].mxu0 }
  0xfa   : > { %v568_v54 = vadd.f32 %v2128_v30, %v567_v52  ;;  %v2283_v56 = vpop.f32.mrb[6].mxu1  ;;  %589 = vst.msk [vmem:[#allocation2 + $0x30] sm:$0xff] %vm582_vm2, %v544_v49  ;;  %v547_v57 = vadd.f32 %v2275_v55, %v2128_v30  ;;  %v538_v59 = vpop.f32.mrb[7].mxu0 }
  0xfb   : > { %597 = vst.msk [vmem:[#allocation2 + $0x70] sm:$0xff] %vm582_vm2, %v576_v50  ;;  %v579_v58 = vadd.f32 %v2283_v56, %v2128_v30  ;;  %v570_v60 = vpop.f32.mrb[7].mxu1  ;;  %587 = vst.msk [vmem:[#allocation2 + $0x20] sm:$0xff] %vm582_vm2, %v536_v53  ;;  %v539_v61 = vadd.f32 %v2128_v30, %v538_v59 }
  0xfc   : > { %595 = vst.msk [vmem:[#allocation2 + $0x60] sm:$0xff] %vm582_vm2, %v568_v54  ;;  %v571_v62 = vadd.f32 %v2128_v30, %v570_v60  ;;  %590 = vst.msk [vmem:[#allocation2 + $0x38] sm:$0xff] %vm582_vm2, %v547_v57 }
  0xfd   : > { %598 = vst.msk [vmem:[#allocation2 + $0x78] sm:$0xff] %vm582_vm2, %v579_v58  ;;  %588 = vst.msk [vmem:[#allocation2 + $0x28] sm:$0xff] %vm582_vm2, %v539_v61 }
  0xfe   : > { %596 = vst.msk [vmem:[#allocation2 + $0x68] sm:$0xff] %vm582_vm2, %v571_v62 }
  0xff PF: > { %v671_v63 = vld [vmem:[%s3479_s4] sm:$0xf]  ;;  %vm704_vm3 = vcmask 1043456   ;;  %v648_v1 = vld [vmem:[%s2796_s15 + $0x8] sm:$0xff]  ;;  %vm679_vm4 = vcmask 64512   ;;  %v649_v4 = vld [vmem:[%s2796_s15 + $0x10] sm:$0xff] }
 0x100   : > { %v647_v0 = vld [vmem:[%s2796_s15] sm:$0xff]  ;;  %2460 = vmatprep.subr.msk.bf16.mxu0 %vm704_vm3, %v671_v63  ;;  %v706_v2 = vsel %vm704_vm3, %v671_v63, 0  ;;  %v650_v5 = vld [vmem:[%s2796_s15 + $0x18] sm:$0xff]  ;;  %v652_v8 = vld [vmem:[%s2796_s15 + $0x28] sm:$0xff]  ;;  %vm929_vm5 = vcmask 7168   ;;  %p2187_p10 = scmp.ne.s32.totalorder %s2652_s13, 1 }
 0x101   : > { %v663_v3 = vpack.c.bf16 %v648_v1, %v647_v0  ;;  %v651_v6 = vld [vmem:[%s2796_s15 + $0x20] sm:$0xff]  ;;  %2285 = vmatpush3.bf16.msra.mxu0 %v706_v2  ;;  %v2900_v7 = vpack.c.bf16 %v650_v5, %v649_v4  ;;  %v653_v10 = vld [vmem:[%s2796_s15 + $0x30] sm:$0xff]  ;;  %v654_v11 = vld [vmem:[%s2796_s15 + $0x38] sm:$0xff] }
 0x102   : > { %v2904_v9 = vpack.c.bf16 %v652_v8, %v651_v6  ;;  %v655_v12 = vld [vmem:[%s2796_s15 + $0x40] sm:$0xff]  ;;  %v656_v13 = vld [vmem:[%s2796_s15 + $0x48] sm:$0xff]  ;;  %v2915_v14 = vpack.c.bf16 %v654_v11, %v653_v10  ;;  %v657_v16 = vld [vmem:[%s2796_s15 + $0x50] sm:$0xff] }
 0x103   : > { %2286 = vmatprep.mubr.msk.bf16.mxu0 %vm679_vm4, %v663_v3  ;;  %2304 = vmatprep.mubr.msk.bf16.mxu1 %vm679_vm4, %v663_v3  ;;  %v2917_v15 = vpack.c.bf16 %v656_v13, %v655_v12  ;;  %v658_v17 = vld [vmem:[%s2796_s15 + $0x58] sm:$0xff]  ;;  %v659_v18 = vld [vmem:[%s2796_s15 + $0x60] sm:$0xff]  ;;  %v660_v19 = vld [vmem:[%s2796_s15 + $0x68] sm:$0xff] }
 0x104   : > { %2287 = vmatmul.mubr.msk.bf16.vlgmr.msra.gmra.mrb[0].mxu0 %vm679_vm4, %v2900_v7  ;;  %v2927_v20 = vpack.c.bf16 %v658_v17, %v657_v16  ;;  %v2929_v21 = vpack.c.bf16 %v660_v19, %v659_v18  ;;  %v661_v22 = vld [vmem:[%s2796_s15 + $0x70] sm:$0xff]  ;;  %v662_v23 = vld [vmem:[%s2796_s15 + $0x78] sm:$0xff]  ;;  %v913_v25 = vld [vmem:[#allocation2] sm:$0xff] }
 0x105   : > { %2290 = vmatprep.mubr.msk.bf16.mxu0 %vm679_vm4, %v2904_v9  ;;  %v2937_v24 = vpack.c.bf16 %v662_v23, %v661_v22  ;;  %v2137_v27 = vld [vmem:[#allocation7] ss:$0 sm:$0xff]  ;;  %vm2944_vm6 = vmpackc.low %vm929_vm5, %vm929_vm5  ;;  %v914_v4 = vld [vmem:[#allocation2 + $0x8] sm:$0xff] }
 0x106   : > { %v915_v5 = vld [vmem:[#allocation2 + $0x10] sm:$0xff]  ;;  %v916_v6 = vld [vmem:[#allocation2 + $0x18] sm:$0xff]  ;;  %v917_v8 = vld [vmem:[#allocation2 + $0x20] sm:$0xff] }
 0x107   : > { %v918_v10 = vld [vmem:[#allocation2 + $0x28] sm:$0xff]  ;;  %v919_v11 = vld [vmem:[#allocation2 + $0x30] sm:$0xff]  ;;  %v920_v12 = vld [vmem:[#allocation2 + $0x38] sm:$0xff] }
 0x108   : > { %v921_v13 = vld [vmem:[#allocation2 + $0x40] sm:$0xff]  ;;  %v922_v16 = vld [vmem:[#allocation2 + $0x48] sm:$0xff]  ;;  %v923_v17 = vld [vmem:[#allocation2 + $0x50] sm:$0xff] }
 0x109   : > { %v924_v18 = vld [vmem:[#allocation2 + $0x58] sm:$0xff]  ;;  %v925_v19 = vld [vmem:[#allocation2 + $0x60] sm:$0xff]  ;;  %v926_v22 = vld [vmem:[#allocation2 + $0x68] sm:$0xff] }
 0x10a   : > { %v927_v23 = vld [vmem:[#allocation2 + $0x70] sm:$0xff] }
 0x10c   : > { %2291 = vmatmul.mubr.msk.bf16.gmra.mrb[4].mxu0 %vm679_vm4, %v2915_v14 }
 0x10d   : > { %2294 = vmatprep.mubr.msk.bf16.mxu0 %vm679_vm4, %v2917_v15 }
 0x114   : > { %2295 = vmatmul.mubr.msk.bf16.gmra.mrb[8].mxu0 %vm679_vm4, %v2927_v20 }
 0x115   : > { %2298 = vmatprep.mubr.msk.bf16.mxu0 %vm679_vm4, %v2929_v21 }
 0x11c   : > { %2299 = vmatmul.mubr.msk.bf16.gmra.mrb[12].mxu0 %vm679_vm4, %v2937_v24 }
 0x11d   : > { %2352 = vmatprep.mubr.msk.f32.mxu0 %vm929_vm5, %v913_v25  ;;  %v928_v25 = vld [vmem:[#allocation2 + $0x78] sm:$0xff] }
 0x1d7   : > { %v2288_v26 = vpop.f32.mrb[0].mxu0 }
 0x1d8   : > { %v742_v28 = vpop.f32.mrb[1].mxu0  ;;  %v751_v30 = vadd.f32 %v2288_v26, %v2137_v27  ;;  %v805_v26 = vld [vmem:[%s3480_s6] sm:$0xf] }
 0x1d9   : > { %v2289_v29 = vpop.f32.mrb[2].mxu0  ;;  %v743_v33 = vadd.f32 %v2137_v27, %v742_v28  ;;  %2461 = vmatprep.subr.msk.bf16.mxu1 %vm704_vm3, %v805_v26 }
 0x1da   : > { %v754_v31 = vadd.f32 %v2289_v29, %v2137_v27  ;;  %v745_v32 = vpop.f32.mrb[3].mxu0 }
 0x1db   : > { %v746_v34 = vadd.f32 %v2137_v27, %v745_v32 }
 0x1dc   : > { %v2414_v35 = vpack.c.bf16 %v754_v31, %v751_v30  ;;  %v2680_v31 = vmov 0  }
 0x1dd   : > { %v2408_v37 = vpack.c.bf16 %v746_v34, %v743_v33  ;;  %2522 = vset.pattern.permute.xlu0 %v2680_v31  ;;  %2523 = vset.pattern.permute.xlu1 %v2680_v31 }
 0x1df   : > { %2410 = vmatprep.subr.msk.bf16.mxu0 %vm2944_vm6, %v2408_v37  ;;  %v2292_v38 = vpop.f32.mrb[4].mxu0 }
 0x1e0   : > { %2413 = vmatpush3.bf16.xpose.msk.msra.mxu0 %vm2944_vm6, %v2408_v37  ;;  %v767_v39 = vadd.f32 %v2292_v38, %v2137_v27  ;;  %v758_v40 = vpop.f32.mrb[5].mxu0  ;;  %v3065_v38 = vld [vmem:[%s3481_s7] ss:$0 sm:$0xff] }
 0x1e1   : > { %2416 = vmatprep.subr.msk.bf16.mxu0 %vm2944_vm6, %v2414_v35  ;;  %v759_v41 = vadd.f32 %v2137_v27, %v758_v40  ;;  %v2293_v42 = vpop.f32.mrb[6].mxu0 }
 0x1e2   : > { %v770_v43 = vadd.f32 %v2293_v42, %v2137_v27  ;;  %v761_v44 = vpop.f32.mrb[7].mxu0 }
 0x1e3   : > { %v762_v45 = vadd.f32 %v2137_v27, %v761_v44 }
 0x1e4   : > { %v2426_v46 = vpack.c.bf16 %v770_v43, %v767_v39 }
 0x1e5   : > { %v2420_v47 = vpack.c.bf16 %v762_v45, %v759_v41 }
 0x1e7   : > { %v2296_v48 = vpop.f32.mrb[8].mxu0 }
 0x1e8   : > { %2419 = vmatpush3.bf16.xpose.msk.msra.mxu0 %vm2944_vm6, %v2414_v35  ;;  %v783_v49 = vadd.f32 %v2296_v48, %v2137_v27  ;;  %v774_v50 = vpop.f32.mrb[9].mxu0 }
 0x1e9   : > { %2422 = vmatprep.subr.msk.bf16.mxu0 %vm2944_vm6, %v2420_v47  ;;  %v775_v51 = vadd.f32 %v2137_v27, %v774_v50  ;;  %v2297_v52 = vpop.f32.mrb[10].mxu0 }
 0x1ea   : > { %v786_v53 = vadd.f32 %v2297_v52, %v2137_v27  ;;  %v777_v54 = vpop.f32.mrb[11].mxu0 }
 0x1eb   : > { %v778_v55 = vadd.f32 %v2137_v27, %v777_v54 }
 0x1ec   : > { %v2438_v56 = vpack.c.bf16 %v786_v53, %v783_v49 }
 0x1ed   : > { %v2432_v57 = vpack.c.bf16 %v778_v55, %v775_v51 }
 0x1ef   : > { %v2300_v58 = vpop.f32.mrb[12].mxu0 }
 0x1f0   : > { %2425 = vmatpush3.bf16.xpose.msk.msra.mxu0 %vm2944_vm6, %v2420_v47  ;;  %v799_v59 = vadd.f32 %v2300_v58, %v2137_v27  ;;  %v790_v60 = vpop.f32.mrb[13].mxu0 }
 0x1f1   : > { %2428 = vmatprep.subr.msk.bf16.mxu0 %vm2944_vm6, %v2426_v46  ;;  %v791_v61 = vadd.f32 %v2137_v27, %v790_v60  ;;  %v2301_v62 = vpop.f32.mrb[14].mxu0 }
 0x1f2   : > { %v802_v63 = vadd.f32 %v2301_v62, %v2137_v27  ;;  %v793_v0 = vpop.f32.mrb[15].mxu0  ;;  %v3080_v62 = vld [vmem:[#allocation3 + $0x18] sm:$0xff] }
 0x1f3   : > { %v794_v1 = vadd.f32 %v2137_v27, %v793_v0  ;;  %v814_v27 = vsel %vm704_vm3, %v805_v26, 0 }
 0x1f4   : > { %v2450_v2 = vpack.c.bf16 %v802_v63, %v799_v59  ;;  %2303 = vmatpush3.bf16.msra.mxu1 %v814_v27  ;;  %v3075_v59 = vld [vmem:[#allocation3] sm:$0xff]  ;;  %v3082_v63 = vld [vmem:[#allocation3 + $0x8] sm:$0xff] }
 0x1f5   : > { %v2444_v3 = vpack.c.bf16 %v794_v1, %v791_v61 }
 0x1f7   : > { %2305 = vmatmul.mubr.msk.bf16.vlgmr.msra.gmra.mrb[0].mxu1 %vm679_vm4, %v2900_v7 }
 0x1f8   : > { %2431 = vmatpush3.bf16.xpose.msk.msra.mxu0 %vm2944_vm6, %v2426_v46  ;;  %2308 = vmatprep.mubr.msk.bf16.mxu1 %vm679_vm4, %v2904_v9 }
 0x1f9   : > { %2434 = vmatprep.subr.msk.bf16.mxu0 %vm2944_vm6, %v2432_v57 }
 0x1ff   : > { %2309 = vmatmul.mubr.msk.bf16.gmra.mrb[4].mxu1 %vm679_vm4, %v2915_v14 }
 0x200   : > { %2437 = vmatpush3.bf16.xpose.msk.msra.mxu0 %vm2944_vm6, %v2432_v57  ;;  %2312 = vmatprep.mubr.msk.bf16.mxu1 %vm679_vm4, %v2917_v15 }
 0x201   : > { %2440 = vmatprep.subr.msk.bf16.mxu0 %vm2944_vm6, %v2438_v56 }
 0x207   : > { %2313 = vmatmul.mubr.msk.bf16.gmra.mrb[8].mxu1 %vm679_vm4, %v2927_v20 }
 0x208   : > { %2443 = vmatpush3.bf16.xpose.msk.msra.mxu0 %vm2944_vm6, %v2438_v56  ;;  %2316 = vmatprep.mubr.msk.bf16.mxu1 %vm679_vm4, %v2929_v21 }
 0x209   : > { %2446 = vmatprep.subr.msk.bf16.mxu0 %vm2944_vm6, %v2444_v3 }
 0x20f   : > { %2317 = vmatmul.mubr.msk.bf16.gmra.mrb[12].mxu1 %vm679_vm4, %v2937_v24 }
 0x210   : > { %2449 = vmatpush3.bf16.xpose.msk.msra.mxu0 %vm2944_vm6, %v2444_v3 }
 0x211   : > { %2452 = vmatprep.subr.msk.bf16.mxu0 %vm2944_vm6, %v2450_v2 }
 0x218   : > { %2455 = vmatpush3.bf16.xpose.msk.msra.mxu0 %vm2944_vm6, %v2450_v2 }
 0x21f   : > { %2353 = vmatmul.mubr.msk.f32.vlgmr.msra.gmra.mrb[16].mxu0 %vm929_vm5, %v914_v4  ;;  %v3093_v4 = vld [vmem:[#allocation3 + $0x10] sm:$0xff] }
 0x220   : > { %2355 = vmatprep.mubr.msk.f32.mxu0 %vm929_vm5, %v915_v5  ;;  %v3097_v5 = vld [vmem:[#allocation3 + $0x20] sm:$0xff] }
 0x223   : > { %2356 = vmatmul.mubr.msk.f32.gmra.mrb[18].mxu0 %vm929_vm5, %v916_v6 }
 0x224   : > { %2358 = vmatprep.mubr.msk.f32.mxu0 %vm929_vm5, %v917_v8 }
 0x227   : > { %2359 = vmatmul.mubr.msk.f32.gmra.mrb[20].mxu0 %vm929_vm5, %v918_v10 }
 0x228   : > { %2361 = vmatprep.mubr.msk.f32.mxu0 %vm929_vm5, %v919_v11 }
 0x22b   : > { %2362 = vmatmul.mubr.msk.f32.gmra.mrb[22].mxu0 %vm929_vm5, %v920_v12  ;;  %v3105_v12 = vld [vmem:[#allocation3 + $0x28] sm:$0xff] }
 0x22c   : > { %2364 = vmatprep.mubr.msk.f32.mxu0 %vm929_vm5, %v921_v13 }
 0x22f   : > { %2365 = vmatmul.mubr.msk.f32.gmra.mrb[24].mxu0 %vm929_vm5, %v922_v16 }
 0x230   : > { %2367 = vmatprep.mubr.msk.f32.mxu0 %vm929_vm5, %v923_v17  ;;  %v3112_v17 = vld [vmem:[#allocation3 + $0x30] sm:$0xff] }
 0x233   : > { %2368 = vmatmul.mubr.msk.f32.gmra.mrb[26].mxu0 %vm929_vm5, %v924_v18 }
 0x234   : > { %2370 = vmatprep.mubr.msk.f32.mxu0 %vm929_vm5, %v925_v19 }
 0x237   : > { %2371 = vmatmul.mubr.msk.f32.gmra.mrb[28].mxu0 %vm929_vm5, %v926_v22 }
 0x238   : > { %2373 = vmatprep.mubr.msk.f32.mxu0 %vm929_vm5, %v927_v23 }
 0x23b   : > { %2374 = vmatmul.mubr.msk.f32.gmra.mrb[30].mxu0 %vm929_vm5, %v928_v25 }
 0x2ca   : > { %v2306_v39 = vpop.f32.mrb[0].mxu1 }
 0x2cb   : > { %v859_v40 = vadd.f32 %v2306_v39, %v3065_v38  ;;  %v850_v41 = vpop.f32.mrb[1].mxu1 }
 0x2cc   : > { %v851_v42 = vadd.f32 %v3065_v38, %v850_v41  ;;  %v2307_v43 = vpop.f32.mrb[2].mxu1 }
 0x2cd   : > { %v862_v44 = vadd.f32 %v2307_v43, %v3065_v38  ;;  %v853_v45 = vpop.f32.mrb[3].mxu1 }
 0x2ce   : > { %v854_v46 = vadd.f32 %v3065_v38, %v853_v45 }
 0x2cf   : > { %v1628_v47 = vpack.c.bf16 %v862_v44, %v859_v40  ;;  %v3124_v40 = vld [vmem:[#allocation3 + $0x38] sm:$0xff] }
 0x2d0   : > { %v1627_v48 = vpack.c.bf16 %v854_v46, %v851_v42  ;;  %v3131_v42 = vld [vmem:[#allocation3 + $0x40] sm:$0xff] }
 0x2d2   : > { %v2310_v49 = vpop.f32.mrb[4].mxu1  ;;  %2376 = vmatprep.subr.bf16.mxu1 %v1627_v48 }
 0x2d3   : > { %v875_v50 = vadd.f32 %v2310_v49, %v3065_v38  ;;  %v866_v51 = vpop.f32.mrb[5].mxu1  ;;  %2377 = vmatpush3.bf16.msra.mxu1 %v1627_v48  ;;  %v3139_v49 = vld [vmem:[#allocation3 + $0x48] sm:$0xff] }
 0x2d4   : > { %v867_v52 = vadd.f32 %v3065_v38, %v866_v51  ;;  %v2311_v53 = vpop.f32.mrb[6].mxu1  ;;  %2378 = vmatprep.subr.bf16.mxu1 %v1628_v47 }
 0x2d5   : > { %v878_v54 = vadd.f32 %v2311_v53, %v3065_v38  ;;  %v869_v55 = vpop.f32.mrb[7].mxu1 }
 0x2d6   : > { %v870_v56 = vadd.f32 %v3065_v38, %v869_v55 }
 0x2d7   : > { %v1630_v57 = vpack.c.bf16 %v878_v54, %v875_v50  ;;  %2379 = vmatpush3.bf16.msra.mxu1 %v1628_v47 }
 0x2d8   : > { %v1629_v58 = vpack.c.bf16 %v870_v56, %v867_v52  ;;  %v3146_v52 = vld [vmem:[#allocation3 + $0x50] sm:$0xff] }
 0x2da   : > { %2380 = vmatprep.subr.bf16.mxu1 %v1629_v58  ;;  %v2314_v11 = vpop.f32.mrb[8].mxu1 }
 0x2db   : > { %2381 = vmatpush3.bf16.msra.mxu1 %v1629_v58  ;;  %v882_v16 = vpop.f32.mrb[9].mxu1  ;;  %v891_v22 = vadd.f32 %v2314_v11, %v3065_v38 }
 0x2dc   : > { %2382 = vmatprep.subr.bf16.mxu1 %v1630_v57  ;;  %v2315_v18 = vpop.f32.mrb[10].mxu1  ;;  %v883_v23 = vadd.f32 %v3065_v38, %v882_v16 }
 0x2dd   : > { %v885_v25 = vpop.f32.mrb[11].mxu1  ;;  %v894_v31 = vadd.f32 %v2315_v18, %v3065_v38 }
 0x2de   : > { %v886_v39 = vadd.f32 %v3065_v38, %v885_v25  ;;  %v1184_v25 = vld [vmem:[#allocation3 + $0x68] sm:$0xff] }
 0x2df   : > { %2383 = vmatpush3.bf16.msra.mxu1 %v1630_v57  ;;  %v1632_v43 = vpack.c.bf16 %v894_v31, %v891_v22  ;;  %v3176_v31 = vld [vmem:[#allocation3 + $0x70] sm:$0xff] }
 0x2e0   : > { %v1631_v44 = vpack.c.bf16 %v886_v39, %v883_v23 }
 0x2e2   : > { %v2318_v48 = vpop.f32.mrb[12].mxu1  ;;  %2384 = vmatprep.subr.bf16.mxu1 %v1631_v44 }
 0x2e3   : > { %v898_v51 = vpop.f32.mrb[13].mxu1  ;;  %2385 = vmatpush3.bf16.msra.mxu1 %v1631_v44  ;;  %v907_v56 = vadd.f32 %v2318_v48, %v3065_v38 }
 0x2e4   : > { %v2319_v53 = vpop.f32.mrb[14].mxu1  ;;  %2386 = vmatprep.subr.bf16.mxu1 %v1632_v43  ;;  %v899_v57 = vadd.f32 %v3065_v38, %v898_v51 }
 0x2e5   : > { %v901_v58 = vpop.f32.mrb[15].mxu1 }
 0x2e7   : > { %2387 = vmatpush3.bf16.msra.mxu1 %v1632_v43 }
 0x2f2   : > { %v3014_v28 = vpop.f32.mrb[16].mxu0 }
 0x2f3   : > { %v3016_v7 = vpop.f32.mrb[17].mxu0 }
 0x2f4   : > { %1187 = vmax.xlane.f32.xlu0 %v3016_v7 }
 0x2f6   : > { %v3019_v9 = vpop.f32.mrb[18].mxu0 }
 0x2f7   : > { %1193 = vmax.xlane.f32.xlu1 %v3019_v9  ;;  %v3022_v14 = vpop.f32.mrb[19].mxu0 }
 0x2f8   : > { %1189 = vmax.xlane.f32.xlu0 %v3014_v28 }
 0x2fa   : > { %v3025_v15 = vpop.f32.mrb[20].mxu0 }
 0x2fb   : > { %1191 = vmax.xlane.f32.xlu1 %v3022_v14  ;;  %v3028_v20 = vpop.f32.mrb[21].mxu0 }
 0x2fc   : > { %1195 = vmax.xlane.f32.xlu0 %v3028_v20 }
 0x2fe   : > { %v3031_v21 = vpop.f32.mrb[22].mxu0 }
 0x2ff   : > { %1197 = vmax.xlane.f32.xlu1 %v3025_v15  ;;  %v3034_v24 = vpop.f32.mrb[23].mxu0 }
 0x300   : > { %1199 = vmax.xlane.f32.xlu0 %v3034_v24 }
 0x302   : > { %v3037_v29 = vpop.f32.mrb[24].mxu0 }
 0x303   : > { %1201 = vmax.xlane.f32.xlu1 %v3031_v21  ;;  %v3040_v30 = vpop.f32.mrb[25].mxu0 }
 0x304   : > { %1203 = vmax.xlane.f32.xlu0 %v3040_v30 }
 0x306   : > { %v3043_v32 = vpop.f32.mrb[26].mxu0 }
 0x307   : > { %1205 = vmax.xlane.f32.xlu1 %v3037_v29  ;;  %v3046_v33 = vpop.f32.mrb[27].mxu0 }
 0x308   : > { %1207 = vmax.xlane.f32.xlu0 %v3046_v33 }
 0x30a   : > { %v3049_v34 = vpop.f32.mrb[28].mxu0 }
 0x30b   : > { %1209 = vmax.xlane.f32.xlu1 %v3043_v32  ;;  %v3052_v35 = vpop.f32.mrb[29].mxu0 }
 0x30c   : > { %1211 = vmax.xlane.f32.xlu0 %v3052_v35 }
 0x30e   : > { %v3055_v36 = vpop.f32.mrb[30].mxu0 }
 0x30f   : > { %1213 = vmax.xlane.f32.xlu1 %v3049_v34  ;;  %v3058_v37 = vpop.f32.mrb[31].mxu0 }
 0x310   : > { %1215 = vmax.xlane.f32.xlu0 %v3058_v37 }
 0x313   : > { %1217 = vmax.xlane.f32.xlu1 %v3055_v36 }
 0x381   : > { %v1188_v60 = vpop.xlane.xlu0 %1187 }
 0x382   : > { %v3078_v61 = vmax.f32 %v3075_v59, %v1188_v60 }
 0x384   : > { %1764 = vst.msk [vmem:[#allocation3] sm:$0xff] %vm929_vm5, %v3078_v61  ;;  %v1194_v0 = vpop.xlane.xlu1 %1193  ;;  %1285 = vperm.xlu0 %2522, %v3078_v61   ;;  %v1235_v54 = vsub.f32 %v3075_v59, %v3078_v61  ;;  %v3164_v61 = vld [vmem:[#allocation3 + $0x60] sm:$0xff] }
 0x385   : > { %v3088_v1 = vmax.f32 %v3080_v62, %v1194_v0  ;;  %v1190_v2 = vpop.xlane.xlu0 %1189 }
 0x386   : > { %v3091_v3 = vmax.f32 %v3082_v63, %v1190_v2  ;;  %v910_v2 = vadd.f32 %v2319_v53, %v3065_v38  ;;  %v1251_v18 = vmul.f32 1.442695, %v1235_v54 }
 0x387   : > { %1767 = vst.msk [vmem:[#allocation3 + $0x18] sm:$0xff] %vm929_vm5, %v3088_v1 }
 0x388   : > { %1765 = vst.msk [vmem:[#allocation3 + $0x8] sm:$0xff] %vm929_vm5, %v3091_v3  ;;  %v1192_v6 = vpop.xlane.xlu1 %1191  ;;  %1290 = vperm.xlu1 %2523, %v3091_v3   ;;  %v1634_v11 = vpack.c.bf16 %v910_v2, %v907_v56  ;;  %2524 = vpow2.f32 %v1251_v18  ;;  %v1236_v53 = vsub.f32 %v3082_v63, %v3091_v3 }
 0x389   : > { %v3103_v8 = vmax.f32 %v3093_v4, %v1192_v6  ;;  %v1196_v10 = vpop.xlane.xlu0 %1195  ;;  %v902_v6 = vadd.f32 %v3065_v38, %v901_v58 }
 0x38a   : > { %v3108_v13 = vmax.f32 %v3097_v5, %v1196_v10  ;;  %v3158_v10 = vld [vmem:[#allocation3 + $0x58] sm:$0xff]  ;;  %v1253_v56 = vmul.f32 1.442695, %v1236_v53 }
 0x38b   : > { %1766 = vst.msk [vmem:[#allocation3 + $0x10] sm:$0xff] %vm929_vm5, %v3103_v8  ;;  %v1633_v16 = vpack.c.bf16 %v902_v6, %v899_v57  ;;  %v1237_v63 = vsub.f32 %v3093_v4, %v3103_v8 }
 0x38c   : > { %v1198_v19 = vpop.xlane.xlu1 %1197  ;;  %1300 = vperm.xlu1 %2523, %v3088_v1   ;;  %1768 = vst.msk [vmem:[#allocation3 + $0x20] sm:$0xff] %vm929_vm5, %v3108_v13 }
 0x38d   : > { %v3120_v26 = vmax.f32 %v3105_v12, %v1198_v19  ;;  %v1200_v27 = vpop.xlane.xlu0 %1199  ;;  %v1238_v19 = vsub.f32 %v3080_v62, %v3088_v1  ;;  %2388 = vmatprep.subr.bf16.mxu1 %v1633_v16 }
 0x38e   : > { %v3127_v41 = vmax.f32 %v3112_v17, %v1200_v27  ;;  %2389 = vmatpush3.bf16.msra.mxu1 %v1633_v16 }
 0x38f   : > { %1769 = vst.msk [vmem:[#allocation3 + $0x28] sm:$0xff] %vm929_vm5, %v3120_v26  ;;  %2390 = vmatprep.subr.bf16.mxu1 %v1634_v11  ;;  %v1257_v62 = vmul.f32 1.442695, %v1238_v19  ;;  %v1240_v1 = vsub.f32 %v3105_v12, %v3120_v26 }
 0x390   : > { %v1202_v45 = vpop.xlane.xlu1 %1201  ;;  %1295 = vperm.xlu1 %2523, %v3103_v8   ;;  %1770 = vst.msk [vmem:[#allocation3 + $0x30] sm:$0xff] %vm929_vm5, %v3127_v41  ;;  %v1241_v6 = vsub.f32 %v3112_v17, %v3127_v41 }
 0x391   : > { %v3137_v46 = vmax.f32 %v3124_v40, %v1202_v45  ;;  %v1204_v47 = vpop.xlane.xlu0 %1203  ;;  %v3183_v45 = vld [vmem:[#allocation3 + $0x78] sm:$0xff]  ;;  %2526 = vpow2.f32 %v1257_v62  ;;  %v1261_v48 = vmul.f32 1.442695, %v1240_v1 }
 0x392   : > { %v3142_v50 = vmax.f32 %v3131_v42, %v1204_v47  ;;  %2391 = vmatpush3.bf16.msra.mxu1 %v1634_v11  ;;  %v3210_v3 = vpop.eup %2524 }
 0x393   : > { %1771 = vst.msk [vmem:[#allocation3 + $0x38] sm:$0xff] %vm929_vm5, %v3137_v46  ;;  %v1242_v12 = vsub.f32 %v3124_v40, %v3137_v46  ;;  %2528 = vpow2.f32 %v1261_v48 }
 0x394   : > { %v1206_v55 = vpop.xlane.xlu1 %1205  ;;  %1310 = vperm.xlu1 %2523, %v3120_v26   ;;  %1772 = vst.msk [vmem:[#allocation3 + $0x40] sm:$0xff] %vm929_vm5, %v3142_v50  ;;  %v1243_v11 = vsub.f32 %v3131_v42, %v3142_v50 }
 0x395   : > { %v1228_v60 = vmax.f32 %v3139_v49, %v1206_v55  ;;  %v1208_v0 = vpop.xlane.xlu0 %1207  ;;  %v1265_v40 = vmul.f32 1.442695, %v1242_v12 }
 0x396   : > { %v3161_v59 = vmax.f32 %v3146_v52, %v1208_v0  ;;  %v1255_v0 = vmul.f32 1.442695, %v1237_v63  ;;  %v1267_v17 = vmul.f32 1.442695, %v1243_v11 }
 0x397   : > { %1773 = vst.msk [vmem:[#allocation3 + $0x48] sm:$0xff] %vm929_vm5, %v1228_v60  ;;  %1330 = vperm.xlu0 %2522, %v1228_v60   ;;  %2530 = vpow2.f32 %v1265_v40 }
 0x398   : > { %v1210_v22 = vpop.xlane.xlu1 %1209  ;;  %1305 = vperm.xlu1 %2523, %v3108_v13   ;;  %1774 = vst.msk [vmem:[#allocation3 + $0x50] sm:$0xff] %vm929_vm5, %v3161_v59  ;;  %2532 = vpow2.f32 %v1253_v56 }
 0x399   : > { %v1230_v38 = vmax.f32 %v3158_v10, %v1210_v22  ;;  %v1212_v23 = vpop.xlane.xlu0 %1211 }
 0x39a   : > { %v3173_v27 = vmax.f32 %v3164_v61, %v1212_v23 }
 0x39b   : > { %1775 = vst.msk [vmem:[#allocation3 + $0x58] sm:$0xff] %vm929_vm5, %v1230_v38  ;;  %1340 = vperm.xlu0 %2522, %v1230_v38   ;;  %v1246_v58 = vsub.f32 %v3158_v10, %v1230_v38 }
 0x39c   : > { %v1214_v39 = vpop.xlane.xlu1 %1213  ;;  %1320 = vperm.xlu1 %2523, %v3137_v46   ;;  %1776 = vst.msk [vmem:[#allocation3 + $0x60] sm:$0xff] %vm929_vm5, %v3173_v27  ;;  %v1244_v46 = vsub.f32 %v3139_v49, %v1228_v60  ;;  %v1239_v49 = vsub.f32 %v3097_v5, %v3108_v13  ;;  %v3217_v60 = vpop.eup %2526  ;;  %v1263_v13 = vmul.f32 1.442695, %v1241_v6 }
 0x39d   : > { %v1232_v43 = vmax.f32 %v1184_v25, %v1214_v39  ;;  %v1216_v44 = vpop.xlane.xlu0 %1215  ;;  %v1273_v4 = vmul.f32 1.442695, %v1246_v58  ;;  %v3223_v10 = vpop.eup %2528 }
 0x39e   : > { %v3186_v47 = vmax.f32 %v3176_v31, %v1216_v44  ;;  %v1269_v57 = vmul.f32 1.442695, %v1244_v46  ;;  %v1259_v2 = vmul.f32 1.442695, %v1239_v49 }
 0x39f   : > { %1777 = vst.msk [vmem:[#allocation3 + $0x68] sm:$0xff] %vm929_vm5, %v1232_v43  ;;  %1350 = vperm.xlu0 %2522, %v1232_v43   ;;  %v1248_v8 = vsub.f32 %v1184_v25, %v1232_v43 }
 0x3a0   : > { %1315 = vperm.xlu1 %2523, %v3127_v41   ;;  %v1218_v26 = vpop.xlane.xlu1 %1217  ;;  %v1249_v51 = vsub.f32 %v3176_v31, %v3186_v47  ;;  %1778 = vst.msk [vmem:[#allocation3 + $0x70] sm:$0xff] %vm929_vm5, %v3186_v47  ;;  %2534 = vpow2.f32 %v1269_v57  ;;  %v1245_v41 = vsub.f32 %v3146_v52, %v3161_v59 }
 0x3a1   : > { %v3199_v54 = vmax.f32 %v3183_v45, %v1218_v26  ;;  %2536 = vpow2.f32 %v1255_v0  ;;  %v1277_v5 = vmul.f32 1.442695, %v1248_v8  ;;  %v3229_v16 = vpop.eup %2530 }
 0x3a2   : > { %2538 = vpow2.f32 %v1273_v4  ;;  %v3231_v18 = vpop.eup %2532  ;;  %v1271_v42 = vmul.f32 1.442695, %v1245_v41 }
 0x3a3   : > { %v1250_v55 = vsub.f32 %v3183_v45, %v3199_v54  ;;  %1779 = vst.msk [vmem:[#allocation3 + $0x78] sm:$0xff] %vm929_vm5, %v3199_v54  ;;  %1360 = vperm.xlu0 %2522, %v3199_v54   ;;  %2540 = vpow2.f32 %v1259_v2 }
 0x3a4   : > { %1325 = vperm.xlu1 %2523, %v3142_v50   ;;  %2542 = vpow2.f32 %v1277_v5  ;;  %v1247_v50 = vsub.f32 %v3164_v61, %v3173_v27 }
 0x3a5   : > { %2544 = vpow2.f32 %v1263_v13 }
 0x3a6   : > { %2546 = vpow2.f32 %v1267_v17  ;;  %v1275_v52 = vmul.f32 1.442695, %v1247_v50 }
 0x3a7   : > { %1525 = vperm.xlu0 %2522, %v3210_v3   ;;  %2548 = vpow2.f32 %v1271_v42 }
 0x3a8   : > { %1335 = vperm.xlu1 %2523, %v3161_v59   ;;  %2550 = vpow2.f32 %v1275_v52 }
 0x3aa   : > { %v3237_v19 = vpop.eup %2534 }
 0x3ab   : > { %1540 = vperm.xlu0 %2522, %v3217_v60   ;;  %v3239_v22 = vpop.eup %2536 }
 0x3ac   : > { %1345 = vperm.xlu1 %2523, %v3173_v27   ;;  %v3245_v38 = vpop.eup %2538 }
 0x3ad   : > { %v3247_v23 = vpop.eup %2540 }
 0x3ae   : > { %v3251_v59 = vpop.eup %2542 }
 0x3af   : > { %1550 = vperm.xlu0 %2522, %v3223_v10   ;;  %v3253_v25 = vpop.eup %2544 }
 0x3b0   : > { %1355 = vperm.xlu1 %2523, %v3186_v47   ;;  %v3257_v61 = vpop.eup %2546 }
 0x3b1   : > { %v3260_v27 = vpop.eup %2548 }
 0x3b2   : > { %v3263_v62 = vpop.eup %2550 }
 0x3b3   : > { %1560 = vperm.xlu0 %2522, %v3229_v16  }
 0x3b4   : > { %1530 = vperm.xlu1 %2523, %v3231_v18  }
 0x3b7   : > { %1570 = vperm.xlu0 %2522, %v3237_v19  }
 0x3b8   : > { %1535 = vperm.xlu1 %2523, %v3239_v22  }
 0x3bb   : > { %1580 = vperm.xlu0 %2522, %v3245_v38  }
 0x3bc   : > { %1545 = vperm.xlu1 %2523, %v3247_v23  }
 0x3bf   : > { %1590 = vperm.xlu0 %2522, %v3251_v59  }
 0x3c0   : > { %1555 = vperm.xlu1 %2523, %v3253_v25  }
 0x3c4   : > { %1565 = vperm.xlu1 %2523, %v3257_v61  }
 0x3c8   : > { %1575 = vperm.xlu1 %2523, %v3260_v27  }
 0x3cc   : > { %1585 = vperm.xlu1 %2523, %v3263_v62  }
 0x403   : > { %v1286_v1 = vpop.permute.xlu0 %1285 }
 0x404   : > { %v1363_v39 = vsub.f32 %v3016_v7, %v1286_v1 }
 0x406   : > { %v1379_v43 = vmul.f32 1.442695, %v1363_v39 }
 0x407   : > { %v1291_v44 = vpop.permute.xlu1 %1290 }
 0x408   : > { %2552 = vpow2.f32 %v1379_v43  ;;  %v1364_v48 = vsub.f32 %v3014_v28, %v1291_v44 }
 0x40a   : > { %v1381_v12 = vmul.f32 1.442695, %v1364_v48 }
 0x40b   : > { %v1301_v26 = vpop.permute.xlu1 %1300 }
 0x40c   : > { %2554 = vpow2.f32 %v1381_v12  ;;  %v1366_v53 = vsub.f32 %v3019_v9, %v1301_v26 }
 0x40e   : > { %v1385_v40 = vmul.f32 1.442695, %v1366_v53 }
 0x40f   : > { %v1296_v46 = vpop.permute.xlu1 %1295 }
 0x410   : > { %2556 = vpow2.f32 %v1385_v40  ;;  %v1365_v56 = vsub.f32 %v3022_v14, %v1296_v46 }
 0x412   : > { %v2553_v63 = vpop.eup %2552  ;;  %v1383_v57 = vmul.f32 1.442695, %v1365_v56 }
 0x413   : > { %v1311_v58 = vpop.permute.xlu1 %1310  ;;  %1443 = vadd.xlane.f32.xlu1 %v2553_v63 }
 0x414   : > { %2558 = vpow2.f32 %v1383_v57  ;;  %v1368_v7 = vsub.f32 %v3025_v15, %v1311_v58 }
 0x416   : > { %v2555_v0 = vpop.eup %2554  ;;  %v1389_v49 = vmul.f32 1.442695, %v1368_v7  ;;  %v1331_v28 = vpop.permute.xlu0 %1330 }
 0x417   : > { %v1306_v4 = vpop.permute.xlu1 %1305  ;;  %1445 = vadd.xlane.f32.xlu0 %v2555_v0  ;;  %v1619_v8 = vpack.c.bf16 %v2555_v0, %v2553_v63  ;;  %v1372_v5 = vsub.f32 %v3037_v29, %v1331_v28 }
 0x418   : > { %2560 = vpow2.f32 %v1389_v49  ;;  %v1367_v9 = vsub.f32 %v3028_v20, %v1306_v4 }
 0x419   : > { %2392 = vmatprep.mubr.bf16.mxu1 %v1619_v8  ;;  %v1397_v42 = vmul.f32 1.442695, %v1372_v5 }
 0x41a   : > { %v2557_v2 = vpop.eup %2556  ;;  %v1387_v6 = vmul.f32 1.442695, %v1367_v9  ;;  %v1341_v14 = vpop.permute.xlu0 %1340 }
 0x41b   : > { %v1321_v13 = vpop.permute.xlu1 %1320  ;;  %1449 = vadd.xlane.f32.xlu1 %v2557_v2  ;;  %v1374_v50 = vsub.f32 %v3043_v32, %v1341_v14 }
 0x41c   : > { %2562 = vpow2.f32 %v1387_v6  ;;  %v1370_v15 = vsub.f32 %v3031_v21, %v1321_v13 }
 0x41d   : > { %v1401_v43 = vmul.f32 1.442695, %v1374_v50 }
 0x41e   : > { %v2559_v11 = vpop.eup %2558  ;;  %v1393_v17 = vmul.f32 1.442695, %v1370_v15  ;;  %v1351_v41 = vpop.permute.xlu0 %1350  ;;  %v1279_v15 = vmul.f32 1.442695, %v1249_v51 }
 0x41f   : > { %v1316_v52 = vpop.permute.xlu1 %1315  ;;  %1447 = vadd.xlane.f32.xlu0 %v2559_v11  ;;  %v1620_v20 = vpack.c.bf16 %v2557_v2, %v2559_v11  ;;  %v1376_v44 = vsub.f32 %v3049_v34, %v1351_v41  ;;  %v1281_v41 = vmul.f32 1.442695, %v1250_v55 }
 0x420   : > { %2564 = vpow2.f32 %v1393_v17  ;;  %v1369_v1 = vsub.f32 %v3034_v24, %v1316_v52 }
 0x421   : > { %2393 = vmatmul.mubr.bf16.vlgmr.msra.gmra.mrb[16].mxu1 %v1620_v20  ;;  %2566 = vpow2.f32 %v1397_v42  ;;  %v1405_v53 = vmul.f32 1.442695, %v1376_v44 }
 0x422   : > { %v2561_v39 = vpop.eup %2560  ;;  %v1391_v29 = vmul.f32 1.442695, %v1369_v1  ;;  %v1361_v48 = vpop.permute.xlu0 %1360 }
 0x423   : > { %v1326_v21 = vpop.permute.xlu1 %1325  ;;  %1453 = vadd.xlane.f32.xlu1 %v2561_v39  ;;  %v1378_v40 = vsub.f32 %v3055_v36, %v1361_v48 }
 0x424   : > { %2568 = vpow2.f32 %v1391_v29  ;;  %v1371_v12 = vsub.f32 %v3040_v30, %v1326_v21  ;;  %v1411_v21 = vld [vmem:[#allocation4] sm:$0xff] }
 0x425   : > { %2570 = vpow2.f32 %v1401_v43  ;;  %v1409_v57 = vmul.f32 1.442695, %v1378_v40  ;;  %v1427_v48 = vmul.f32 %v3210_v3, %v1411_v21 }
 0x426   : > { %v2563_v32 = vpop.eup %2562  ;;  %v1395_v26 = vmul.f32 1.442695, %v1371_v12  ;;  %v3296_v47 = vpop.permute.xlu0 %1525 }
 0x427   : > { %v1336_v24 = vpop.permute.xlu1 %1335  ;;  %1451 = vadd.xlane.f32.xlu0 %v2563_v32  ;;  %v1621_v46 = vpack.c.bf16 %v2561_v39, %v2563_v32 }
 0x428   : > { %2572 = vpow2.f32 %v1395_v26  ;;  %v1373_v56 = vsub.f32 %v3046_v33, %v1336_v24  ;;  %v1412_v26 = vld [vmem:[#allocation4 + $0x8] sm:$0xff] }
 0x429   : > { %2396 = vmatprep.mubr.bf16.mxu1 %v1621_v46  ;;  %2574 = vpow2.f32 %v1405_v53  ;;  %v1428_v40 = vmul.f32 %v3231_v18, %v1412_v26  ;;  %v1414_v46 = vld [vmem:[#allocation4 + $0x18] sm:$0xff] }
 0x42a   : > { %v2565_v34 = vpop.eup %2564  ;;  %v1399_v63 = vmul.f32 1.442695, %v1373_v56  ;;  %v3300_v52 = vpop.permute.xlu0 %1540 }
 0x42b   : > { %v1346_v58 = vpop.permute.xlu1 %1345  ;;  %1457 = vadd.xlane.f32.xlu1 %v2565_v34  ;;  %v2567_v7 = vpop.eup %2566 }
 0x42c   : > { %2576 = vpow2.f32 %v1399_v63  ;;  %v1375_v30 = vsub.f32 %v3052_v35, %v1346_v58 }
 0x42d   : > { %2578 = vpow2.f32 %v1409_v57  ;;  %v1413_v57 = vld [vmem:[#allocation4 + $0x10] sm:$0xff] }
 0x42e   : > { %v2569_v0 = vpop.eup %2568  ;;  %v1403_v49 = vmul.f32 1.442695, %v1375_v30  ;;  %v3304_v45 = vpop.permute.xlu0 %1550  ;;  %v1429_v3 = vmul.f32 %v3239_v22, %v1413_v57 }
 0x42f   : > { %1455 = vadd.xlane.f32.xlu0 %v2569_v0  ;;  %v1356_v36 = vpop.permute.xlu1 %1355  ;;  %1461 = vadd.xlane.f32.xlu1 %v2567_v7  ;;  %v1622_v28 = vpack.c.bf16 %v2565_v34, %v2569_v0  ;;  %v2571_v4 = vpop.eup %2570  ;;  %v1430_v34 = vmul.f32 %v3217_v60, %v1414_v46  ;;  %v1426_v46 = vld [vmem:[#allocation4 + $0x78] sm:$0xff] }
 0x430   : > { %2580 = vpow2.f32 %v1403_v49  ;;  %v1377_v33 = vsub.f32 %v3058_v37, %v1356_v36  ;;  %v1415_v36 = vld [vmem:[#allocation4 + $0x20] sm:$0xff] }
 0x431   : > { %2397 = vmatmul.mubr.bf16.gmra.mrb[20].mxu1 %v1622_v28  ;;  %v1431_v60 = vmul.f32 %v3247_v23, %v1415_v36  ;;  %v1422_v23 = vld [vmem:[#allocation4 + $0x58] sm:$0xff]  ;;  %v1508_v36 = vld [vmem:[#allocation5 + $0x8] sm:$0xff] }
 0x432   : > { %v2573_v8 = vpop.eup %2572  ;;  %v1407_v9 = vmul.f32 1.442695, %v1377_v33  ;;  %v3308_v55 = vpop.permute.xlu0 %1560 }
 0x433   : > { %1459 = vadd.xlane.f32.xlu0 %v2573_v8  ;;  %1465 = vadd.xlane.f32.xlu1 %v2571_v4  ;;  %v1623_v2 = vpack.c.bf16 %v2567_v7, %v2573_v8  ;;  %v2575_v35 = vpop.eup %2574  ;;  %v3294_v31 = vpop.permute.xlu1 %1530  ;;  %v1416_v7 = vld [vmem:[#allocation4 + $0x28] sm:$0xff] }
 0x434   : > { %2582 = vpow2.f32 %v1407_v9  ;;  %v1432_v18 = vmul.f32 %v3223_v10, %v1416_v7 }
 0x435   : > { %2400 = vmatprep.mubr.bf16.mxu1 %v1623_v2  ;;  %2584 = vpow2.f32 %v1279_v15  ;;  %v1420_v2 = vld [vmem:[#allocation4 + $0x48] sm:$0xff] }
 0x436   : > { %v2577_v6 = vpop.eup %2576  ;;  %2586 = vpow2.f32 %v1281_v41  ;;  %v3312_v39 = vpop.permute.xlu0 %1570  ;;  %v1436_v10 = vmul.f32 %v3237_v19, %v1420_v2  ;;  %v1421_v19 = vld [vmem:[#allocation4 + $0x50] sm:$0xff] }
 0x437   : > { %1463 = vadd.xlane.f32.xlu0 %v2577_v6  ;;  %1469 = vadd.xlane.f32.xlu1 %v2575_v35  ;;  %v1624_v14 = vpack.c.bf16 %v2571_v4, %v2577_v6  ;;  %v2579_v5 = vpop.eup %2578  ;;  %v3298_v51 = vpop.permute.xlu1 %1535  ;;  %v1418_v4 = vld [vmem:[#allocation4 + $0x38] sm:$0xff] }
 0x438   : > { %v1434_v22 = vmul.f32 %v3229_v16, %v1418_v4  ;;  %v1438_v16 = vmul.f32 %v3245_v38, %v1422_v23  ;;  %v1423_v38 = vld [vmem:[#allocation4 + $0x60] sm:$0xff] }
 0x439   : > { %2401 = vmatmul.mubr.bf16.gmra.mrb[24].mxu1 %v1624_v14 }
 0x43a   : > { %v2581_v13 = vpop.eup %2580  ;;  %v3316_v43 = vpop.permute.xlu0 %1580 }
 0x43b   : > { %1467 = vadd.xlane.f32.xlu0 %v2581_v13  ;;  %1473 = vadd.xlane.f32.xlu1 %v2579_v5  ;;  %v1625_v37 = vpack.c.bf16 %v2575_v35, %v2581_v13  ;;  %v3302_v20 = vpop.permute.xlu1 %1545  ;;  %v1417_v35 = vld [vmem:[#allocation4 + $0x30] sm:$0xff] }
 0x43c   : > { %v1433_v14 = vmul.f32 %v3253_v25, %v1417_v35 }
 0x43d   : > { %2404 = vmatprep.mubr.bf16.mxu1 %v1625_v37  ;;  %v1419_v37 = vld [vmem:[#allocation4 + $0x40] sm:$0xff] }
 0x43e   : > { %v2583_v11 = vpop.eup %2582  ;;  %v3321_v12 = vpop.permute.xlu0 %1590 }
 0x43f   : > { %1471 = vadd.xlane.f32.xlu0 %v2583_v11  ;;  %v1626_v17 = vpack.c.bf16 %v2579_v5, %v2583_v11  ;;  %v3288_v42 = vpop.eup %2584  ;;  %v3306_v54 = vpop.permute.xlu1 %1555 }
 0x440   : > { %v3291_v50 = vpop.eup %2586 }
 0x441   : > { %2405 = vmatmul.mubr.bf16.gmra.mrb[28].mxu1 %v1626_v17  ;;  %v1435_v17 = vmul.f32 %v3257_v61, %v1419_v37 }
 0x443   : > { %v3310_v1 = vpop.permute.xlu1 %1565 }
 0x447   : > { %v3314_v29 = vpop.permute.xlu1 %1575 }
 0x44b   : > { %v3318_v44 = vpop.permute.xlu1 %1585 }
 0x44c   : > { %1595 = vperm.xlu1 %2523, %v3288_v42  }
 0x455   : > { %1600 = vperm.xlu0 %2522, %v3291_v50  }
 0x4a0   : > { %v1444_v32 = vpop.xlane.xlu1 %1443 }
 0x4a1   : > { %v1475_v53 = vadd.f32 %v1444_v32, %v1427_v48  ;;  %v1424_v48 = vld [vmem:[#allocation4 + $0x68] sm:$0xff] }
 0x4a2   : > { %v1440_v26 = vmul.f32 %v3251_v59, %v1424_v48 }
 0x4a3   : > { %1491 = vst.msk [vmem:[#allocation4] sm:$0xff] %vm929_vm5, %v1475_v53  ;;  %v1437_v53 = vmul.f32 %v3260_v27, %v1421_v19 }
 0x4a4   : > { %v1446_v24 = vpop.xlane.xlu0 %1445 }
 0x4a5   : > { %v1476_v56 = vadd.f32 %v1446_v24, %v1428_v40 }
 0x4a7   : > { %1492 = vst.msk [vmem:[#allocation4 + $0x8] sm:$0xff] %vm929_vm5, %v1476_v56 }
 0x4a8   : > { %v1450_v63 = vpop.xlane.xlu1 %1449 }
 0x4a9   : > { %v1478_v58 = vadd.f32 %v1450_v63, %v1430_v34  ;;  %v1442_v34 = vmul.f32 %v3291_v50, %v1426_v46  ;;  %v1439_v63 = vmul.f32 %v3263_v62, %v1423_v38  ;;  %v1510_v50 = vld [vmem:[#allocation5 + $0x18] sm:$0xff] }
 0x4ab   : > { %1494 = vst.msk [vmem:[#allocation4 + $0x18] sm:$0xff] %vm929_vm5, %v1478_v58 }
 0x4ac   : > { %v1448_v30 = vpop.xlane.xlu0 %1447 }
 0x4ad   : > { %v1477_v0 = vadd.f32 %v1448_v30, %v1429_v3  ;;  %v1425_v3 = vld [vmem:[#allocation4 + $0x70] sm:$0xff] }
 0x4ae   : > { %v1441_v27 = vmul.f32 %v3288_v42, %v1425_v3 }
 0x4af   : > { %1493 = vst.msk [vmem:[#allocation4 + $0x10] sm:$0xff] %vm929_vm5, %v1477_v0 }
 0x4b0   : > { %v1454_v49 = vpop.xlane.xlu1 %1453 }
 0x4b1   : > { %v1480_v28 = vadd.f32 %v1454_v49, %v1432_v18  ;;  %v1509_v18 = vld [vmem:[#allocation5 + $0x10] sm:$0xff]  ;;  %v1507_v49 = vld [vmem:[#allocation5] sm:$0xff] }
 0x4b2   : > { %v1605_v62 = vmul.f32 %v3298_v51, %v1509_v18  ;;  %v1511_v51 = vld [vmem:[#allocation5 + $0x20] sm:$0xff] }
 0x4b3   : > { %1496 = vst.msk [vmem:[#allocation4 + $0x28] sm:$0xff] %vm929_vm5, %v1480_v28  ;;  %v1603_v28 = vmul.f32 %v3296_v47, %v1507_v49  ;;  %v1513_v47 = vld [vmem:[#allocation5 + $0x30] sm:$0xff] }
 0x4b4   : > { %v1452_v33 = vpop.xlane.xlu0 %1451 }
 0x4b5   : > { %v1479_v8 = vadd.f32 %v1452_v33, %v1431_v60  ;;  %v1606_v33 = vmul.f32 %v3300_v52, %v1510_v50  ;;  %v1514_v52 = vld [vmem:[#allocation5 + $0x38] sm:$0xff] }
 0x4b7   : > { %1495 = vst.msk [vmem:[#allocation4 + $0x20] sm:$0xff] %vm929_vm5, %v1479_v8 }
 0x4b8   : > { %v1458_v9 = vpop.xlane.xlu1 %1457 }
 0x4b9   : > { %v1482_v6 = vadd.f32 %v1458_v9, %v1434_v22  ;;  %v1604_v22 = vmul.f32 %v3294_v31, %v1508_v36  ;;  %v1607_v31 = vmul.f32 %v3302_v20, %v1511_v51  ;;  %v1518_v20 = vld [vmem:[#allocation5 + $0x58] sm:$0xff] }
 0x4bb   : > { %1498 = vst.msk [vmem:[#allocation4 + $0x38] sm:$0xff] %vm929_vm5, %v1482_v6 }
 0x4bc   : > { %v1462_v5 = vpop.xlane.xlu1 %1461  ;;  %v1456_v13 = vpop.xlane.xlu0 %1455 }
 0x4bd   : > { %v1484_v15 = vadd.f32 %v1462_v5, %v1436_v10  ;;  %v1481_v11 = vadd.f32 %v1456_v13, %v1433_v14  ;;  %v1512_v10 = vld [vmem:[#allocation5 + $0x28] sm:$0xff]  ;;  %v1609_v14 = vmul.f32 %v3306_v54, %v1513_v47  ;;  %v1610_v13 = vmul.f32 %v3308_v55, %v1514_v52  ;;  %v1515_v54 = vld [vmem:[#allocation5 + $0x40] sm:$0xff] }
 0x4be   : > { %v1516_v55 = vld [vmem:[#allocation5 + $0x48] sm:$0xff] }
 0x4bf   : > { %1500 = vst.msk [vmem:[#allocation4 + $0x48] sm:$0xff] %vm929_vm5, %v1484_v15  ;;  %1497 = vst.msk [vmem:[#allocation4 + $0x30] sm:$0xff] %vm929_vm5, %v1481_v11  ;;  %v1608_v15 = vmul.f32 %v3304_v45, %v1512_v10  ;;  %v1611_v45 = vmul.f32 %v3310_v1, %v1515_v54  ;;  %v1522_v1 = vld [vmem:[#allocation5 + $0x78] sm:$0xff] }
 0x4c0   : > { %v1466_v41 = vpop.xlane.xlu1 %1465  ;;  %v1460_v21 = vpop.xlane.xlu0 %1459 }
 0x4c1   : > { %v1486_v32 = vadd.f32 %v1466_v41, %v1438_v16  ;;  %v1483_v25 = vadd.f32 %v1460_v21, %v1435_v17  ;;  %v1517_v21 = vld [vmem:[#allocation5 + $0x50] sm:$0xff] }
 0x4c2   : > { %v1613_v19 = vmul.f32 %v3314_v29, %v1517_v21 }
 0x4c3   : > { %1502 = vst.msk [vmem:[#allocation4 + $0x58] sm:$0xff] %vm929_vm5, %v1486_v32  ;;  %1499 = vst.msk [vmem:[#allocation4 + $0x40] sm:$0xff] %vm929_vm5, %v1483_v25  ;;  %v1614_v25 = vmul.f32 %v3316_v43, %v1518_v20 }
 0x4c4   : > { %v1470_v40 = vpop.xlane.xlu1 %1469  ;;  %v1464_v24 = vpop.xlane.xlu0 %1463 }
 0x4c5   : > { %v1488_v56 = vadd.f32 %v1470_v40, %v1440_v26  ;;  %v1485_v61 = vadd.f32 %v1464_v24, %v1437_v53  ;;  %v1612_v40 = vmul.f32 %v3312_v39, %v1516_v55 }
 0x4c7   : > { %1504 = vst.msk [vmem:[#allocation4 + $0x68] sm:$0xff] %vm929_vm5, %v1488_v56  ;;  %1501 = vst.msk [vmem:[#allocation4 + $0x50] sm:$0xff] %vm929_vm5, %v1485_v61  ;;  %v1521_v61 = vld [vmem:[#allocation5 + $0x70] sm:$0xff] }
 0x4c8   : > { %v1474_v57 = vpop.xlane.xlu1 %1473  ;;  %v1468_v58 = vpop.xlane.xlu0 %1467 }
 0x4c9   : > { %v1490_v59 = vadd.f32 %v1474_v57, %v1442_v34  ;;  %v1487_v30 = vadd.f32 %v1468_v58, %v1439_v63  ;;  %v1519_v63 = vld [vmem:[#allocation5 + $0x60] sm:$0xff]  ;;  %v1520_v57 = vld [vmem:[#allocation5 + $0x68] sm:$0xff] }
 0x4ca   : > { %v1615_v58 = vmul.f32 %v3318_v44, %v1519_v63  ;;  %v1802_v44 = vld [vmem:[#allocation4 + $0x10] sm:$0xff] (!%p2187_p10)  ;;  %v1811_v51 = vld [vmem:[#allocation4 + $0x58] sm:$0xff] (!%p2187_p10) }
 0x4cb   : > { %1506 = vst.msk [vmem:[#allocation4 + $0x78] sm:$0xff] %vm929_vm5, %v1490_v59  ;;  %1503 = vst.msk [vmem:[#allocation4 + $0x60] sm:$0xff] %vm929_vm5, %v1487_v30  ;;  %2590 = vrcp.f32 (!%p2187_p10), %v1802_v44 }
 0x4cc   : > { %v1472_v7 = vpop.xlane.xlu0 %1471  ;;  %v1596_v34 = vpop.permute.xlu1 %1595 }
 0x4cd   : > { %v1489_v0 = vadd.f32 %v1472_v7, %v1441_v27  ;;  %v1617_v39 = vmul.f32 %v1596_v34, %v1521_v61  ;;  %v1616_v7 = vmul.f32 %v3321_v12, %v1520_v57  ;;  %v2681_v12 = vmov (!%p2187_p10), 0   ;;  %v1954_v57 = vld [vmem:[%s2786_s28 + $0x18] sm:$0xff] (!%p2187_p10) }
 0x4ce   : > { %2589 = vset.pattern.permute.xlu1 (!%p2187_p10), %v2681_v12  ;;  %2588 = vset.pattern.permute.xlu0 (!%p2187_p10), %v2681_v12  ;;  %v1810_v10 = vld [vmem:[#allocation4 + $0x50] sm:$0xff] (!%p2187_p10)  ;;  %v1955_v12 = vld [vmem:[%s2786_s28 + $0x20] sm:$0xff] (!%p2187_p10) }
 0x4cf   : > { %1505 = vst.msk [vmem:[#allocation4 + $0x70] sm:$0xff] %vm929_vm5, %v1489_v0 }
 0x4d4   : > { %v1601_v43 = vpop.permute.xlu0 %1600 }
 0x4d5   : > { %v1618_v59 = vmul.f32 %v1601_v43, %v1522_v1 }
 0x4f4   : > { %v2394_v60 = vpop.f32.mrb[16].mxu1 }
 0x4f5   : > { %v1734_v4 = vadd.f32 %v2394_v60, %v1605_v62  ;;  %v1669_v8 = vpop.f32.mrb[17].mxu1  ;;  %v1800_v62 = vld [vmem:[#allocation4] sm:$0xff] (!%p2187_p10)  ;;  %v1801_v60 = vld [vmem:[#allocation4 + $0x8] sm:$0xff] (!%p2187_p10) }
 0x4f6   : > { %v1732_v42 = vadd.f32 %v1669_v8, %v1603_v28  ;;  %v2395_v9 = vpop.f32.mrb[18].mxu1  ;;  %v1803_v28 = vld [vmem:[#allocation4 + $0x18] sm:$0xff] (!%p2187_p10)  ;;  %2592 = vrcp.f32 (!%p2187_p10), %v1800_v62 }
 0x4f7   : > { %1750 = vst.msk [vmem:[#allocation5 + $0x10] sm:$0xff] %vm679_vm4, %v1734_v4  ;;  %v1735_v2 = vadd.f32 %v2395_v9, %v1606_v33  ;;  %v1672_v35 = vpop.f32.mrb[19].mxu1  ;;  %2594 = vrcp.f32 (!%p2187_p10), %v1803_v28  ;;  %v1805_v33 = vld [vmem:[#allocation4 + $0x28] sm:$0xff] (!%p2187_p10)  ;;  %v1804_v4 = vld [vmem:[#allocation4 + $0x20] sm:$0xff] (!%p2187_p10)  ;;  %v1807_v8 = vld [vmem:[#allocation4 + $0x38] sm:$0xff] (!%p2187_p10) }
 0x4f8   : > { %1748 = vst.msk [vmem:[#allocation5] sm:$0xff] %vm679_vm4, %v1732_v42  ;;  %v1733_v6 = vadd.f32 %v1672_v35, %v1604_v22  ;;  %2596 = vrcp.f32 (!%p2187_p10), %v1801_v60  ;;  %v1806_v22 = vld [vmem:[#allocation4 + $0x30] sm:$0xff] (!%p2187_p10)  ;;  %v2591_v42 = vpop.eup (!%p2187_p10), %2590 }
 0x4f9   : > { %1751 = vst.msk [vmem:[#allocation5 + $0x18] sm:$0xff] %vm679_vm4, %v1735_v2  ;;  %2598 = vrcp.f32 (!%p2187_p10), %v1805_v33  ;;  %1844 = vperm.xlu1 (!%p2187_p10), %2589, %v2591_v42   ;;  %v1809_v2 = vld [vmem:[#allocation4 + $0x48] sm:$0xff] (!%p2187_p10) }
 0x4fa   : > { %1749 = vst.msk [vmem:[#allocation5 + $0x8] sm:$0xff] %vm679_vm4, %v1733_v6  ;;  %2600 = vrcp.f32 (!%p2187_p10), %v1804_v4  ;;  %v1808_v6 = vld [vmem:[#allocation4 + $0x40] sm:$0xff] (!%p2187_p10) }
 0x4fb   : > { %2602 = vrcp.f32 (!%p2187_p10), %v1807_v8 }
 0x4fc   : > { %2604 = vrcp.f32 (!%p2187_p10), %v1806_v22 }
 0x4fd   : > { %2606 = vrcp.f32 (!%p2187_p10), %v1809_v2  ;;  %v1958_v2 = vld [vmem:[%s2786_s28 + $0x38] sm:$0xff] (!%p2187_p10) }
 0x4fe   : > { %2608 = vrcp.f32 (!%p2187_p10), %v1808_v6  ;;  %v1786_v55 = vld [vmem:[#allocation5 + $0x10] sm:$0xff] (!%p2187_p10) }
 0x4ff   : > { %2610 = vrcp.f32 (!%p2187_p10), %v1811_v51  ;;  %v1957_v51 = vld [vmem:[%s2786_s28 + $0x30] sm:$0xff] (!%p2187_p10) }
 0x500   : > { %v2593_v9 = vpop.eup (!%p2187_p10), %2592  ;;  %2612 = vrcp.f32 (!%p2187_p10), %v1810_v10 }
 0x501   : > { %v2595_v35 = vpop.eup (!%p2187_p10), %2594  ;;  %1834 = vperm.xlu0 (!%p2187_p10), %2588, %v2593_v9  }
 0x502   : > { %v2597_v47 = vpop.eup (!%p2187_p10), %2596  ;;  %1849 = vperm.xlu1 (!%p2187_p10), %2589, %v2595_v35  }
 0x503   : > { %v2599_v52 = vpop.eup (!%p2187_p10), %2598 }
 0x504   : > { %v2398_v5 = vpop.f32.mrb[20].mxu1 }
 0x505   : > { %v1738_v23 = vadd.f32 %v2398_v5, %v1609_v14  ;;  %v1685_v37 = vpop.f32.mrb[21].mxu1  ;;  %1839 = vperm.xlu0 (!%p2187_p10), %2588, %v2597_v47   ;;  %v2601_v14 = vpop.eup (!%p2187_p10), %2600 }
 0x506   : > { %v1736_v11 = vadd.f32 %v1685_v37, %v1607_v31  ;;  %v2399_v16 = vpop.f32.mrb[22].mxu1  ;;  %1859 = vperm.xlu1 (!%p2187_p10), %2589, %v2599_v52   ;;  %v1813_v31 = vld [vmem:[#allocation4 + $0x68] sm:$0xff] (!%p2187_p10)  ;;  %v2603_v5 = vpop.eup (!%p2187_p10), %2602  ;;  %v1815_v37 = vld [vmem:[#allocation4 + $0x78] sm:$0xff] (!%p2187_p10) }
 0x507   : > { %1754 = vst.msk [vmem:[#allocation5 + $0x30] sm:$0xff] %vm679_vm4, %v1738_v23  ;;  %v1739_v17 = vadd.f32 %v2399_v16, %v1610_v13  ;;  %v1688_v41 = vpop.f32.mrb[23].mxu1  ;;  %v1812_v13 = vld [vmem:[#allocation4 + $0x60] sm:$0xff] (!%p2187_p10)  ;;  %v2605_v23 = vpop.eup (!%p2187_p10), %2604  ;;  %2614 = vrcp.f32 (!%p2187_p10), %v1813_v31 }
 0x508   : > { %1752 = vst.msk [vmem:[#allocation5 + $0x20] sm:$0xff] %vm679_vm4, %v1736_v11  ;;  %v1737_v48 = vadd.f32 %v1688_v41, %v1608_v15  ;;  %2616 = vrcp.f32 (!%p2187_p10), %v1812_v13  ;;  %v2607_v15 = vpop.eup (!%p2187_p10), %2606  ;;  %v1814_v11 = vld [vmem:[#allocation4 + $0x70] sm:$0xff] (!%p2187_p10) }
 0x509   : > { %1755 = vst.msk [vmem:[#allocation5 + $0x38] sm:$0xff] %vm679_vm4, %v1739_v17  ;;  %1854 = vperm.xlu0 (!%p2187_p10), %2588, %v2601_v14   ;;  %v2609_v16 = vpop.eup (!%p2187_p10), %2608  ;;  %2618 = vrcp.f32 (!%p2187_p10), %v1815_v37  ;;  %v1960_v37 = vld [vmem:[%s2786_s28 + $0x48] sm:$0xff] (!%p2187_p10) }
 0x50a   : > { %1753 = vst.msk [vmem:[#allocation5 + $0x28] sm:$0xff] %vm679_vm4, %v1737_v48  ;;  %1869 = vperm.xlu1 (!%p2187_p10), %2589, %v2603_v5   ;;  %2620 = vrcp.f32 (!%p2187_p10), %v1814_v11  ;;  %v2611_v17 = vpop.eup (!%p2187_p10), %2610 }
 0x50b   : > { %v2613_v41 = vpop.eup (!%p2187_p10), %2612 }
 0x50c   : > { %v2402_v32 = vpop.f32.mrb[24].mxu1 }
 0x50d   : > { %v1742_v26 = vadd.f32 %v2402_v32, %v1613_v19  ;;  %v1701_v53 = vpop.f32.mrb[25].mxu1  ;;  %1864 = vperm.xlu0 (!%p2187_p10), %2588, %v2605_v23   ;;  %v1784_v19 = vld [vmem:[#allocation5] sm:$0xff] (!%p2187_p10) }
 0x50e   : > { %v1740_v24 = vadd.f32 %v1701_v53, %v1611_v45  ;;  %v2403_v46 = vpop.f32.mrb[26].mxu1  ;;  %1879 = vperm.xlu1 (!%p2187_p10), %2589, %v2607_v15   ;;  %v3388_v45 = vld [vmem:[%s3482_s8] ss:$0 sm:$0xff] (!%p2187_p10)  ;;  %v1953_v53 = vld [vmem:[%s2786_s28 + $0x10] sm:$0xff] (!%p2187_p10) }
 0x50f   : > { %1758 = vst.msk [vmem:[#allocation5 + $0x50] sm:$0xff] %vm679_vm4, %v1742_v26  ;;  %v1743_v38 = vadd.f32 %v2403_v46, %v1614_v25  ;;  %v1704_v56 = vpop.f32.mrb[27].mxu1  ;;  %v1790_v60 = vld [vmem:[#allocation5 + $0x30] sm:$0xff] (!%p2187_p10) }
 0x510   : > { %1756 = vst.msk [vmem:[#allocation5 + $0x40] sm:$0xff] %vm679_vm4, %v1740_v24  ;;  %v1741_v29 = vadd.f32 %v1704_v56, %v1612_v40  ;;  %v1787_v24 = vld [vmem:[#allocation5 + $0x18] sm:$0xff] (!%p2187_p10)  ;;  %v1785_v56 = vld [vmem:[#allocation5 + $0x8] sm:$0xff] (!%p2187_p10) }
 0x511   : > { %1759 = vst.msk [vmem:[#allocation5 + $0x58] sm:$0xff] %vm679_vm4, %v1743_v38  ;;  %1874 = vperm.xlu0 (!%p2187_p10), %2588, %v2609_v16   ;;  %v2615_v21 = vpop.eup (!%p2187_p10), %2614  ;;  %v1951_v38 = vld [vmem:[%s2786_s28] sm:$0xff] (!%p2187_p10)  ;;  %v1791_v62 = vld [vmem:[#allocation5 + $0x38] sm:$0xff] (!%p2187_p10) }
 0x512   : > { %1757 = vst.msk [vmem:[#allocation5 + $0x48] sm:$0xff] %vm679_vm4, %v1741_v29  ;;  %1889 = vperm.xlu1 (!%p2187_p10), %2589, %v2611_v17   ;;  %v2617_v48 = vpop.eup (!%p2187_p10), %2616  ;;  %v1959_v17 = vld [vmem:[%s2786_s28 + $0x40] sm:$0xff] (!%p2187_p10) }
 0x513   : > { %v2619_v54 = vpop.eup (!%p2187_p10), %2618 }
 0x514   : > { %v2406_v3 = vpop.f32.mrb[28].mxu1  ;;  %1783 = sbr.rel (%p2187_p10) target bundleno = 1444 (0x5a4), region = 64  ;;  %v2621_v20 = vpop.eup (!%p2187_p10), %2620 }
 0x515   : > { %v1746_v30 = vadd.f32 %v2406_v3, %v1617_v39  ;;  %v1717_v27 = vpop.f32.mrb[29].mxu1  ;;  %1884 = vperm.xlu0 (!%p2187_p10), %2588, %v2613_v41  }
 0x516   : > { %v1744_v0 = vadd.f32 %v1717_v27, %v1615_v58  ;;  %v2407_v18 = vpop.f32.mrb[30].mxu1  ;;  %1899 = vperm.xlu1 (!%p2187_p10), %2589, %v2615_v21   ;;  %v1789_v58 = vld [vmem:[#allocation5 + $0x28] sm:$0xff] (!%p2187_p10)  ;;  %v1794_v41 = vld [vmem:[#allocation5 + $0x50] sm:$0xff] (!%p2187_p10) }
 0x517   : > { %1762 = vst.msk [vmem:[#allocation5 + $0x70] sm:$0xff] %vm679_vm4, %v1746_v30  ;;  %v1747_v49 = vadd.f32 %v2407_v18, %v1618_v59  ;;  %v1720_v50 = vpop.f32.mrb[31].mxu1  ;;  %v1952_v59 = vld [vmem:[%s2786_s28 + $0x8] sm:$0xff] (!%p2187_p10)  ;;  %v1788_v30 = vld [vmem:[#allocation5 + $0x20] sm:$0xff] (!%p2187_p10) }
 0x518   : > { %1760 = vst.msk [vmem:[#allocation5 + $0x60] sm:$0xff] %vm679_vm4, %v1744_v0  ;;  %v1745_v36 = vadd.f32 %v1720_v50, %v1616_v7  ;;  %v1792_v52 = vld [vmem:[#allocation5 + $0x40] sm:$0xff] (!%p2187_p10)  ;;  %v1795_v11 = vld [vmem:[#allocation5 + $0x58] sm:$0xff] (!%p2187_p10) }
 0x519   : > { %1763 = vst.msk [vmem:[#allocation5 + $0x78] sm:$0xff] %vm679_vm4, %v1747_v49  ;;  %1894 = vperm.xlu0 (!%p2187_p10), %2588, %v2617_v48   ;;  %v1793_v6 = vld [vmem:[#allocation5 + $0x48] sm:$0xff] (!%p2187_p10) }
 0x51a   : > { %1761 = vst.msk [vmem:[#allocation5 + $0x68] sm:$0xff] %vm679_vm4, %v1745_v36  ;;  %1909 = vperm.xlu1 (!%p2187_p10), %2589, %v2619_v54   ;;  %v1956_v36 = vld [vmem:[%s2786_s28 + $0x28] sm:$0xff] (!%p2187_p10) }
 0x51d   : > { %1904 = vperm.xlu0 %2588, %v2621_v20  }
 0x578   : > { %v1845_v32 = vpop.permute.xlu1 %1844 }
 0x579   : > { %v1914_v25 = vmul.f32 %v1845_v32, %v1786_v55  ;;  %v1962_v32 = vld [vmem:[%s2786_s28 + $0x58] sm:$0xff] }
 0x57b   : > { %v1937_v46 = vmul.f32 %v3388_v45, %v1914_v25 }
 0x57d   : > { %v1969_v29 = vadd.f32 %v1953_v53, %v1937_v46 }
 0x57f   : > { %1985 = vst.msk [vmem:[%s2791_s10 + $0x10] sm:$0xff] %vm679_vm4, %v1969_v29 }
 0x580   : > { %v1835_v26 = vpop.permute.xlu0 %1834 }
 0x581   : > { %v1912_v40 = vmul.f32 %v1835_v26, %v1784_v19  ;;  %v1850_v34 = vpop.permute.xlu1 %1849  ;;  %v1797_v26 = vld [vmem:[#allocation5 + $0x68] sm:$0xff] }
 0x582   : > { %v1915_v63 = vmul.f32 %v1850_v34, %v1787_v24  ;;  %v1796_v24 = vld [vmem:[#allocation5 + $0x60] sm:$0xff] }
 0x583   : > { %v1935_v61 = vmul.f32 %v3388_v45, %v1912_v40  ;;  %v1961_v40 = vld [vmem:[%s2786_s28 + $0x50] sm:$0xff] }
 0x584   : > { %v1840_v1 = vpop.permute.xlu0 %1839  ;;  %v1938_v3 = vmul.f32 %v3388_v45, %v1915_v63  ;;  %v1964_v63 = vld [vmem:[%s2786_s28 + $0x68] sm:$0xff] }
 0x585   : > { %v1967_v43 = vadd.f32 %v1951_v38, %v1935_v61  ;;  %v1913_v39 = vmul.f32 %v1840_v1, %v1785_v56  ;;  %v1860_v7 = vpop.permute.xlu1 %1859 }
 0x586   : > { %v1970_v0 = vadd.f32 %v1954_v57, %v1938_v3  ;;  %v1917_v18 = vmul.f32 %v1860_v7, %v1789_v58  ;;  %v1798_v58 = vld [vmem:[#allocation5 + $0x70] sm:$0xff] }
 0x587   : > { %1983 = vst.msk [vmem:[%s2791_s10] sm:$0xff] %vm679_vm4, %v1967_v43  ;;  %v1936_v27 = vmul.f32 %v3388_v45, %v1913_v39  ;;  %v1799_v43 = vld [vmem:[#allocation5 + $0x78] sm:$0xff]  ;;  %v1963_v39 = vld [vmem:[%s2786_s28 + $0x60] sm:$0xff] }
 0x588   : > { %v1855_v49 = vpop.permute.xlu0 %1854  ;;  %1986 = vst.msk [vmem:[%s2791_s10 + $0x18] sm:$0xff] %vm679_vm4, %v1970_v0  ;;  %v1940_v28 = vmul.f32 %v3388_v45, %v1917_v18  ;;  %v1966_v18 = vld [vmem:[%s2786_s28 + $0x78] sm:$0xff] }
 0x589   : > { %v1968_v50 = vadd.f32 %v1952_v59, %v1936_v27  ;;  %v1916_v44 = vmul.f32 %v1855_v49, %v1788_v30  ;;  %v1870_v4 = vpop.permute.xlu1 %1869 }
 0x58a   : > { %v1972_v8 = vadd.f32 %v1956_v36, %v1940_v28  ;;  %v1919_v22 = vmul.f32 %v1870_v4, %v1791_v62  ;;  %v1965_v36 = vld [vmem:[%s2786_s28 + $0x70] sm:$0xff] }
 0x58b   : > { %1984 = vst.msk [vmem:[%s2791_s10 + $0x8] sm:$0xff] %vm679_vm4, %v1968_v50  ;;  %v1939_v33 = vmul.f32 %v3388_v45, %v1916_v44 }
 0x58c   : > { %v1865_v42 = vpop.permute.xlu0 %1864  ;;  %1988 = vst.msk [vmem:[%s2791_s10 + $0x28] sm:$0xff] %vm679_vm4, %v1972_v8  ;;  %v1942_v47 = vmul.f32 %v3388_v45, %v1919_v22 }
 0x58d   : > { %v1971_v9 = vadd.f32 %v1955_v12, %v1939_v33  ;;  %v1918_v35 = vmul.f32 %v1865_v42, %v1790_v60  ;;  %v1880_v14 = vpop.permute.xlu1 %1879 }
 0x58e   : > { %v1974_v31 = vadd.f32 %v1958_v2, %v1942_v47  ;;  %v1921_v5 = vmul.f32 %v1880_v14, %v1793_v6 }
 0x58f   : > { %1987 = vst.msk [vmem:[%s2791_s10 + $0x20] sm:$0xff] %vm679_vm4, %v1971_v9  ;;  %v1941_v10 = vmul.f32 %v3388_v45, %v1918_v35 }
 0x590   : > { %v1875_v13 = vpop.permute.xlu0 %1874  ;;  %1990 = vst.msk [vmem:[%s2791_s10 + $0x38] sm:$0xff] %vm679_vm4, %v1974_v31  ;;  %v1944_v16 = vmul.f32 %v3388_v45, %v1921_v5 }
 0x591   : > { %v1973_v23 = vadd.f32 %v1957_v51, %v1941_v10  ;;  %v1920_v15 = vmul.f32 %v1875_v13, %v1792_v52  ;;  %v1890_v48 = vpop.permute.xlu1 %1889 }
 0x592   : > { %v1976_v54 = vadd.f32 %v1960_v37, %v1944_v16  ;;  %v1923_v20 = vmul.f32 %v1890_v48, %v1795_v11 }
 0x593   : > { %1989 = vst.msk [vmem:[%s2791_s10 + $0x30] sm:$0xff] %vm679_vm4, %v1973_v23  ;;  %v1943_v21 = vmul.f32 %v3388_v45, %v1920_v15 }
 0x594   : > { %v1885_v55 = vpop.permute.xlu0 %1884  ;;  %1992 = vst.msk [vmem:[%s2791_s10 + $0x48] sm:$0xff] %vm679_vm4, %v1976_v54  ;;  %v1946_v53 = vmul.f32 %v3388_v45, %v1923_v20 }
 0x595   : > { %v1975_v19 = vadd.f32 %v1959_v17, %v1943_v21  ;;  %v1922_v25 = vmul.f32 %v1885_v55, %v1794_v41  ;;  %v1900_v38 = vpop.permute.xlu1 %1899 }
 0x596   : > { %v1978_v56 = vadd.f32 %v1962_v32, %v1946_v53  ;;  %v1925_v61 = vmul.f32 %v1900_v38, %v1797_v26 }
 0x597   : > { %1991 = vst.msk [vmem:[%s2791_s10 + $0x40] sm:$0xff] %vm679_vm4, %v1975_v19  ;;  %v1945_v46 = vmul.f32 %v3388_v45, %v1922_v25 }
 0x598   : > { %v1895_v34 = vpop.permute.xlu0 %1894  ;;  %1994 = vst.msk [vmem:[%s2791_s10 + $0x58] sm:$0xff] %vm679_vm4, %v1978_v56  ;;  %v1948_v57 = vmul.f32 %v3388_v45, %v1925_v61 }
 0x599   : > { %v1977_v29 = vadd.f32 %v1961_v40, %v1945_v46  ;;  %v1924_v1 = vmul.f32 %v1895_v34, %v1796_v24  ;;  %v1910_v59 = vpop.permute.xlu1 %1909 }
 0x59a   : > { %v1980_v30 = vadd.f32 %v1964_v63, %v1948_v57  ;;  %v1927_v27 = vmul.f32 %v1910_v59, %v1799_v43 }
 0x59b   : > { %1993 = vst.msk [vmem:[%s2791_s10 + $0x50] sm:$0xff] %vm679_vm4, %v1977_v29  ;;  %v1947_v3 = vmul.f32 %v3388_v45, %v1924_v1 }
 0x59c   : > { %v1905_v7 = vpop.permute.xlu0 %1904  ;;  %1996 = vst.msk [vmem:[%s2791_s10 + $0x68] sm:$0xff] %vm679_vm4, %v1980_v30  ;;  %v1950_v50 = vmul.f32 %v3388_v45, %v1927_v27 }
 0x59d   : > { %v1979_v0 = vadd.f32 %v1963_v39, %v1947_v3  ;;  %v1926_v49 = vmul.f32 %v1905_v7, %v1798_v58 }
 0x59e   : > { %v1982_v62 = vadd.f32 %v1966_v18, %v1950_v50 }
 0x59f   : > { %1995 = vst.msk [vmem:[%s2791_s10 + $0x60] sm:$0xff] %vm679_vm4, %v1979_v0  ;;  %v1949_v44 = vmul.f32 %v3388_v45, %v1926_v49 }
 0x5a0   : > { %1998 = vst.msk [vmem:[%s2791_s10 + $0x78] sm:$0xff] %vm679_vm4, %v1982_v62 }
 0x5a1   : > { %v1981_v28 = vadd.f32 %v1965_v36, %v1949_v44 }
 0x5a3   : > { %1997 = vst.msk [vmem:[%s2791_s10 + $0x70] sm:$0xff] %vm679_vm4, %v1981_v28 }
 0x5a4 PF: > { %s23_s19 = sadd.s32 1, %s2676_s19   ;;  %s3488_s28 = sld [smem:[#allocation8_spill]] }
 0x5a5   : > { %p20_p11 = scmp.ge.s32.totalorder %s23_s19, 10   ;;  %s3489_s13 = smov %s2664_s16 }
 0x5a6   : > { %s3490_s14 = smov %s2668_s17  ;;  %s3491_s15 = smov %s2672_s18 }
 0x5a7   : > { %s3492_s16 = smov %s3496_s3  ;;  %s3493_s17 = smov %s3500_s5 }
 0x5a8   :  { %22 = sbr.rel (!%p20_p11) target bundleno = 4 (0x4), region = 97 }
 0x5aa   : > { %s3494_s18 = smov %s3488_s28 }

</bundles_post_ra>
